<compile_context>
chip_gen: v5e
topology: v5e:2x2
jax: 0.10.0
libtpu: 0.0.40
codegen_flags: <defaults>
</compile_context>

<pallas_src>
import jax
import jax.numpy as jnp
from jax import lax
from jax.experimental import pallas as pl
from jax.experimental.pallas import tpu as pltpu

_EPS = 1e-5          # PyTorch BatchNorm2d default eps
_LANE = 128


def _round_up(a, b):
    return (a + b - 1) // b * b


def _vmem_capacity_bytes():
    try:
        info = pltpu.get_tpu_info()
    except Exception:
        return 0
    for attr in ("vmem_capacity_bytes", "vmem_size_bytes", "vmem_bytes"):
        v = getattr(info, attr, None)
        if v:
            try:
                return int(v)
            except Exception:
                pass
    return 0


def _generation_budget():
    """(max M-tile rows, scoped-VMEM limit) picked from the physical VMEM size."""
    vmem = _vmem_capacity_bytes()
    if vmem >= 100 * 1024 * 1024:          # v5e / v6e: 128 MiB physical VMEM
        return 1024, 64 * 1024 * 1024
    if vmem > 0:                           # v7x: 64 MiB physical VMEM per TensorCore
        return 512, 48 * 1024 * 1024
    return 512, 32 * 1024 * 1024           # unknown backend: conservative defaults


def _make_layer_kernel(*, has_norm_in, want_stats, ragged, tm, m_valid):
    """Fused layer: [prev-layer BN (mean,inv_std) + ReLU] -> matmul -> [BN partials]."""

    def kernel(*refs):
        if has_norm_in:
            nrm_ref, a_ref, w_ref, *outs = refs
            mu = nrm_ref[0].astype(jnp.bfloat16)
            inv = nrm_ref[1].astype(jnp.bfloat16)
            # Training-mode BatchNorm2d(1) + ReLU of the previous layer, fused in bf16
            # (ReLU commutes with the positive scale inv_std).
            h = jnp.maximum((a_ref[...] - mu) * inv, 0.0)
        else:
            a_ref, w_ref, *outs = refs
            h = a_ref[...].astype(jnp.bfloat16)   # layer 1: f32 x -> bf16 in-kernel

        # Conv2d(1, C_out, kernel=(1, C_in), bias=False) == per-point matmul (MXU).
        y = jnp.dot(h, w_ref[...], preferred_element_type=jnp.float32)

        if want_stats:
            y_ref, ssum_ref, ssq_ref = outs
        else:
            (y_ref,) = outs
        # Rows past M in the last (ragged) tile are clipped on the HBM write-back,
        # so the stored activation never needs masking.
        y_ref[...] = y.astype(y_ref.dtype)

        if want_stats:
            def put_stats(yv):
                # Per-tile column partial sums for the global BatchNorm2d(1) stats
                # (accumulated in f32; disjoint blocks => no cross-tile accumulator).
                ssum_ref[0] = jnp.sum(yv, axis=0, keepdims=True)
                ssq_ref[0] = jnp.sum(yv * yv, axis=0, keepdims=True)

            if ragged:
                i = pl.program_id(0)
                last = pl.num_programs(0) - 1

                @pl.when(i != last)
                def _():
                    put_stats(y)

                @pl.when(i == last)
                def _():
                    # Only the last tile has out-of-range rows; zero them so the
                    # global batch statistics stay exact (select also kills any
                    # garbage/NaN coming from the boundary input block).
                    rows = i * tm + lax.broadcasted_iota(jnp.int32, (y.shape[0], 1), 0)
                    put_stats(jnp.where(rows < m_valid, y, 0.0))
            else:
                put_stats(y)

    return kernel


def _layer_call(act, w_bf16, *, norm, want_stats, out_dtype, tm, m_valid, vmem_limit):
    """Run one layer over an M-tiled grid. Returns y (and BN mean / inv_std)."""
    nt = (m_valid + tm - 1) // tm
    ragged = (nt * tm != m_valid)
    c_in = act.shape[1]
    c_out = w_bf16.shape[1]

    kernel = _make_layer_kernel(has_norm_in=norm is not None, want_stats=want_stats,
                                ragged=ragged, tm=tm, m_valid=m_valid)

    in_specs, args = [], []
    if norm is not None:
        in_specs.append(pl.BlockSpec(memory_space=pltpu.MemorySpace.SMEM))
        args.append(norm)                                     # (2,) f32: [mean, inv_std]
    in_specs += [
        pl.BlockSpec((tm, c_in), lambda i: (i, 0)),           # streamed activations
        # Resident weights: constant index_map => the pipeline skips the re-fetch each
        # step.  TODO(synk): on v7x, pipeline_mode=pl.Buffered(1) would also drop the
        # second (unused) weight buffer if VMEM headroom ever gets tight.
        pl.BlockSpec((c_in, c_out), lambda i: (0, 0)),
    ]
    args += [act, w_bf16]

    out_specs = [pl.BlockSpec((tm, c_out), lambda i: (i, 0))]
    out_shape = [jax.ShapeDtypeStruct((m_valid, c_out), out_dtype)]
    if want_stats:
        out_specs += [pl.BlockSpec((1, 1, c_out), lambda i: (i, 0, 0))] * 2
        out_shape += [jax.ShapeDtypeStruct((nt, 1, c_out), jnp.float32)] * 2

    outs = pl.pallas_call(
        kernel,
        grid=(nt,),
        in_specs=in_specs,
        out_specs=out_specs,
        out_shape=out_shape,
        compiler_params=pltpu.CompilerParams(
            # M-tiles are fully independent; multi-TensorCore parts (v7x) can shard
            # them.  TODO(synk): if an xprof trace shows one v7x core idle, switch this
            # axis to pltpu.CORE_PARALLEL / an explicit core_map.
            dimension_semantics=("parallel",),
            vmem_limit_bytes=vmem_limit,
        ),
    )(*args)

    if not want_stats:
        return outs[0]

    y, ssum, ssq = outs
    n = jnp.float32(m_valid * c_out)
    mean = jnp.sum(ssum) / n
    # Biased variance (PyTorch normalization path).  One-pass E[y^2]-E[y]^2 kept in
    # f32; fine for NN-scale activations (|mean|/std << 1e3).
    var = jnp.maximum(jnp.sum(ssq) / n - mean * mean, 0.0)
    inv_std = lax.rsqrt(var + jnp.float32(_EPS))
    return y, mean, inv_std


@jax.jit
def segmentation_head(x, w1, w2, w3, w4):
    """x: (N, 1, H, 1088) f32. w_i: PyTorch Conv2d weights (C_out, 1, 1, C_in)."""
    N, one, H, c0 = x.shape
    assert one == 1
    c1, c2, c3 = w1.shape[0], w2.shape[0], w3.shape[0]
    num_classes = w4.shape[0]
    M = N * H

    max_tm, vmem_limit = _generation_budget()
    tm = min(max_tm, _round_up(M, 16))

    # Points-major 2D slab, kept in f32 (free reshape); layer-1 casts to bf16 in VMEM.
    x2d = x.reshape(M, c0)

    # Conv2d weight (C_out,1,1,C_in) -> (C_in, C_out), cast to bf16 once (MXU inputs).
    w1t = w1.reshape(c1, c0).T.astype(jnp.bfloat16)
    w2t = w2.reshape(c2, c1).T.astype(jnp.bfloat16)
    w3t = w3.reshape(c3, c2).T.astype(jnp.bfloat16)
    # Final layer: lane-dense output (classes padded to 128), sliced in the wrapper.
    cN = _round_up(max(num_classes, _LANE), _LANE)
    w4t = jnp.pad(w4.reshape(num_classes, c3).T,
                  ((0, 0), (0, cN - num_classes))).astype(jnp.bfloat16)

    common = dict(tm=tm, m_valid=M, vmem_limit=vmem_limit)

    y1, m1, i1 = _layer_call(x2d, w1t, norm=None, want_stats=True,
                             out_dtype=jnp.bfloat16, **common)            # 1088 -> 512
    y2, m2, i2 = _layer_call(y1, w2t, norm=jnp.stack([m1, i1]), want_stats=True,
                             out_dtype=jnp.bfloat16, **common)            # 512 -> 256
    y3, m3, i3 = _layer_call(y2, w3t, norm=jnp.stack([m2, i2]), want_stats=True,
                             out_dtype=jnp.bfloat16, **common)            # 256 -> 128
    out = _layer_call(y3, w4t, norm=jnp.stack([m3, i3]), want_stats=False,
                      out_dtype=jnp.bfloat16, **common)                   # 128 -> classes

    # Undo the moveaxis(0, -1).T plumbing: output layout (N, 1, H, num_classes).
    return out[:, :num_classes].astype(jnp.float32).reshape(N, 1, H, num_classes)


def _reference(x, w1, w2, w3, w4):
    """Plain-JAX f32 reference mirroring the PyTorch forward (training-mode BN)."""
    def shared(h, w):
        y = h @ w.reshape(w.shape[0], -1).T
        m = y.mean()
        v = jnp.mean(jnp.square(y - m))
        return jnp.maximum((y - m) / jnp.sqrt(v + _EPS), 0.0)

    N, _, H, C = x.shape
    h = x.reshape(N * H, C).astype(jnp.float32)
    h = shared(h, w1)
    h = shared(h, w2)
    h = shared(h, w3)
    o = h @ w4.reshape(w4.shape[0], -1).T
    return o.reshape(N, 1, H, w4.shape[0])


if __name__ == "__main__":
    key = jax.random.PRNGKey(0)
    k_x, k1, k2, k3, k4 = jax.random.split(key, 5)

    N, H = 2, 16           # batch=2, 16 points
    num_classes = 4

    # Input implied by the forward: (N, 1, H, 1088) — 1088 = PointNet concat feature.
    x = jax.random.normal(k_x, (N, 1, H, 1088), dtype=jnp.float32)

    # Deterministic synthetic Conv2d weights, PyTorch layout (C_out, C_in=1, 1, K).
    def init_w(k, c_out, c_in):
        bound = 1.0 / jnp.sqrt(jnp.float32(c_in))
        return jax.random.uniform(k, (c_out, 1, 1, c_in), jnp.float32, -bound, bound)

    w1 = init_w(k1, 512, 1088)
    w2 = init_w(k2, 256, 512)
    w3 = init_w(k3, 128, 256)
    w4 = init_w(k4, num_classes, 128)
    # TODO(synk): BatchNorm running_mean/running_var buffer updates (a training-time
    # side effect) are not materialized; only the forward math is reproduced.

    out = jax.block_until_ready(segmentation_head(x, w1, w2, w3, w4))
    ref = jax.block_until_ready(_reference(x, w1, w2, w3, w4))

    assert out.shape == (N, 1, H, num_classes), out.shape
    assert bool(jnp.all(jnp.isfinite(out)))
    assert jnp.allclose(out, ref, rtol=2e-2, atol=2e-2)
    print("KERNEL_OK")
</pallas_src>

<mosaic_0001>
module attributes {stable_mosaic.version = 11 : i64} {
  func.func @kernel(%arg0: i32, %arg1: memref<32x1088xf32, #tpu.memory_space<vmem>>, %arg2: memref<1088x512xbf16, #tpu.memory_space<vmem>>, %arg3: memref<32x512xbf16, #tpu.memory_space<vmem>>, %arg4: memref<1x1x512xf32, #tpu.memory_space<vmem>>, %arg5: memref<1x1x512xf32, #tpu.memory_space<vmem>>) attributes {dimension_semantics = [#tpu.dimension_semantics<parallel>], iteration_bounds = array<i64: 1>, scalar_prefetch = 0 : i64, scratch_operands = 0 : i64, tpu.core_type = #tpu.core_type<tc>, window_params = [{transform_indices = @transform_0, window_bounds = array<i64: 32, 1088>}, {pipeline_mode = #tpu.pipeline_mode<synchronous>, transform_indices = @transform_1, window_bounds = array<i64: 1088, 512>}, {transform_indices = @transform_2, window_bounds = array<i64: 32, 512>}, {transform_indices = @transform_3, window_bounds = array<i64: 1, 1, 512>}, {transform_indices = @transform_4, window_bounds = array<i64: 1, 1, 512>}]} {
    %c0 = arith.constant 0 : index
    %c0_0 = arith.constant 0 : index
    %0 = vector.load %arg1[%c0, %c0_0] : memref<32x1088xf32, #tpu.memory_space<vmem>>, vector<32x1088xf32>
    %1 = arith.truncf %0 : vector<32x1088xf32> to vector<32x1088xbf16>
    %c0_1 = arith.constant 0 : index
    %c0_2 = arith.constant 0 : index
    %2 = vector.load %arg2[%c0_1, %c0_2] : memref<1088x512xbf16, #tpu.memory_space<vmem>>, vector<1088x512xbf16>
    %cst = arith.constant dense<0.000000e+00> : vector<32x512xf32>
    %3 = tpu.matmul %1, %2, %cst {dimension_numbers = #tpu.dot_dimension_numbers<[1], [0], [0], [1], [0, 0, 1, 1], [], []>} : vector<32x1088xbf16>, vector<1088x512xbf16>, vector<32x512xf32> -> vector<32x512xf32>
    %4 = arith.truncf %3 : vector<32x512xf32> to vector<32x512xbf16>
    %c0_3 = arith.constant 0 : index
    %c0_4 = arith.constant 0 : index
    %5 = vector.load %arg3[%c0_3, %c0_4] : memref<32x512xbf16, #tpu.memory_space<vmem>>, vector<32x512xbf16>
    tpu.vector_store %arg3[%c0_3, %c0_4], %4 {strides = array<i32>} : memref<32x512xbf16, #tpu.memory_space<vmem>>, vector<32x512xbf16>,
    %cst_5 = arith.constant dense<0.000000e+00> : vector<512xf32>
    %6 = vector.multi_reduction <add>, %3, %cst_5 [0] : vector<32x512xf32> to vector<512xf32>
    %7 = vector.shape_cast %6 : vector<512xf32> to vector<1x512xf32>
    %c0_6 = arith.constant 0 : index
    %c0_7 = arith.constant 0 : index
    %c0_8 = arith.constant 0 : index
    %8 = vector.load %arg4[%c0_6, %c0_7, %c0_8] : memref<1x1x512xf32, #tpu.memory_space<vmem>>, vector<1x1x512xf32>
    %9 = vector.shape_cast %8 : vector<1x1x512xf32> to vector<1x512xf32>
    %10 = vector.shape_cast %7 : vector<1x512xf32> to vector<1x1x512xf32>
    tpu.vector_store %arg4[%c0_6, %c0_7, %c0_8], %10 {strides = array<i32>} : memref<1x1x512xf32, #tpu.memory_space<vmem>>, vector<1x1x512xf32>,
    %11 = arith.mulf %3, %3 : vector<32x512xf32>
    %cst_9 = arith.constant dense<0.000000e+00> : vector<512xf32>
    %12 = vector.multi_reduction <add>, %11, %cst_9 [0] : vector<32x512xf32> to vector<512xf32>
    %13 = vector.shape_cast %12 : vector<512xf32> to vector<1x512xf32>
    %c0_10 = arith.constant 0 : index
    %c0_11 = arith.constant 0 : index
    %c0_12 = arith.constant 0 : index
    %14 = vector.load %arg5[%c0_10, %c0_11, %c0_12] : memref<1x1x512xf32, #tpu.memory_space<vmem>>, vector<1x1x512xf32>
    %15 = vector.shape_cast %14 : vector<1x1x512xf32> to vector<1x512xf32>
    %16 = vector.shape_cast %13 : vector<1x512xf32> to vector<1x1x512xf32>
    tpu.vector_store %arg5[%c0_10, %c0_11, %c0_12], %16 {strides = array<i32>} : memref<1x1x512xf32, #tpu.memory_space<vmem>>, vector<1x1x512xf32>,
    return
  }
  func.func @transform_0(%arg0: i32) -> (i32, i32) {
    %c0_i32 = arith.constant 0 : i32
    %c0_i32_0 = arith.constant 0 : i32
    return %arg0, %c0_i32 : i32, i32
  }
  func.func @transform_1(%arg0: i32) -> (i32, i32) {
    %c0_i32 = arith.constant 0 : i32
    %c0_i32_0 = arith.constant 0 : i32
    %c0_i32_1 = arith.constant 0 : i32
    return %c0_i32, %c0_i32_0 : i32, i32
  }
  func.func @transform_2(%arg0: i32) -> (i32, i32) {
    %c0_i32 = arith.constant 0 : i32
    %c0_i32_0 = arith.constant 0 : i32
    return %arg0, %c0_i32 : i32, i32
  }
  func.func @transform_3(%arg0: i32) -> (i32, i32, i32) {
    %c0_i32 = arith.constant 0 : i32
    %c0_i32_0 = arith.constant 0 : i32
    %c0_i32_1 = arith.constant 0 : i32
    return %arg0, %c0_i32, %c0_i32_0 : i32, i32, i32
  }
  func.func @transform_4(%arg0: i32) -> (i32, i32, i32) {
    %c0_i32 = arith.constant 0 : i32
    %c0_i32_0 = arith.constant 0 : i32
    %c0_i32_1 = arith.constant 0 : i32
    return %arg0, %c0_i32, %c0_i32_0 : i32, i32, i32
  }
}

module attributes {stable_mosaic.version = 11 : i64} {
  func.func @kernel(%arg0: i32, %arg1: memref<2xf32, #tpu.memory_space<smem>>, %arg2: memref<32x512xbf16, #tpu.memory_space<vmem>>, %arg3: memref<512x256xbf16, #tpu.memory_space<vmem>>, %arg4: memref<32x256xbf16, #tpu.memory_space<vmem>>, %arg5: memref<1x1x256xf32, #tpu.memory_space<vmem>>, %arg6: memref<1x1x256xf32, #tpu.memory_space<vmem>>) attributes {dimension_semantics = [#tpu.dimension_semantics<parallel>], iteration_bounds = array<i64: 1>, scalar_prefetch = 0 : i64, scratch_operands = 0 : i64, tpu.core_type = #tpu.core_type<tc>, window_params = [{transform_indices = @transform_0, window_bounds = array<i64: 2>}, {transform_indices = @transform_1, window_bounds = array<i64: 32, 512>}, {pipeline_mode = #tpu.pipeline_mode<synchronous>, transform_indices = @transform_2, window_bounds = array<i64: 512, 256>}, {transform_indices = @transform_3, window_bounds = array<i64: 32, 256>}, {transform_indices = @transform_4, window_bounds = array<i64: 1, 1, 256>}, {transform_indices = @transform_5, window_bounds = array<i64: 1, 1, 256>}]} {
    %c0 = arith.constant 0 : index
    %0 = memref.load %arg1[%c0] : memref<2xf32, #tpu.memory_space<smem>>
    %1 = arith.truncf %0 : f32 to bf16
    %c1 = arith.constant 1 : index
    %2 = memref.load %arg1[%c1] : memref<2xf32, #tpu.memory_space<smem>>
    %3 = arith.truncf %2 : f32 to bf16
    %c0_0 = arith.constant 0 : index
    %c0_1 = arith.constant 0 : index
    %4 = vector.load %arg2[%c0_0, %c0_1] : memref<32x512xbf16, #tpu.memory_space<vmem>>, vector<32x512xbf16>
    %5 = vector.broadcast %1 : bf16 to vector<32x512xbf16>
    %6 = arith.subf %4, %5 : vector<32x512xbf16>
    %7 = vector.broadcast %3 : bf16 to vector<32x512xbf16>
    %8 = arith.mulf %6, %7 : vector<32x512xbf16>
    %cst = arith.constant 0.000000e+00 : bf16
    %9 = vector.broadcast %cst : bf16 to vector<32x512xbf16>
    %10 = arith.maximumf %8, %9 : vector<32x512xbf16>
    %c0_2 = arith.constant 0 : index
    %c0_3 = arith.constant 0 : index
    %11 = vector.load %arg3[%c0_2, %c0_3] : memref<512x256xbf16, #tpu.memory_space<vmem>>, vector<512x256xbf16>
    %cst_4 = arith.constant dense<0.000000e+00> : vector<32x256xf32>
    %12 = tpu.matmul %10, %11, %cst_4 {dimension_numbers = #tpu.dot_dimension_numbers<[1], [0], [0], [1], [0, 0, 1, 1], [], []>} : vector<32x512xbf16>, vector<512x256xbf16>, vector<32x256xf32> -> vector<32x256xf32>
    %13 = arith.truncf %12 : vector<32x256xf32> to vector<32x256xbf16>
    %c0_5 = arith.constant 0 : index
    %c0_6 = arith.constant 0 : index
    %14 = vector.load %arg4[%c0_5, %c0_6] : memref<32x256xbf16, #tpu.memory_space<vmem>>, vector<32x256xbf16>
    tpu.vector_store %arg4[%c0_5, %c0_6], %13 {strides = array<i32>} : memref<32x256xbf16, #tpu.memory_space<vmem>>, vector<32x256xbf16>,
    %cst_7 = arith.constant dense<0.000000e+00> : vector<256xf32>
    %15 = vector.multi_reduction <add>, %12, %cst_7 [0] : vector<32x256xf32> to vector<256xf32>
    %16 = vector.shape_cast %15 : vector<256xf32> to vector<1x256xf32>
    %c0_8 = arith.constant 0 : index
    %c0_9 = arith.constant 0 : index
    %c0_10 = arith.constant 0 : index
    %17 = vector.load %arg5[%c0_8, %c0_9, %c0_10] : memref<1x1x256xf32, #tpu.memory_space<vmem>>, vector<1x1x256xf32>
    %18 = vector.shape_cast %17 : vector<1x1x256xf32> to vector<1x256xf32>
    %19 = vector.shape_cast %16 : vector<1x256xf32> to vector<1x1x256xf32>
    tpu.vector_store %arg5[%c0_8, %c0_9, %c0_10], %19 {strides = array<i32>} : memref<1x1x256xf32, #tpu.memory_space<vmem>>, vector<1x1x256xf32>,
    %20 = arith.mulf %12, %12 : vector<32x256xf32>
    %cst_11 = arith.constant dense<0.000000e+00> : vector<256xf32>
    %21 = vector.multi_reduction <add>, %20, %cst_11 [0] : vector<32x256xf32> to vector<256xf32>
    %22 = vector.shape_cast %21 : vector<256xf32> to vector<1x256xf32>
    %c0_12 = arith.constant 0 : index
    %c0_13 = arith.constant 0 : index
    %c0_14 = arith.constant 0 : index
    %23 = vector.load %arg6[%c0_12, %c0_13, %c0_14] : memref<1x1x256xf32, #tpu.memory_space<vmem>>, vector<1x1x256xf32>
    %24 = vector.shape_cast %23 : vector<1x1x256xf32> to vector<1x256xf32>
    %25 = vector.shape_cast %22 : vector<1x256xf32> to vector<1x1x256xf32>
    tpu.vector_store %arg6[%c0_12, %c0_13, %c0_14], %25 {strides = array<i32>} : memref<1x1x256xf32, #tpu.memory_space<vmem>>, vector<1x1x256xf32>,
    return
  }
  func.func @transform_0(%arg0: i32) -> i32 {
    %c0_i32 = arith.constant 0 : i32
    %c0_i32_0 = arith.constant 0 : i32
    return %c0_i32 : i32
  }
  func.func @transform_1(%arg0: i32) -> (i32, i32) {
    %c0_i32 = arith.constant 0 : i32
    %c0_i32_0 = arith.constant 0 : i32
    return %arg0, %c0_i32 : i32, i32
  }
  func.func @transform_2(%arg0: i32) -> (i32, i32) {
    %c0_i32 = arith.constant 0 : i32
    %c0_i32_0 = arith.constant 0 : i32
    %c0_i32_1 = arith.constant 0 : i32
    return %c0_i32, %c0_i32_0 : i32, i32
  }
  func.func @transform_3(%arg0: i32) -> (i32, i32) {
    %c0_i32 = arith.constant 0 : i32
    %c0_i32_0 = arith.constant 0 : i32
    return %arg0, %c0_i32 : i32, i32
  }
  func.func @transform_4(%arg0: i32) -> (i32, i32, i32) {
    %c0_i32 = arith.constant 0 : i32
    %c0_i32_0 = arith.constant 0 : i32
    %c0_i32_1 = arith.constant 0 : i32
    return %arg0, %c0_i32, %c0_i32_0 : i32, i32, i32
  }
  func.func @transform_5(%arg0: i32) -> (i32, i32, i32) {
    %c0_i32 = arith.constant 0 : i32
    %c0_i32_0 = arith.constant 0 : i32
    %c0_i32_1 = arith.constant 0 : i32
    return %arg0, %c0_i32, %c0_i32_0 : i32, i32, i32
  }
}

module attributes {stable_mosaic.version = 11 : i64} {
  func.func @kernel(%arg0: i32, %arg1: memref<2xf32, #tpu.memory_space<smem>>, %arg2: memref<32x256xbf16, #tpu.memory_space<vmem>>, %arg3: memref<256x128xbf16, #tpu.memory_space<vmem>>, %arg4: memref<32x128xbf16, #tpu.memory_space<vmem>>, %arg5: memref<1x1x128xf32, #tpu.memory_space<vmem>>, %arg6: memref<1x1x128xf32, #tpu.memory_space<vmem>>) attributes {dimension_semantics = [#tpu.dimension_semantics<parallel>], iteration_bounds = array<i64: 1>, scalar_prefetch = 0 : i64, scratch_operands = 0 : i64, tpu.core_type = #tpu.core_type<tc>, window_params = [{transform_indices = @transform_0, window_bounds = array<i64: 2>}, {transform_indices = @transform_1, window_bounds = array<i64: 32, 256>}, {pipeline_mode = #tpu.pipeline_mode<synchronous>, transform_indices = @transform_2, window_bounds = array<i64: 256, 128>}, {transform_indices = @transform_3, window_bounds = array<i64: 32, 128>}, {transform_indices = @transform_4, window_bounds = array<i64: 1, 1, 128>}, {transform_indices = @transform_5, window_bounds = array<i64: 1, 1, 128>}]} {
    %c0 = arith.constant 0 : index
    %0 = memref.load %arg1[%c0] : memref<2xf32, #tpu.memory_space<smem>>
    %1 = arith.truncf %0 : f32 to bf16
    %c1 = arith.constant 1 : index
    %2 = memref.load %arg1[%c1] : memref<2xf32, #tpu.memory_space<smem>>
    %3 = arith.truncf %2 : f32 to bf16
    %c0_0 = arith.constant 0 : index
    %c0_1 = arith.constant 0 : index
    %4 = vector.load %arg2[%c0_0, %c0_1] : memref<32x256xbf16, #tpu.memory_space<vmem>>, vector<32x256xbf16>
    %5 = vector.broadcast %1 : bf16 to vector<32x256xbf16>
    %6 = arith.subf %4, %5 : vector<32x256xbf16>
    %7 = vector.broadcast %3 : bf16 to vector<32x256xbf16>
    %8 = arith.mulf %6, %7 : vector<32x256xbf16>
    %cst = arith.constant 0.000000e+00 : bf16
    %9 = vector.broadcast %cst : bf16 to vector<32x256xbf16>
    %10 = arith.maximumf %8, %9 : vector<32x256xbf16>
    %c0_2 = arith.constant 0 : index
    %c0_3 = arith.constant 0 : index
    %11 = vector.load %arg3[%c0_2, %c0_3] : memref<256x128xbf16, #tpu.memory_space<vmem>>, vector<256x128xbf16>
    %cst_4 = arith.constant dense<0.000000e+00> : vector<32x128xf32>
    %12 = tpu.matmul %10, %11, %cst_4 {dimension_numbers = #tpu.dot_dimension_numbers<[1], [0], [0], [1], [0, 0, 1, 1], [], []>} : vector<32x256xbf16>, vector<256x128xbf16>, vector<32x128xf32> -> vector<32x128xf32>
    %13 = arith.truncf %12 : vector<32x128xf32> to vector<32x128xbf16>
    %c0_5 = arith.constant 0 : index
    %c0_6 = arith.constant 0 : index
    %14 = vector.load %arg4[%c0_5, %c0_6] : memref<32x128xbf16, #tpu.memory_space<vmem>>, vector<32x128xbf16>
    tpu.vector_store %arg4[%c0_5, %c0_6], %13 {strides = array<i32>} : memref<32x128xbf16, #tpu.memory_space<vmem>>, vector<32x128xbf16>,
    %cst_7 = arith.constant dense<0.000000e+00> : vector<128xf32>
    %15 = vector.multi_reduction <add>, %12, %cst_7 [0] : vector<32x128xf32> to vector<128xf32>
    %16 = vector.shape_cast %15 : vector<128xf32> to vector<1x128xf32>
    %c0_8 = arith.constant 0 : index
    %c0_9 = arith.constant 0 : index
    %c0_10 = arith.constant 0 : index
    %17 = vector.load %arg5[%c0_8, %c0_9, %c0_10] : memref<1x1x128xf32, #tpu.memory_space<vmem>>, vector<1x1x128xf32>
    %18 = vector.shape_cast %17 : vector<1x1x128xf32> to vector<1x128xf32>
    %19 = vector.shape_cast %16 : vector<1x128xf32> to vector<1x1x128xf32>
    tpu.vector_store %arg5[%c0_8, %c0_9, %c0_10], %19 {strides = array<i32>} : memref<1x1x128xf32, #tpu.memory_space<vmem>>, vector<1x1x128xf32>,
    %20 = arith.mulf %12, %12 : vector<32x128xf32>
    %cst_11 = arith.constant dense<0.000000e+00> : vector<128xf32>
    %21 = vector.multi_reduction <add>, %20, %cst_11 [0] : vector<32x128xf32> to vector<128xf32>
    %22 = vector.shape_cast %21 : vector<128xf32> to vector<1x128xf32>
    %c0_12 = arith.constant 0 : index
    %c0_13 = arith.constant 0 : index
    %c0_14 = arith.constant 0 : index
    %23 = vector.load %arg6[%c0_12, %c0_13, %c0_14] : memref<1x1x128xf32, #tpu.memory_space<vmem>>, vector<1x1x128xf32>
    %24 = vector.shape_cast %23 : vector<1x1x128xf32> to vector<1x128xf32>
    %25 = vector.shape_cast %22 : vector<1x128xf32> to vector<1x1x128xf32>
    tpu.vector_store %arg6[%c0_12, %c0_13, %c0_14], %25 {strides = array<i32>} : memref<1x1x128xf32, #tpu.memory_space<vmem>>, vector<1x1x128xf32>,
    return
  }
  func.func @transform_0(%arg0: i32) -> i32 {
    %c0_i32 = arith.constant 0 : i32
    %c0_i32_0 = arith.constant 0 : i32
    return %c0_i32 : i32
  }
  func.func @transform_1(%arg0: i32) -> (i32, i32) {
    %c0_i32 = arith.constant 0 : i32
    %c0_i32_0 = arith.constant 0 : i32
    return %arg0, %c0_i32 : i32, i32
  }
  func.func @transform_2(%arg0: i32) -> (i32, i32) {
    %c0_i32 = arith.constant 0 : i32
    %c0_i32_0 = arith.constant 0 : i32
    %c0_i32_1 = arith.constant 0 : i32
    return %c0_i32, %c0_i32_0 : i32, i32
  }
  func.func @transform_3(%arg0: i32) -> (i32, i32) {
    %c0_i32 = arith.constant 0 : i32
    %c0_i32_0 = arith.constant 0 : i32
    return %arg0, %c0_i32 : i32, i32
  }
  func.func @transform_4(%arg0: i32) -> (i32, i32, i32) {
    %c0_i32 = arith.constant 0 : i32
    %c0_i32_0 = arith.constant 0 : i32
    %c0_i32_1 = arith.constant 0 : i32
    return %arg0, %c0_i32, %c0_i32_0 : i32, i32, i32
  }
  func.func @transform_5(%arg0: i32) -> (i32, i32, i32) {
    %c0_i32 = arith.constant 0 : i32
    %c0_i32_0 = arith.constant 0 : i32
    %c0_i32_1 = arith.constant 0 : i32
    return %arg0, %c0_i32, %c0_i32_0 : i32, i32, i32
  }
}

module attributes {stable_mosaic.version = 11 : i64} {
  func.func @kernel(%arg0: i32, %arg1: memref<2xf32, #tpu.memory_space<smem>>, %arg2: memref<32x128xbf16, #tpu.memory_space<vmem>>, %arg3: memref<128x128xbf16, #tpu.memory_space<vmem>>, %arg4: memref<32x128xbf16, #tpu.memory_space<vmem>>) attributes {dimension_semantics = [#tpu.dimension_semantics<parallel>], iteration_bounds = array<i64: 1>, scalar_prefetch = 0 : i64, scratch_operands = 0 : i64, tpu.core_type = #tpu.core_type<tc>, window_params = [{transform_indices = @transform_0, window_bounds = array<i64: 2>}, {transform_indices = @transform_1, window_bounds = array<i64: 32, 128>}, {pipeline_mode = #tpu.pipeline_mode<synchronous>, transform_indices = @transform_2, window_bounds = array<i64: 128, 128>}, {transform_indices = @transform_3, window_bounds = array<i64: 32, 128>}]} {
    %c0 = arith.constant 0 : index
    %0 = memref.load %arg1[%c0] : memref<2xf32, #tpu.memory_space<smem>>
    %1 = arith.truncf %0 : f32 to bf16
    %c1 = arith.constant 1 : index
    %2 = memref.load %arg1[%c1] : memref<2xf32, #tpu.memory_space<smem>>
    %3 = arith.truncf %2 : f32 to bf16
    %c0_0 = arith.constant 0 : index
    %c0_1 = arith.constant 0 : index
    %4 = vector.load %arg2[%c0_0, %c0_1] : memref<32x128xbf16, #tpu.memory_space<vmem>>, vector<32x128xbf16>
    %5 = vector.broadcast %1 : bf16 to vector<32x128xbf16>
    %6 = arith.subf %4, %5 : vector<32x128xbf16>
    %7 = vector.broadcast %3 : bf16 to vector<32x128xbf16>
    %8 = arith.mulf %6, %7 : vector<32x128xbf16>
    %cst = arith.constant 0.000000e+00 : bf16
    %9 = vector.broadcast %cst : bf16 to vector<32x128xbf16>
    %10 = arith.maximumf %8, %9 : vector<32x128xbf16>
    %c0_2 = arith.constant 0 : index
    %c0_3 = arith.constant 0 : index
    %11 = vector.load %arg3[%c0_2, %c0_3] : memref<128x128xbf16, #tpu.memory_space<vmem>>, vector<128x128xbf16>
    %cst_4 = arith.constant dense<0.000000e+00> : vector<32x128xf32>
    %12 = tpu.matmul %10, %11, %cst_4 {dimension_numbers = #tpu.dot_dimension_numbers<[1], [0], [0], [1], [0, 0, 1, 1], [], []>} : vector<32x128xbf16>, vector<128x128xbf16>, vector<32x128xf32> -> vector<32x128xf32>
    %13 = arith.truncf %12 : vector<32x128xf32> to vector<32x128xbf16>
    %c0_5 = arith.constant 0 : index
    %c0_6 = arith.constant 0 : index
    %14 = vector.load %arg4[%c0_5, %c0_6] : memref<32x128xbf16, #tpu.memory_space<vmem>>, vector<32x128xbf16>
    tpu.vector_store %arg4[%c0_5, %c0_6], %13 {strides = array<i32>} : memref<32x128xbf16, #tpu.memory_space<vmem>>, vector<32x128xbf16>,
    return
  }
  func.func @transform_0(%arg0: i32) -> i32 {
    %c0_i32 = arith.constant 0 : i32
    %c0_i32_0 = arith.constant 0 : i32
    return %c0_i32 : i32
  }
  func.func @transform_1(%arg0: i32) -> (i32, i32) {
    %c0_i32 = arith.constant 0 : i32
    %c0_i32_0 = arith.constant 0 : i32
    return %arg0, %c0_i32 : i32, i32
  }
  func.func @transform_2(%arg0: i32) -> (i32, i32) {
    %c0_i32 = arith.constant 0 : i32
    %c0_i32_0 = arith.constant 0 : i32
    %c0_i32_1 = arith.constant 0 : i32
    return %c0_i32, %c0_i32_0 : i32, i32
  }
  func.func @transform_3(%arg0: i32) -> (i32, i32) {
    %c0_i32 = arith.constant 0 : i32
    %c0_i32_0 = arith.constant 0 : i32
    return %arg0, %c0_i32 : i32, i32
  }
}

</mosaic_0001>

<bundles_post_ra>
// kernel: segmentation_head.5
= control target key start
LH: loop header
LB: loop body
LE: loop exit
PB: predicated region body
PF: predicated region fallthrough
CT: control target
= control target key end

     0   :  { %11 = vsyncpa [#allocation3], 0  ;;  %s1144_s21 = smov [#allocation2]   ;;  %s1821_s0 = inlined_call_operand.vmem [shape: f32[2], index: 0, kind: input, shape index: {}]   ;;  %s1822_s1 = inlined_call_operand.vmem [shape: bf16[32,512], index: 1, kind: input, shape index: {}]   ;;  %s1823_s2 = inlined_call_operand.vmem [shape: bf16[512,256], index: 2, kind: input, shape index: {}]   ;;  %s1824_s3 = inlined_call_operand.vmem [shape: bf16[32,256], index: 3, kind: output, shape index: {0}]   ;;  %s1825_s4 = inlined_call_operand.vmem [shape: f32[1,1,256], index: 4, kind: output, shape index: {1}]   ;;  %s1826_s5 = inlined_call_operand.vmem [shape: f32[1,1,256], index: 5, kind: output, shape index: {2}]  }
   0x1   :  { %s17_s20 = sshll.u32 %s1821_s0, 4  ;;  %s18_s20 = int_to_ptr.vmem [resolvable:$true] %s17_s20 }
   0x2   :  { %20 = dma.vmem_to_smem %s18_s20, 16, %s1144_s21, [#allocation3]  }
   0x3   :  { %1142 = dma.done.wait [#allocation3], 16  }
   0x4   :  { %1143 = vsyncadd [#allocation3], 4294967280 }
   0x5   :  { %29 = sfence }
   0x6   :  { %v867_v0 = vld [vmem:[%s1823_s2 + $0x70] sm:$0xf]  ;;  %v1080_v1 = vld [vmem:[%s1823_s2 + $0x74] sm:$0xf0]  ;;  %v859_v11 = vld [vmem:[%s1823_s2 + $0x60] sm:$0xf] }
   0x7   :  { %v931_v2 = vld [vmem:[%s1823_s2 + $0xf0] sm:$0xf]  ;;  %v868_v3 = vor.u32 %v1080_v1, %v867_v0  ;;  %v1096_v4 = vld [vmem:[%s1823_s2 + $0xf4] sm:$0xf0]  ;;  %v1078_v13 = vld [vmem:[%s1823_s2 + $0x64] sm:$0xf0] }
   0x8   :  { %v995_v5 = vld [vmem:[%s1823_s2 + $0x170] sm:$0xf]  ;;  %v1112_v6 = vld [vmem:[%s1823_s2 + $0x174] sm:$0xf0]  ;;  %v932_v7 = vor.u32 %v1096_v4, %v931_v2  ;;  %v923_v14 = vld [vmem:[%s1823_s2 + $0xe0] sm:$0xf]  ;;  %v860_v16 = vor.u32 %v1078_v13, %v859_v11 }
   0x9   :  { %v996_v8 = vor.u32 %v1112_v6, %v995_v5  ;;  %v1059_v9 = vld [vmem:[%s1823_s2 + $0x1f0] sm:$0xf]  ;;  %v1128_v10 = vld [vmem:[%s1823_s2 + $0x1f4] sm:$0xf0]  ;;  %574 = vmatpush.bf16.msra.mxu0 %v868_v3  ;;  %v1094_v15 = vld [vmem:[%s1823_s2 + $0xe4] sm:$0xf0] }
   0xa   :  { %v1060_v12 = vor.u32 %v1128_v10, %v1059_v9  ;;  %593 = vmatpush.bf16.msra.mxu1 %v932_v7  ;;  %v924_v17 = vor.u32 %v1094_v15, %v923_v14  ;;  %v987_v18 = vld [vmem:[%s1823_s2 + $0x160] sm:$0xf]  ;;  %v1110_v19 = vld [vmem:[%s1823_s2 + $0x164] sm:$0xf0]  ;;  %v851_v23 = vld [vmem:[%s1823_s2 + $0x50] sm:$0xf] }
   0xb   :  { %612 = vmatpush.bf16.msra.mxu2 %v996_v8  ;;  %v1051_v20 = vld [vmem:[%s1823_s2 + $0x1e0] sm:$0xf]  ;;  %v988_v21 = vor.u32 %v1110_v19, %v987_v18  ;;  %v1126_v22 = vld [vmem:[%s1823_s2 + $0x1e4] sm:$0xf0]  ;;  %v1076_v24 = vld [vmem:[%s1823_s2 + $0x54] sm:$0xf0] }
   0xc   :  { %631 = vmatpush.bf16.msra.mxu3 %v1060_v12  ;;  %v1052_v25 = vor.u32 %v1126_v22, %v1051_v20  ;;  %v915_v26 = vld [vmem:[%s1823_s2 + $0xd0] sm:$0xf]  ;;  %v1092_v27 = vld [vmem:[%s1823_s2 + $0xd4] sm:$0xf0]  ;;  %v852_v29 = vor.u32 %v1076_v24, %v851_v23  ;;  %v843_v35 = vld [vmem:[%s1823_s2 + $0x40] sm:$0xf] }
   0xd   :  { %v979_v28 = vld [vmem:[%s1823_s2 + $0x150] sm:$0xf]  ;;  %575 = vmatpush.bf16.msra.mxu0 %v860_v16  ;;  %v1108_v30 = vld [vmem:[%s1823_s2 + $0x154] sm:$0xf0]  ;;  %v916_v33 = vor.u32 %v1092_v27, %v915_v26  ;;  %v1074_v36 = vld [vmem:[%s1823_s2 + $0x44] sm:$0xf0] }
   0xe   :  { %v1043_v31 = vld [vmem:[%s1823_s2 + $0x1d0] sm:$0xf]  ;;  %v1124_v32 = vld [vmem:[%s1823_s2 + $0x1d4] sm:$0xf0]  ;;  %594 = vmatpush.bf16.msra.mxu1 %v924_v17  ;;  %v980_v34 = vor.u32 %v1108_v30, %v979_v28  ;;  %v907_v37 = vld [vmem:[%s1823_s2 + $0xc0] sm:$0xf]  ;;  %v844_v44 = vor.u32 %v1074_v36, %v843_v35 }
   0xf   :  { %613 = vmatpush.bf16.msra.mxu2 %v988_v21  ;;  %v1044_v38 = vor.u32 %v1124_v32, %v1043_v31  ;;  %v1090_v39 = vld [vmem:[%s1823_s2 + $0xc4] sm:$0xf0]  ;;  %v971_v40 = vld [vmem:[%s1823_s2 + $0x140] sm:$0xf]  ;;  %v835_v47 = vld [vmem:[%s1823_s2 + $0x30] sm:$0xf] }
  0x10   :  { %632 = vmatpush.bf16.msra.mxu3 %v1052_v25  ;;  %v1106_v41 = vld [vmem:[%s1823_s2 + $0x144] sm:$0xf0]  ;;  %v1035_v42 = vld [vmem:[%s1823_s2 + $0x1c0] sm:$0xf]  ;;  %v908_v45 = vor.u32 %v1090_v39, %v907_v37  ;;  %v1072_v48 = vld [vmem:[%s1823_s2 + $0x34] sm:$0xf0] }
  0x11   :  { %v1122_v43 = vld [vmem:[%s1823_s2 + $0x1c4] sm:$0xf0]  ;;  %576 = vmatpush.bf16.msra.mxu0 %v852_v29  ;;  %v972_v46 = vor.u32 %v1106_v41, %v971_v40  ;;  %v899_v49 = vld [vmem:[%s1823_s2 + $0xb0] sm:$0xf]  ;;  %v1088_v51 = vld [vmem:[%s1823_s2 + $0xb4] sm:$0xf0]  ;;  %v836_v56 = vor.u32 %v1072_v48, %v835_v47 }
  0x12   :  { %595 = vmatpush.bf16.msra.mxu1 %v916_v33  ;;  %v1036_v50 = vor.u32 %v1122_v43, %v1035_v42  ;;  %v963_v52 = vld [vmem:[%s1823_s2 + $0x130] sm:$0xf]  ;;  %v1104_v53 = vld [vmem:[%s1823_s2 + $0x134] sm:$0xf0]  ;;  %v900_v57 = vor.u32 %v1088_v51, %v899_v49  ;;  %v827_v59 = vld [vmem:[%s1823_s2 + $0x20] sm:$0xf] }
  0x13   :  { %614 = vmatpush.bf16.msra.mxu2 %v980_v34  ;;  %v1027_v54 = vld [vmem:[%s1823_s2 + $0x1b0] sm:$0xf]  ;;  %v1120_v55 = vld [vmem:[%s1823_s2 + $0x1b4] sm:$0xf0]  ;;  %v964_v58 = vor.u32 %v1104_v53, %v963_v52  ;;  %v1070_v60 = vld [vmem:[%s1823_s2 + $0x24] sm:$0xf0] }
  0x14   :  { %633 = vmatpush.bf16.msra.mxu3 %v1044_v38  ;;  %v891_v61 = vld [vmem:[%s1823_s2 + $0xa0] sm:$0xf]  ;;  %v1028_v62 = vor.u32 %v1120_v55, %v1027_v54  ;;  %v1086_v63 = vld [vmem:[%s1823_s2 + $0xa4] sm:$0xf0]  ;;  %v828_v4 = vor.u32 %v1070_v60, %v827_v59  ;;  %v819_v5 = vld [vmem:[%s1823_s2 + $0x10] sm:$0xf] }
  0x15   :  { %577 = vmatpush.bf16.msra.mxu0 %v844_v44  ;;  %v955_v0 = vld [vmem:[%s1823_s2 + $0x120] sm:$0xf]  ;;  %v1102_v1 = vld [vmem:[%s1823_s2 + $0x124] sm:$0xf0]  ;;  %v1068_v6 = vld [vmem:[%s1823_s2 + $0x14] sm:$0xf0]  ;;  %v892_v8 = vor.u32 %v1086_v63, %v891_v61 }
  0x16   :  { %596 = vmatpush.bf16.msra.mxu1 %v908_v45  ;;  %v1019_v2 = vld [vmem:[%s1823_s2 + $0x1a0] sm:$0xf]  ;;  %v1118_v3 = vld [vmem:[%s1823_s2 + $0x1a4] sm:$0xf0]  ;;  %v883_v7 = vld [vmem:[%s1823_s2 + $0x90] sm:$0xf]  ;;  %v956_v9 = vor.u32 %v1102_v1, %v955_v0  ;;  %v820_v18 = vor.u32 %v1068_v6, %v819_v5 }
  0x17   :  { %615 = vmatpush.bf16.msra.mxu2 %v972_v46  ;;  %v1084_v10 = vld [vmem:[%s1823_s2 + $0x94] sm:$0xf0]  ;;  %v947_v11 = vld [vmem:[%s1823_s2 + $0x110] sm:$0xf]  ;;  %v1020_v13 = vor.u32 %v1118_v3, %v1019_v2  ;;  %s1346_s29 = sld [smem:[#allocation2]]  ;;  %v1406_v35 = vld [vmem:[%s1822_s1] sm:$0xff] }
  0x18   :  { %634 = vmatpush.bf16.msra.mxu3 %v1036_v50  ;;  %v1100_v12 = vld [vmem:[%s1823_s2 + $0x114] sm:$0xf0]  ;;  %v1011_v14 = vld [vmem:[%s1823_s2 + $0x190] sm:$0xf]  ;;  %v811_v16 = vld [vmem:[%s1823_s2] sm:$0xf]  ;;  %v884_v22 = vor.u32 %v1084_v10, %v883_v7  ;;  %v64_v60 = vunpack.c.l.bf16 %v1406_v35  ;;  %v65_v1 = vunpack.c.h.bf16 %v1406_v35 }
  0x19   :  { %578 = vmatpush.bf16.msra.mxu0 %v836_v56  ;;  %v1116_v15 = vld [vmem:[%s1823_s2 + $0x194] sm:$0xf0]  ;;  %v1066_v17 = vld [vmem:[%s1823_s2 + $0x4] sm:$0xf0]  ;;  %s1354_s9 = sld [smem:[#allocation2 + $0x1]]  ;;  %v948_v23 = vor.u32 %v1100_v12, %v947_v11  ;;  %v1423_v40 = vld [vmem:[%s1822_s1 + $0x10] sm:$0xff] }
  0x1a   :  { %597 = vmatpush.bf16.msra.mxu1 %v900_v57  ;;  %v875_v19 = vld [vmem:[%s1823_s2 + $0x80] sm:$0xf]  ;;  %v1082_v20 = vld [vmem:[%s1823_s2 + $0x84] sm:$0xf0]  ;;  %v1012_v27 = vor.u32 %v1116_v15, %v1011_v14  ;;  %v1111_v28 = vld [vmem:[%s1823_s2 + $0x174] sm:$0xf]  ;;  %v812_v34 = vor.u32 %v1066_v17, %v811_v16  ;;  %v68_v2 = vunpack.c.l.bf16 %v1423_v40  ;;  %v69_v3 = vunpack.c.h.bf16 %v1423_v40 }
  0x1b   :  { %616 = vmatpush.bf16.msra.mxu2 %v964_v58  ;;  %v939_v21 = vld [vmem:[%s1823_s2 + $0x100] sm:$0xf]  ;;  %v1098_v24 = vld [vmem:[%s1823_s2 + $0x104] sm:$0xf0]  ;;  %v997_v29 = vld [vmem:[%s1823_s2 + $0x178] sm:$0xf0]  ;;  %v876_v38 = vor.u32 %v1082_v20, %v875_v19 }
  0x1c   :  { %635 = vmatpush.bf16.msra.mxu3 %v1028_v62  ;;  %v1003_v25 = vld [vmem:[%s1823_s2 + $0x180] sm:$0xf]  ;;  %v1114_v26 = vld [vmem:[%s1823_s2 + $0x184] sm:$0xf0]  ;;  %v1383_v30 = vld [vmem:[%s1823_s2 + $0x74] sm:$0xf]  ;;  %v940_v39 = vor.u32 %v1098_v24, %v939_v21  ;;  %v1000_v45 = vor.u32 %v1111_v28, %v997_v29 }
  0x1d   :  { %579 = vmatpush.bf16.msra.mxu0 %v828_v4  ;;  %v1388_v31 = vld [vmem:[%s1823_s2 + $0x78] sm:$0xf0]  ;;  %v1393_v32 = vld [vmem:[%s1823_s2 + $0xf4] sm:$0xf]  ;;  %p32_p0 = scmp.ne.f32.partialorder %s1346_s29, %s1346_s29  ;;  %s33_s10 = sshrl.u32 %s1346_s29, 16  ;;  %v1004_v43 = vor.u32 %v1114_v26, %v1003_v25  ;;  %v1439_v44 = vld [vmem:[%s1822_s1 + $0x8] sm:$0xff] }
  0x1e   :  { %598 = vmatpush.bf16.msra.mxu1 %v892_v8  ;;  %v1398_v33 = vld [vmem:[%s1823_s2 + $0xf8] sm:$0xf0]  ;;  %v1411_v36 = vld [vmem:[%s1823_s2 + $0x1f4] sm:$0xf]  ;;  %s34_s17 = sand.u32 1, %s33_s10  ;;  %v872_v51 = vor.u32 %v1383_v30, %v1388_v31  ;;  %v1496_v58 = vld [vmem:[%s1822_s1 + $0x20] sm:$0xff]  ;;  %v66_v8 = vunpack.c.l.bf16 %v1439_v44 }
  0x1f   :  { %617 = vmatpush.bf16.msra.mxu2 %v956_v9  ;;  %v1416_v37 = vld [vmem:[%s1823_s2 + $0x1f8] sm:$0xf0]  ;;  %p43_p1 = scmp.ne.f32.partialorder %s1354_s9, %s1354_s9  ;;  %v1428_v41 = vld [vmem:[%s1823_s2 + $0x164] sm:$0xf]  ;;  %v1433_v42 = vld [vmem:[%s1823_s2 + $0x168] sm:$0xf0]  ;;  %v936_v52 = vor.u32 %v1393_v32, %v1398_v33  ;;  %v67_v9 = vunpack.c.h.bf16 %v1439_v44  ;;  %v72_v19 = vunpack.c.l.bf16 %v1496_v58  ;;  %v73_v24 = vunpack.c.h.bf16 %v1496_v58 }
  0x20   :  { %636 = vmatpush.bf16.msra.mxu3 %v1020_v13  ;;  %s35_s24 = sadd.s32 32767, %s34_s17  ;;  %s44_s25 = sshrl.u32 %s1354_s9, 16  ;;  %v1444_v46 = vld [vmem:[%s1823_s2 + $0x64] sm:$0xf]  ;;  %v1449_v47 = vld [vmem:[%s1823_s2 + $0x68] sm:$0xf0]  ;;  %v1064_v55 = vor.u32 %v1411_v36, %v1416_v37  ;;  %v992_v4 = vor.u32 %v1428_v41, %v1433_v42 }
  0x21   :  { %580 = vmatpush.bf16.msra.mxu0 %v820_v18  ;;  %v1454_v48 = vld [vmem:[%s1823_s2 + $0xe4] sm:$0xf]  ;;  %v1459_v49 = vld [vmem:[%s1823_s2 + $0xe8] sm:$0xf0]  ;;  %s36_s12 = sadd.s32 %s35_s24, %s1346_s29  ;;  %s45_s13 = sand.u32 1, %s44_s25  ;;  %v1465_v50 = vld [vmem:[%s1822_s1 + $0x18] sm:$0xff]  ;;  %v864_v10 = vor.u32 %v1444_v46, %v1449_v47 }
  0x22   :  { %599 = vmatpush.bf16.msra.mxu1 %v884_v22  ;;  %v1474_v53 = vld [vmem:[%s1823_s2 + $0x1e4] sm:$0xf]  ;;  %v1479_v54 = vld [vmem:[%s1823_s2 + $0x1e8] sm:$0xf0]  ;;  %s37_s20 = sand.u32 4294901760, %s36_s12  ;;  %s46_s21 = sadd.s32 32767, %s45_s13  ;;  %v928_v11 = vor.u32 %v1454_v48, %v1459_v49  ;;  %v70_v14 = vunpack.c.l.bf16 %v1465_v50  ;;  %v71_v15 = vunpack.c.h.bf16 %v1465_v50 }
  0x23   :  { %618 = vmatpush.bf16.msra.mxu2 %v948_v23  ;;  %v1486_v56 = vld [vmem:[%s1823_s2 + $0x154] sm:$0xf]  ;;  %v1491_v57 = vld [vmem:[%s1823_s2 + $0x158] sm:$0xf0]  ;;  %s1828_s20 = smov (%p32_p0, %s37_s20), 2143289344  ;;  %v1527_v0 = vld [vmem:[%s1822_s1 + $0x28] sm:$0xff]  ;;  %s47_s13 = sadd.s32 %s1354_s9, %s46_s21  ;;  %v1056_v16 = vor.u32 %v1474_v53, %v1479_v54 }
  0x24   :  { %637 = vmatpush.bf16.msra.mxu3 %v1012_v27  ;;  %v1501_v59 = vld [vmem:[%s1822_s1 + $0x30] sm:$0xff]  ;;  %v1517_v62 = vld [vmem:[%s1823_s2 + $0x58] sm:$0xf0]  ;;  %s40_s21 = sshrl.u32 %s1828_s20, 16  ;;  %s48_s22 = sand.u32 4294901760, %s47_s13  ;;  %v984_v21 = vor.u32 %v1486_v56, %v1491_v57  ;;  %v74_v31 = vunpack.c.l.bf16 %v1527_v0  ;;  %v75_v32 = vunpack.c.h.bf16 %v1527_v0  ;;  %vm755_vm0 = vcmask 1040384  }
  0x25   :  { %581 = vmatpush.bf16.msra.mxu0 %v812_v34  ;;  %v1512_v61 = vld [vmem:[%s1823_s2 + $0x54] sm:$0xf]  ;;  %v1538_v5 = vld [vmem:[%s1823_s2 + $0xd8] sm:$0xf0]  ;;  %v1560_v12 = vld [vmem:[%s1823_s2 + $0x144] sm:$0xf]  ;;  %v76_v25 = vunpack.c.l.bf16 %v1501_v59  ;;  %v77_v26 = vunpack.c.h.bf16 %v1501_v59 }
  0x26   :  { %600 = vmatpush.bf16.msra.mxu1 %v876_v38  ;;  %v1522_v63 = vld [vmem:[%s1823_s2 + $0xd4] sm:$0xf]  ;;  %v1548_v7 = vld [vmem:[%s1823_s2 + $0x1d8] sm:$0xf0]  ;;  %v1565_v13 = vld [vmem:[%s1823_s2 + $0x148] sm:$0xf0]  ;;  %v856_v27 = vor.u32 %v1512_v61, %v1517_v62 }
  0x27   :  { %619 = vmatpush.bf16.msra.mxu2 %v940_v39  ;;  %v1543_v6 = vld [vmem:[%s1823_s2 + $0x1d4] sm:$0xf]  ;;  %s1830_s22 = smov (%p43_p1, %s48_s22), 2143289344  ;;  %v1579_v17 = vld [vmem:[%s1823_s2 + $0x44] sm:$0xf]  ;;  %v1590_v20 = vld [vmem:[%s1822_s1 + $0x38] sm:$0xff]  ;;  %v920_v28 = vor.u32 %v1522_v63, %v1538_v5  ;;  %v976_v42 = vor.u32 %v1560_v12, %v1565_v13 }
  0x28   :  { %638 = vmatpush.bf16.msra.mxu3 %v1004_v43  ;;  %v1584_v18 = vld [vmem:[%s1823_s2 + $0x48] sm:$0xf0]  ;;  %s60_s6 = sshll.u32 %s40_s21, 16  ;;  %v1597_v22 = vld [vmem:[%s1823_s2 + $0xc4] sm:$0xf]  ;;  %s51_s1 = sshrl.u32 %s1830_s22, 16  ;;  %v1048_v34 = vor.u32 %v1543_v6, %v1548_v7  ;;  %v78_v36 = vunpack.c.l.bf16 %v1590_v20  ;;  %v79_v37 = vunpack.c.h.bf16 %v1590_v20 }
  0x29   :  { %650 = vmatpush.bf16.msrb.mxu0 %v872_v51  ;;  %v1602_v23 = vld [vmem:[%s1823_s2 + $0xc8] sm:$0xf0]  ;;  %s61_s29 = sor.u32 %s60_s6, %s40_s21  ;;  %v1121_v29 = vld [vmem:[%s1823_s2 + $0x1c4] sm:$0xf]  ;;  %s105_s16 = sshll.u32 %s51_s1, 16  ;;  %v848_v43 = vor.u32 %v1579_v17, %v1584_v18 }
  0x2a   :  { %669 = vmatpush.bf16.msrb.mxu1 %v936_v52  ;;  %v1037_v30 = vld [vmem:[%s1823_s2 + $0x1c8] sm:$0xf0]  ;;  %v62_v33 = vstv %s61_s29  ;;  %v1103_v38 = vld [vmem:[%s1823_s2 + $0x134] sm:$0xf]  ;;  %v965_v39 = vld [vmem:[%s1823_s2 + $0x138] sm:$0xf0]  ;;  %s106_s22 = sor.u32 %s105_s16, %s51_s1  ;;  %v912_v44 = vor.u32 %v1597_v22, %v1602_v23 }
  0x2b   :  { %688 = vmatpush.bf16.msrb.mxu2 %v1000_v45  ;;  %v1630_v41 = vunpack.c.l.bf16 %v62_v33  ;;  %v1071_v45 = vld [vmem:[%s1823_s2 + $0x34] sm:$0xf]  ;;  %v837_v46 = vld [vmem:[%s1823_s2 + $0x38] sm:$0xf0]  ;;  %v107_v47 = vstv %s106_s22  ;;  %v1040_v48 = vor.u32 %v1121_v29, %v1037_v30  ;;  %v968_v49 = vor.u32 %v1103_v38, %v965_v39 }
  0x2c   :  { %707 = vmatpush.bf16.msrb.mxu3 %v1064_v55  ;;  %v840_v50 = vor.u32 %v1071_v45, %v837_v46  ;;  %v1656_v55 = vunpack.c.l.bf16 %v107_v47  ;;  %v1119_v47 = vld [vmem:[%s1823_s2 + $0x1b4] sm:$0xf] }
  0x2d   :  { %651 = vmatpush.bf16.msrb.mxu0 %v864_v10  ;;  %v81_v51 = vsub.f32 %v64_v60, %v1630_v41  ;;  %v82_v52 = vsub.f32 %v65_v1, %v1630_v41  ;;  %v85_v53 = vsub.f32 %v68_v2, %v1630_v41  ;;  %v86_v54 = vsub.f32 %v69_v3, %v1630_v41 }
  0x2e   :  { %670 = vmatpush.bf16.msrb.mxu1 %v928_v11  ;;  %v83_v56 = vsub.f32 %v66_v8, %v1630_v41  ;;  %v84_v57 = vsub.f32 %v67_v9, %v1630_v41  ;;  %v87_v58 = vsub.f32 %v70_v14, %v1630_v41  ;;  %v88_v60 = vsub.f32 %v71_v15, %v1630_v41 }
  0x2f   :  { %689 = vmatpush.bf16.msrb.mxu2 %v992_v4  ;;  %v97_v35 = vpack.c.bf16 %v82_v52, %v81_v51  ;;  %v99_v59 = vpack.c.bf16 %v86_v54, %v85_v53  ;;  %v89_v61 = vsub.f32 %v72_v19, %v1630_v41  ;;  %v90_v62 = vsub.f32 %v73_v24, %v1630_v41  ;;  %v957_v51 = vld [vmem:[%s1823_s2 + $0x128] sm:$0xf0]  ;;  %v1069_v52 = vld [vmem:[%s1823_s2 + $0x24] sm:$0xf] }
  0x30   :  { %708 = vmatpush.bf16.msrb.mxu3 %v1056_v16  ;;  %v98_v40 = vpack.c.bf16 %v84_v57, %v83_v56  ;;  %v93_v63 = vsub.f32 %v76_v25, %v1630_v41  ;;  %v94_v1 = vsub.f32 %v77_v26, %v1630_v41  ;;  %v100_v6 = vpack.c.bf16 %v88_v60, %v87_v58  ;;  %v829_v56 = vld [vmem:[%s1823_s2 + $0x28] sm:$0xf0]  ;;  %v1085_v57 = vld [vmem:[%s1823_s2 + $0xa4] sm:$0xf]  ;;  %v1099_v60 = vld [vmem:[%s1823_s2 + $0x114] sm:$0xf] }
  0x31   :  { %652 = vmatpush.bf16.msrb.mxu0 %v856_v27  ;;  %v109_v2 = vunpack.c.l.bf16 %v97_v35  ;;  %v113_v3 = vunpack.c.l.bf16 %v99_v59  ;;  %v110_v4 = vunpack.c.h.bf16 %v97_v35  ;;  %v114_v5 = vunpack.c.h.bf16 %v99_v59  ;;  %v893_v58 = vld [vmem:[%s1823_s2 + $0xa8] sm:$0xf0] }
  0x32   :  { %671 = vmatpush.bf16.msrb.mxu1 %v920_v28  ;;  %v111_v7 = vunpack.c.l.bf16 %v98_v40  ;;  %v112_v8 = vunpack.c.h.bf16 %v98_v40  ;;  %v101_v9 = vpack.c.bf16 %v90_v62, %v89_v61  ;;  %v115_v14 = vunpack.c.l.bf16 %v100_v6 }
  0x33   :  { %690 = vmatpush.bf16.msrb.mxu2 %v984_v21  ;;  %v126_v10 = vmul.f32 %v1656_v55, %v109_v2  ;;  %v130_v11 = vmul.f32 %v1656_v55, %v113_v3  ;;  %v127_v12 = vmul.f32 %v1656_v55, %v110_v4  ;;  %v131_v13 = vmul.f32 %v1656_v55, %v114_v5  ;;  %v1067_v2 = vld [vmem:[%s1823_s2 + $0x14] sm:$0xf] }
  0x34   :  { %709 = vmatpush.bf16.msrb.mxu3 %v1048_v34  ;;  %v128_v15 = vmul.f32 %v1656_v55, %v111_v7  ;;  %v116_v16 = vunpack.c.h.bf16 %v100_v6  ;;  %v129_v17 = vmul.f32 %v1656_v55, %v112_v8  ;;  %v132_v23 = vmul.f32 %v1656_v55, %v115_v14  ;;  %v821_v7 = vld [vmem:[%s1823_s2 + $0x18] sm:$0xf0]  ;;  %v1083_v8 = vld [vmem:[%s1823_s2 + $0x94] sm:$0xf] }
  0x35   :  { %653 = vmatpush.bf16.msrb.mxu0 %v848_v43  ;;  %v166_v18 = vmax.f32 %v126_v10, 0.0  ;;  %v170_v19 = vmax.f32 %v130_v11, 0.0  ;;  %v167_v21 = vmax.f32 %v127_v12, 0.0  ;;  %v171_v22 = vmax.f32 %v131_v13, 0.0  ;;  %v1115_v14 = vld [vmem:[%s1823_s2 + $0x194] sm:$0xf] }
  0x36   :  { %672 = vmatpush.bf16.msrb.mxu1 %v912_v44  ;;  %v168_v24 = vmax.f32 %v128_v15, 0.0  ;;  %v133_v25 = vmul.f32 %v1656_v55, %v116_v16  ;;  %v169_v26 = vmax.f32 %v129_v17, 0.0  ;;  %v103_v29 = vpack.c.bf16 %v94_v1, %v93_v63  ;;  %v949_v1 = vld [vmem:[%s1823_s2 + $0x118] sm:$0xf0] }
  0x37   :  { %691 = vmatpush.bf16.msrb.mxu2 %v976_v42  ;;  %v1674_v27 = vpack.c.bf16 %v170_v19, %v166_v18  ;;  %v1676_v28 = vpack.c.bf16 %v171_v22, %v167_v21  ;;  %v117_v30 = vunpack.c.l.bf16 %v101_v9  ;;  %v172_v33 = vmax.f32 %v132_v23, 0.0  ;;  %v1087_v42 = vld [vmem:[%s1823_s2 + $0xb4] sm:$0xf]  ;;  %v1013_v15 = vld [vmem:[%s1823_s2 + $0x198] sm:$0xf0] }
  0x38   :  { %710 = vmatpush.bf16.msrb.mxu3 %v1040_v48  ;;  %v173_v34 = vmax.f32 %v133_v25, 0.0  ;;  %v118_v38 = vunpack.c.h.bf16 %v101_v9  ;;  %v91_v39 = vsub.f32 %v74_v31, %v1630_v41  ;;  %v121_v43 = vunpack.c.l.bf16 %v103_v29  ;;  %v901_v31 = vld [vmem:[%s1823_s2 + $0xb8] sm:$0xf0]  ;;  %v1097_v21 = vld [vmem:[%s1823_s2 + $0x104] sm:$0xf] }
  0x39   :  { %654 = vmatpush.bf16.msrb.mxu0 %v840_v50  ;;  %601 = vmatmul.bf16.vlgmr.msra.gmra.mxu1 %v1676_v28  ;;  %v1687_v44 = vmul.f32 %v1656_v55, %v117_v30  ;;  %v122_v45 = vunpack.c.h.bf16 %v103_v29  ;;  %v92_v46 = vsub.f32 %v75_v32, %v1630_v41  ;;  %v1029_v48 = vld [vmem:[%s1823_s2 + $0x1b8] sm:$0xf0]  ;;  %v95_v0 = vsub.f32 %v78_v36, %v1630_v41  ;;  %v1101_v32 = vld [vmem:[%s1823_s2 + $0x124] sm:$0xf]  ;;  %v941_v22 = vld [vmem:[%s1823_s2 + $0x108] sm:$0xf0] }
  0x3a   :  { %582 = vmatmul.bf16.vlgmr.msra.gmra.mxu0 %v1674_v27  ;;  %v1703_v50 = vpack.c.bf16 %v173_v34, %v169_v26  ;;  %v1718_v53 = vmul.f32 %v1656_v55, %v121_v43  ;;  %v1721_v54 = vmul.f32 %v1656_v55, %v118_v38  ;;  %v96_v36 = vsub.f32 %v79_v37, %v1630_v41  ;;  %v1117_v37 = vld [vmem:[%s1823_s2 + $0x1a4] sm:$0xf]  ;;  %v1021_v41 = vld [vmem:[%s1823_s2 + $0x1a8] sm:$0xf0]  ;;  %v885_v9 = vld [vmem:[%s1823_s2 + $0x98] sm:$0xf0] }
  0x3b   :  { %692 = vmatpush.bf16.msrb.mxu2 %v968_v49  ;;  %v1701_v49 = vpack.c.bf16 %v172_v33, %v168_v24  ;;  %v102_v35 = vpack.c.bf16 %v92_v46, %v91_v39  ;;  %v904_v59 = vor.u32 %v1087_v42, %v901_v31  ;;  %v1032_v20 = vor.u32 %v1119_v47, %v1029_v48  ;;  %v1065_v29 = vld [vmem:[%s1823_s2 + $0x4] sm:$0xf]  ;;  %v813_v30 = vld [vmem:[%s1823_s2 + $0x8] sm:$0xf0] }
  0x3c   :  { %639 = vmatmul.bf16.vlgmr.msra.gmra.mxu3 %v1703_v50  ;;  %v174_v61 = vmax.f32 %v1687_v44, 0.0  ;;  %v139_v40 = vmul.f32 %v1656_v55, %v122_v45  ;;  %v104_v62 = vpack.c.bf16 %v96_v36, %v95_v0  ;;  %v960_v63 = vor.u32 %v1101_v32, %v957_v51  ;;  %v1081_v38 = vld [vmem:[%s1823_s2 + $0x84] sm:$0xf]  ;;  %v1005_v44 = vld [vmem:[%s1823_s2 + $0x188] sm:$0xf0] }
  0x3d   :  { %620 = vmatmul.bf16.vlgmr.msra.gmra.mxu2 %v1701_v49  ;;  %v119_v3 = vunpack.c.l.bf16 %v102_v35  ;;  %v120_v4 = vunpack.c.h.bf16 %v102_v35  ;;  %673 = vmatpush.bf16.msrb.mxu1 %v904_v59  ;;  %v832_v5 = vor.u32 %v1069_v52, %v829_v56  ;;  %v896_v6 = vor.u32 %v1085_v57, %v893_v58  ;;  %v1113_v43 = vld [vmem:[%s1823_s2 + $0x184] sm:$0xf] }
  0x3e   :  { %711 = vmatpush.bf16.msrb.mxu3 %v1032_v20  ;;  %v178_v10 = vmax.f32 %v1718_v53, 0.0  ;;  %v175_v11 = vmax.f32 %v1721_v54, 0.0  ;;  %v123_v12 = vunpack.c.l.bf16 %v104_v62  ;;  %v124_v13 = vunpack.c.h.bf16 %v104_v62 }
  0x3f   :  { %693 = vmatpush.bf16.msrb.mxu2 %v960_v63  ;;  %v136_v16 = vmul.f32 %v1656_v55, %v119_v3  ;;  %v137_v17 = vmul.f32 %v1656_v55, %v120_v4  ;;  %655 = vmatpush.bf16.msrb.mxu0 %v832_v5  ;;  %v1024_v18 = vor.u32 %v1117_v37, %v1021_v41  ;;  %v179_v23 = vmax.f32 %v139_v40, 0.0 }
  0x40   :  { %v952_v19 = vor.u32 %v1099_v60, %v949_v1  ;;  %v140_v24 = vmul.f32 %v1656_v55, %v123_v12  ;;  %v141_v25 = vmul.f32 %v1656_v55, %v124_v13  ;;  %v824_v26 = vor.u32 %v1067_v2, %v821_v7  ;;  %v877_v55 = vld [vmem:[%s1823_s2 + $0x88] sm:$0xf0] }
  0x41   :  { %674 = vmatpush.bf16.msrb.mxu1 %v896_v6  ;;  %v888_v33 = vor.u32 %v1083_v8, %v885_v9  ;;  %v1016_v34 = vor.u32 %v1115_v14, %v1013_v15  ;;  %v176_v39 = vmax.f32 %v136_v16, 0.0  ;;  %v944_v42 = vor.u32 %v1097_v21, %v941_v22 }
  0x42   :  { %712 = vmatpush.bf16.msrb.mxu3 %v1024_v18  ;;  %v180_v45 = vmax.f32 %v140_v24, 0.0  ;;  %v177_v46 = vmax.f32 %v137_v17, 0.0  ;;  %v181_v31 = vmax.f32 %v141_v25, 0.0  ;;  %v816_v47 = vor.u32 %v1065_v29, %v813_v30 }
  0x43   :  { %694 = vmatpush.bf16.msrb.mxu2 %v952_v19  ;;  %656 = vmatpush.bf16.msrb.mxu0 %v824_v26  ;;  %v186_v48 = vpack.c.bf16 %v178_v10, %v174_v61  ;;  %v187_v0 = vpack.c.bf16 %v179_v23, %v175_v11  ;;  %v880_v32 = vor.u32 %v1081_v38, %v877_v55 }
  0x44   :  { %v1008_v51 = vor.u32 %v1113_v43, %v1005_v44  ;;  %v188_v52 = vpack.c.bf16 %v180_v45, %v176_v39  ;;  %v189_v53 = vpack.c.bf16 %v181_v31, %v177_v46 }
  0x45   :  { %675 = vmatpush.bf16.msrb.mxu1 %v888_v33 }
  0x46   :  { %713 = vmatpush.bf16.msrb.mxu3 %v1016_v34 }
  0x47   :  { %695 = vmatpush.bf16.msrb.mxu2 %v944_v42  ;;  %657 = vmatpush.bf16.msrb.mxu0 %v816_v47 }
  0x49   :  { %606 = vmatmul.bf16.gmra.mxu1 %v187_v0 }
  0x4a   :  { %587 = vmatmul.bf16.gmra.mxu0 %v186_v48  ;;  %676 = vmatpush.bf16.msrb.mxu1 %v880_v32 }
  0x4b   :  { %714 = vmatpush.bf16.msrb.mxu3 %v1008_v51 }
  0x4c   :  { %644 = vmatmul.bf16.gmra.mxu3 %v189_v53 }
  0x4d   :  { %625 = vmatmul.bf16.gmra.mxu2 %v188_v52 }
  0x59   :  { %677 = vmatmul.bf16.vlgmr.msrb.gmra.mxu1 %v1676_v28 }
  0x5a   :  { %658 = vmatmul.bf16.vlgmr.msrb.gmra.mxu0 %v1674_v27 }
  0x5c   :  { %715 = vmatmul.bf16.vlgmr.msrb.gmra.mxu3 %v1703_v50 }
  0x5d   :  { %696 = vmatmul.bf16.vlgmr.msrb.gmra.mxu2 %v1701_v49 }
  0x69   :  { %682 = vmatmul.bf16.gmra.mxu1 %v187_v0 }
  0x6a   :  { %663 = vmatmul.bf16.gmra.mxu0 %v186_v48 }
  0x6c   :  { %720 = vmatmul.bf16.gmra.mxu3 %v189_v53 }
  0x6d   :  { %701 = vmatmul.bf16.gmra.mxu2 %v188_v52 }
  0xb6   :  { %v602_v36 = vpop.f32.mrf.mxu1 }
  0xb7   :  { %v583_v54 = vpop.f32.mrf.mxu0 }
  0xb8   :  { %v603_v63 = vadd.f32 %v602_v36, %v583_v54 }
  0xbe   :  { %v604_v57 = vpop.f32.mrf.mxu1 }
  0xbf   :  { %v585_v56 = vpop.f32.mrf.mxu0  ;;  %v640_v35 = vpop.f32.mrf.mxu3 }
  0xc0   :  { %v621_v58 = vpop.f32.mrf.mxu2  ;;  %v605_v8 = vadd.f32 %v604_v57, %v585_v56 }
  0xc1   :  { %v622_v2 = vadd.f32 %v621_v58, %v603_v63 }
  0xc3   :  { %v641_v10 = vadd.f32 %v640_v35, %v622_v2 }
  0xc5   :  { %v763_v38 = vmul.f32 %v641_v10, %v641_v10 }
  0xc6   :  { %v607_v20 = vpop.f32.mrf.mxu1 }
  0xc7   :  { %v588_v59 = vpop.f32.mrf.mxu0  ;;  %v642_v27 = vpop.f32.mrf.mxu3 }
  0xc8   :  { %v623_v37 = vpop.f32.mrf.mxu2  ;;  %v608_v9 = vadd.f32 %v607_v20, %v588_v59 }
  0xc9   :  { %v624_v12 = vadd.f32 %v623_v37, %v605_v8 }
  0xcb   :  { %v643_v17 = vadd.f32 %v642_v27, %v624_v12 }
  0xcd   :  { %v765_v29 = vmul.f32 %v643_v17, %v643_v17  ;;  %v734_v39 = vadd.f32 %v643_v17, %v641_v10 }
  0xce   :  { %v609_v28 = vpop.f32.mrf.mxu1 }
  0xcf   :  { %v590_v41 = vpop.f32.mrf.mxu0  ;;  %v645_v49 = vpop.f32.mrf.mxu3  ;;  %v771_v42 = vadd.f32 %v765_v29, %v763_v38 }
  0xd0   :  { %v626_v60 = vpop.f32.mrf.mxu2  ;;  %v610_v15 = vadd.f32 %v609_v28, %v590_v41 }
  0xd1   :  { %v627_v14 = vadd.f32 %v626_v60, %v608_v9 }
  0xd3   :  { %v646_v23 = vadd.f32 %v645_v49, %v627_v14 }
  0xd5   :  { %v767_v55 = vmul.f32 %v646_v23, %v646_v23  ;;  %v735_v46 = vadd.f32 %v734_v39, %v646_v23 }
  0xd6   :  { %v678_v50 = vpop.f32.mrf.mxu1 }
  0xd7   :  { %v659_v61 = vpop.f32.mrf.mxu0  ;;  %v647_v62 = vpop.f32.mrf.mxu3  ;;  %v772_v47 = vadd.f32 %v771_v42, %v767_v55 }
  0xd8   :  { %v628_v40 = vpop.f32.mrf.mxu2  ;;  %v679_v1 = vadd.f32 %v678_v50, %v659_v61 }
  0xd9   :  { %v629_v18 = vadd.f32 %v628_v40, %v610_v15  ;;  %v758_v15 = vlaneseq }
  0xdb   :  { %v648_v30 = vadd.f32 %v647_v62, %v629_v18  ;;  %vm760_vm1 = vcmp.lt.s32.totalorder %v758_v15, 256 }
  0xdd   :  { %v769_v43 = vmul.f32 %v648_v30, %v648_v30  ;;  %v736_v48 = vadd.f32 %v735_v46, %v648_v30 }
  0xde   :  { %v680_v4 = vpop.f32.mrf.mxu1 }
  0xdf   :  { %v661_v3 = vpop.f32.mrf.mxu0  ;;  %v716_v6 = vpop.f32.mrf.mxu3  ;;  %v773_v32 = vadd.f32 %v772_v47, %v769_v43  ;;  %v737_v54 = vrot.slane %v736_v48, 4 }
  0xe0   :  { %v697_v5 = vpop.f32.mrf.mxu2  ;;  %v681_v16 = vadd.f32 %v680_v4, %v661_v3 }
  0xe1   :  { %v698_v7 = vadd.f32 %v697_v5, %v679_v1  ;;  %v774_v57 = vrot.slane %v773_v32, 4  ;;  %v738_v41 = vadd.f32 %v737_v54, %v736_v48 }
  0xe3   :  { %v717_v11 = vadd.f32 %v716_v6, %v698_v7  ;;  %v775_v61 = vadd.f32 %v774_v57, %v773_v32  ;;  %v739_v1 = vrot.slane %v738_v41, 2 }
  0xe5   :  { %v726_v13 = vpack.c.bf16 %v717_v11, %v641_v10  ;;  %v764_v35 = vmul.f32 %v717_v11, %v717_v11  ;;  %v776_v4 = vrot.slane %v775_v61, 2  ;;  %v740_v7 = vadd.f32 %v739_v1, %v738_v41 }
  0xe6   :  { %v683_v25 = vpop.f32.mrf.mxu1 }
  0xe7   :  { %730 = vst [vmem:[%s1824_s3] sm:$0xff] %v726_v13  ;;  %v718_v21 = vpop.f32.mrf.mxu3  ;;  %v664_v24 = vpop.f32.mrf.mxu0  ;;  %v777_v10 = vadd.f32 %v776_v4, %v775_v61  ;;  %v741_v13 = vrot.slane %v740_v7, 1 }
  0xe8   :  { %v699_v19 = vpop.f32.mrf.mxu2  ;;  %v684_v34 = vadd.f32 %v683_v25, %v664_v24 }
  0xe9   :  { %v700_v22 = vadd.f32 %v699_v19, %v681_v16 }
  0xeb   :  { %v719_v26 = vadd.f32 %v718_v21, %v700_v22  ;;  %v742_v21 = vadd.f32 %v741_v13, %v740_v7 }
  0xed   :  { %v727_v33 = vpack.c.bf16 %v719_v26, %v643_v17  ;;  %v766_v36 = vmul.f32 %v719_v26, %v719_v26  ;;  %v743_v59 = vadd.f32 %v719_v26, %v717_v11  ;;  %v778_v17 = vrot.slane %v777_v10, 1 }
  0xee   :  { %v685_v52 = vpop.f32.mrf.mxu1 }
  0xef   :  { %731 = vst [vmem:[%s1824_s3 + $0x8] sm:$0xff] %v727_v33  ;;  %v721_v45 = vpop.f32.mrf.mxu3  ;;  %v666_v51 = vpop.f32.mrf.mxu0  ;;  %v780_v28 = vadd.f32 %v766_v36, %v764_v35  ;;  %v779_v24 = vadd.f32 %v778_v17, %v777_v10 }
  0xf0   :  { %v702_v44 = vpop.f32.mrf.mxu2  ;;  %v686_v56 = vadd.f32 %v685_v52, %v666_v51 }
  0xf1   :  { %v703_v31 = vadd.f32 %v702_v44, %v684_v34 }
  0xf3   :  { %v722_v0 = vadd.f32 %v721_v45, %v703_v31 }
  0xf5   :  { %v728_v53 = vpack.c.bf16 %v722_v0, %v646_v23  ;;  %v768_v20 = vmul.f32 %v722_v0, %v722_v0  ;;  %v744_v60 = vadd.f32 %v743_v59, %v722_v0 }
  0xf7   :  { %732 = vst [vmem:[%s1824_s3 + $0x10] sm:$0xff] %v728_v53  ;;  %v723_v27 = vpop.f32.mrf.mxu3  ;;  %v781_v50 = vadd.f32 %v780_v28, %v768_v20 }
  0xf8   :  { %v704_v58 = vpop.f32.mrf.mxu2 }
  0xf9   :  { %v705_v37 = vadd.f32 %v704_v58, %v686_v56 }
  0xfb   :  { %v724_v49 = vadd.f32 %v723_v27, %v705_v37 }
  0xfd   :  { %v729_v40 = vpack.c.bf16 %v724_v49, %v648_v30  ;;  %v745_v62 = vadd.f32 %v744_v60, %v724_v49  ;;  %v770_v63 = vmul.f32 %v724_v49, %v724_v49 }
  0xff   :  { %733 = vst [vmem:[%s1824_s3 + $0x18] sm:$0xff] %v729_v40  ;;  %v746_v2 = vrot.slane %v745_v62, 4  ;;  %v782_v3 = vadd.f32 %v781_v50, %v770_v63 }
 0x101   :  { %v747_v5 = vadd.f32 %v746_v2, %v745_v62  ;;  %v783_v6 = vrot.slane %v782_v3, 4 }
 0x103   :  { %v748_v8 = vrot.slane %v747_v5, 2  ;;  %v784_v9 = vadd.f32 %v783_v6, %v782_v3 }
 0x105   :  { %v749_v11 = vadd.f32 %v748_v8, %v747_v5  ;;  %v785_v12 = vrot.slane %v784_v9, 2 }
 0x107   :  { %v750_v14 = vrot.slane %v749_v11, 1  ;;  %v786_v16 = vadd.f32 %v785_v12, %v784_v9 }
 0x109   :  { %v751_v18 = vadd.f32 %v750_v14, %v749_v11  ;;  %v787_v19 = vrot.slane %v786_v16, 1 }
 0x10b   :  { %v754_v22 = vrot.slane %v751_v18, 7  ;;  %v788_v23 = vadd.f32 %v787_v19, %v786_v16 }
 0x10d   :  { %v756_v25 = vsel %vm755_vm0, %v742_v21, %v754_v22  ;;  %v791_v26 = vrot.slane %v788_v23, 7 }
 0x10e   :  { %762 = vst.msk [vmem:[%s1825_s4] sm:$0x3] %vm760_vm1, %v756_v25 }
 0x10f   :  { %v792_v29 = vsel %vm755_vm0, %v779_v24, %v791_v26 }
 0x110   :  { %794 = vst.msk [vmem:[%s1826_s5] sm:$0x3] %vm760_vm1, %v792_v29 }
 0x111   :  { %807 = vsyncpa [#allocation3], 1 }

// kernel: segmentation_head.6
= control target key start
LH: loop header
LB: loop body
LE: loop exit
PB: predicated region body
PF: predicated region fallthrough
CT: control target
= control target key end

     0   :  { %11 = vsyncpa [#allocation3], 0  ;;  %s460_s21 = smov [#allocation2]   ;;  %s584_s0 = inlined_call_operand.vmem [shape: f32[2], index: 0, kind: input, shape index: {}]   ;;  %s585_s1 = inlined_call_operand.vmem [shape: bf16[32,256], index: 1, kind: input, shape index: {}]   ;;  %s586_s2 = inlined_call_operand.vmem [shape: bf16[256,128], index: 2, kind: input, shape index: {}]   ;;  %s587_s3 = inlined_call_operand.vmem [shape: bf16[32,128], index: 3, kind: output, shape index: {0}]   ;;  %s588_s4 = inlined_call_operand.vmem [shape: f32[1,1,128], index: 4, kind: output, shape index: {1}]   ;;  %s589_s5 = inlined_call_operand.vmem [shape: f32[1,1,128], index: 5, kind: output, shape index: {2}]  }
   0x1   :  { %s17_s20 = sshll.u32 %s584_s0, 4  ;;  %s18_s20 = int_to_ptr.vmem [resolvable:$true] %s17_s20 }
   0x2   :  { %20 = dma.vmem_to_smem %s18_s20, 16, %s460_s21, [#allocation3]  }
   0x3   :  { %458 = dma.done.wait [#allocation3], 16  }
   0x4   :  { %459 = vsyncadd [#allocation3], 4294967280 }
   0x5   :  { %29 = sfence }
   0x6   :  { %v409_v0 = vld [vmem:[%s586_s2 + $0x38] sm:$0xff]  ;;  %s500_s26 = sld [smem:[#allocation2]]  ;;  %v408_v2 = vld [vmem:[%s586_s2 + $0x30] sm:$0xff]  ;;  %v407_v4 = vld [vmem:[%s586_s2 + $0x28] sm:$0xff] }
   0x7   :  { %v417_v1 = vld [vmem:[%s586_s2 + $0x78] sm:$0xff]  ;;  %s502_s27 = sld [smem:[#allocation2 + $0x1]]  ;;  %254 = vmatpush.bf16.msra.mxu0 %v409_v0  ;;  %429 = vmatpush.bf16.msra.mxu2 %v409_v0  ;;  %v416_v3 = vld [vmem:[%s586_s2 + $0x70] sm:$0xff]  ;;  %v415_v5 = vld [vmem:[%s586_s2 + $0x68] sm:$0xff] }
   0x8   :  { %273 = vmatpush.bf16.msra.mxu1 %v417_v1  ;;  %437 = vmatpush.bf16.msra.mxu3 %v417_v1  ;;  %v406_v6 = vld [vmem:[%s586_s2 + $0x20] sm:$0xff]  ;;  %v53_v9 = vld [vmem:[%s585_s1 + $0x8] sm:$0xff]  ;;  %v405_v10 = vld [vmem:[%s586_s2 + $0x18] sm:$0xff] }
   0x9   :  { %v414_v7 = vld [vmem:[%s586_s2 + $0x60] sm:$0xff]  ;;  %v54_v11 = vld [vmem:[%s585_s1 + $0x10] sm:$0xff]  ;;  %v55_v12 = vld [vmem:[%s585_s1 + $0x18] sm:$0xff]  ;;  %v62_v16 = vunpack.c.l.bf16 %v53_v9  ;;  %v63_v17 = vunpack.c.h.bf16 %v53_v9 }
   0xa   :  { %v52_v8 = vld [vmem:[%s585_s1] sm:$0xff]  ;;  %v413_v13 = vld [vmem:[%s586_s2 + $0x58] sm:$0xff]  ;;  %v64_v19 = vunpack.c.l.bf16 %v54_v11  ;;  %v65_v20 = vunpack.c.h.bf16 %v54_v11  ;;  %v66_v21 = vunpack.c.l.bf16 %v55_v12  ;;  %v404_v22 = vld [vmem:[%s586_s2 + $0x10] sm:$0xff]  ;;  %v67_v24 = vunpack.c.h.bf16 %v55_v12 }
   0xb   :  { %255 = vmatpush.bf16.msra.mxu0 %v408_v2  ;;  %430 = vmatpush.bf16.msra.mxu2 %v408_v2  ;;  %v60_v14 = vunpack.c.l.bf16 %v52_v8  ;;  %v61_v15 = vunpack.c.h.bf16 %v52_v8  ;;  %v412_v25 = vld [vmem:[%s586_s2 + $0x50] sm:$0xff]  ;;  %v403_v34 = vld [vmem:[%s586_s2 + $0x8] sm:$0xff]  ;;  %v402_v48 = vld [vmem:[%s586_s2] sm:$0xff] }
   0xc   :  { %p32_p0 = scmp.ne.f32.partialorder %s500_s26, %s500_s26  ;;  %s33_s8 = sshrl.u32 %s500_s26, 16  ;;  %274 = vmatpush.bf16.msra.mxu1 %v416_v3  ;;  %438 = vmatpush.bf16.msra.mxu3 %v416_v3  ;;  %v411_v39 = vld [vmem:[%s586_s2 + $0x48] sm:$0xff]  ;;  %v410_v53 = vld [vmem:[%s586_s2 + $0x40] sm:$0xff] }
   0xd   :  { %s34_s11 = sand.u32 1, %s33_s8  ;;  %p43_p1 = scmp.ne.f32.partialorder %s502_s27, %s502_s27 }
   0xe   :  { %s35_s12 = sadd.s32 32767, %s34_s11  ;;  %s44_s13 = sshrl.u32 %s502_s27, 16 }
   0xf   :  { %s36_s14 = sadd.s32 %s35_s12, %s500_s26  ;;  %s45_s15 = sand.u32 1, %s44_s13  ;;  %256 = vmatpush.bf16.msra.mxu0 %v407_v4  ;;  %431 = vmatpush.bf16.msra.mxu2 %v407_v4 }
  0x10   :  { %s37_s18 = sand.u32 4294901760, %s36_s14  ;;  %s46_s19 = sadd.s32 32767, %s45_s15  ;;  %275 = vmatpush.bf16.msra.mxu1 %v415_v5  ;;  %439 = vmatpush.bf16.msra.mxu3 %v415_v5 }
  0x11   :  { %s591_s18 = smov (%p32_p0, %s37_s18), 2143289344  ;;  %s47_s22 = sadd.s32 %s502_s27, %s46_s19 }
  0x12   :  { %s40_s23 = sshrl.u32 %s591_s18, 16  ;;  %s48_s24 = sand.u32 4294901760, %s47_s22 }
  0x13   :  { %257 = vmatpush.bf16.msra.mxu0 %v406_v6  ;;  %432 = vmatpush.bf16.msra.mxu2 %v406_v6  ;;  %s593_s24 = smov (%p43_p1, %s48_s24), 2143289344  ;;  %s56_s12 = sshll.u32 %s40_s23, 16 }
  0x14   :  { %276 = vmatpush.bf16.msra.mxu1 %v414_v7  ;;  %440 = vmatpush.bf16.msra.mxu3 %v414_v7  ;;  %s51_s13 = sshrl.u32 %s593_s24, 16  ;;  %s57_s14 = sor.u32 %s56_s12, %s40_s23 }
  0x15   :  { %v58_v18 = vstv %s57_s14  ;;  %s81_s27 = sshll.u32 %s51_s13, 16 }
  0x16   :  { %v68_v23 = vunpack.c.l.bf16 %v58_v18  ;;  %s82_s16 = sor.u32 %s81_s27, %s51_s13 }
  0x17   :  { %258 = vmatpush.bf16.msra.mxu0 %v405_v10  ;;  %433 = vmatpush.bf16.msra.mxu2 %v405_v10  ;;  %v83_v26 = vstv %s82_s16 }
  0x18   :  { %277 = vmatpush.bf16.msra.mxu1 %v413_v13  ;;  %441 = vmatpush.bf16.msra.mxu3 %v413_v13  ;;  %v69_v27 = vsub.f32 %v60_v14, %v68_v23  ;;  %v70_v28 = vsub.f32 %v61_v15, %v68_v23  ;;  %v71_v29 = vsub.f32 %v62_v16, %v68_v23  ;;  %v93_v37 = vunpack.c.l.bf16 %v83_v26 }
  0x19   :  { %v72_v30 = vsub.f32 %v63_v17, %v68_v23  ;;  %v73_v31 = vsub.f32 %v64_v19, %v68_v23  ;;  %v74_v32 = vsub.f32 %v65_v20, %v68_v23  ;;  %v75_v33 = vsub.f32 %v66_v21, %v68_v23 }
  0x1a   :  { %v77_v35 = vpack.c.bf16 %v70_v28, %v69_v27  ;;  %v76_v38 = vsub.f32 %v67_v24, %v68_v23 }
  0x1b   :  { %259 = vmatpush.bf16.msra.mxu0 %v404_v22  ;;  %434 = vmatpush.bf16.msra.mxu2 %v404_v22  ;;  %v78_v36 = vpack.c.bf16 %v72_v30, %v71_v29  ;;  %v79_v40 = vpack.c.bf16 %v74_v32, %v73_v31 }
  0x1c   :  { %278 = vmatpush.bf16.msra.mxu1 %v412_v25  ;;  %442 = vmatpush.bf16.msra.mxu3 %v412_v25  ;;  %v85_v41 = vunpack.c.l.bf16 %v77_v35  ;;  %v80_v43 = vpack.c.bf16 %v76_v38, %v75_v33  ;;  %v86_v44 = vunpack.c.h.bf16 %v77_v35 }
  0x1d   :  { %v87_v42 = vunpack.c.l.bf16 %v78_v36  ;;  %v89_v45 = vunpack.c.l.bf16 %v79_v40  ;;  %v88_v46 = vunpack.c.h.bf16 %v78_v36  ;;  %v90_v47 = vunpack.c.h.bf16 %v79_v40 }
  0x1e   :  { %v94_v49 = vmul.f32 %v93_v37, %v85_v41  ;;  %v91_v51 = vunpack.c.l.bf16 %v80_v43  ;;  %v95_v52 = vmul.f32 %v93_v37, %v86_v44  ;;  %v92_v56 = vunpack.c.h.bf16 %v80_v43 }
  0x1f   :  { %260 = vmatpush.bf16.msra.mxu0 %v403_v34  ;;  %435 = vmatpush.bf16.msra.mxu2 %v403_v34  ;;  %v96_v50 = vmul.f32 %v93_v37, %v87_v42  ;;  %v98_v54 = vmul.f32 %v93_v37, %v89_v45  ;;  %v97_v55 = vmul.f32 %v93_v37, %v88_v46 }
  0x20   :  { %279 = vmatpush.bf16.msra.mxu1 %v411_v39  ;;  %443 = vmatpush.bf16.msra.mxu3 %v411_v39  ;;  %v99_v57 = vmul.f32 %v93_v37, %v90_v47  ;;  %v114_v58 = vmax.f32 %v94_v49, 0.0  ;;  %v100_v60 = vmul.f32 %v93_v37, %v91_v51  ;;  %v115_v61 = vmax.f32 %v95_v52, 0.0 }
  0x21   :  { %v116_v59 = vmax.f32 %v96_v50, 0.0  ;;  %v118_v62 = vmax.f32 %v98_v54, 0.0  ;;  %v117_v63 = vmax.f32 %v97_v55, 0.0  ;;  %v101_v0 = vmul.f32 %v93_v37, %v92_v56 }
  0x22   :  { %v119_v1 = vmax.f32 %v99_v57, 0.0  ;;  %v120_v3 = vmax.f32 %v100_v60, 0.0 }
  0x23   :  { %261 = vmatpush.bf16.msra.mxu0 %v402_v48  ;;  %436 = vmatpush.bf16.msra.mxu2 %v402_v48  ;;  %v122_v2 = vpack.c.bf16 %v116_v59, %v114_v58  ;;  %v123_v4 = vpack.c.bf16 %v117_v63, %v115_v61  ;;  %v121_v5 = vmax.f32 %v101_v0, 0.0 }
  0x24   :  { %280 = vmatpush.bf16.msra.mxu1 %v410_v53  ;;  %444 = vmatpush.bf16.msra.mxu3 %v410_v53  ;;  %v124_v6 = vpack.c.bf16 %v120_v3, %v118_v62 }
  0x25   :  { %v125_v7 = vpack.c.bf16 %v121_v5, %v119_v1 }
  0x26   :  { %262 = vmatmul.bf16.vlgmr.msra.gmra.mxu0 %v122_v2  ;;  %267 = vmatmul.bf16.vlgmr.msra.gmra.mxu2 %v124_v6 }
  0x27   :  { %281 = vmatmul.bf16.vlgmr.msra.gmra.mxu1 %v123_v4  ;;  %286 = vmatmul.bf16.vlgmr.msra.gmra.mxu3 %v125_v7 }
  0xa3   :  { %v263_v8 = vpop.f32.mrf.mxu0 }
  0xa4   :  { %v282_v9 = vpop.f32.mrf.mxu1 }
  0xa5   :  { %v283_v13 = vadd.f32 %v282_v9, %v263_v8 }
  0xa7   :  { %v310_v18 = vmul.f32 %v283_v13, %v283_v13 }
  0xa9   :  { %v268_v10 = vpop.f32.mrf.mxu2 }
  0xaa   :  { %v287_v11 = vpop.f32.mrf.mxu3 }
  0xab   :  { %v265_v12 = vpop.f32.mrf.mxu0  ;;  %v288_v19 = vadd.f32 %v287_v11, %v268_v10 }
  0xac   :  { %v284_v14 = vpop.f32.mrf.mxu1 }
  0xad   :  { %v285_v15 = vadd.f32 %v284_v14, %v265_v12  ;;  %v312_v24 = vmul.f32 %v288_v19, %v288_v19 }
  0xaf   :  { %v421_v16 = vpack.c.bf16 %v285_v15, %v283_v13  ;;  %v311_v17 = vmul.f32 %v285_v15, %v285_v15  ;;  %v300_v20 = vadd.f32 %v285_v15, %v283_v13 }
  0xb1   :  { %422 = vst [vmem:[%s587_s3] sm:$0xff] %v421_v16   ;;  %v314_v21 = vadd.f32 %v311_v17, %v310_v18  ;;  %v270_v22 = vpop.f32.mrf.mxu2  ;;  %v301_v26 = vadd.f32 %v300_v20, %v288_v19 }
  0xb2   :  { %v289_v23 = vpop.f32.mrf.mxu3 }
  0xb3   :  { %v290_v25 = vadd.f32 %v289_v23, %v270_v22  ;;  %v315_v30 = vadd.f32 %v314_v21, %v312_v24 }
  0xb5   :  { %v426_v27 = vpack.c.bf16 %v290_v25, %v288_v19  ;;  %v302_v28 = vadd.f32 %v301_v26, %v290_v25  ;;  %v313_v29 = vmul.f32 %v290_v25, %v290_v25 }
  0xb7   :  { %428 = vst [vmem:[%s587_s3 + $0x8] sm:$0xff] %v426_v27   ;;  %v303_v31 = vrot.slane %v302_v28, 4  ;;  %v316_v32 = vadd.f32 %v315_v30, %v313_v29 }
  0xb9   :  { %v304_v33 = vadd.f32 %v303_v31, %v302_v28  ;;  %v317_v34 = vrot.slane %v316_v32, 4 }
  0xbb   :  { %v305_v35 = vrot.slane %v304_v33, 2  ;;  %v318_v36 = vadd.f32 %v317_v34, %v316_v32 }
  0xbd   :  { %v306_v37 = vadd.f32 %v305_v35, %v304_v33  ;;  %v319_v38 = vrot.slane %v318_v36, 2 }
  0xbf   :  { %v307_v39 = vrot.slane %v306_v37, 1  ;;  %v320_v40 = vadd.f32 %v319_v38, %v318_v36 }
  0xc1   :  { %v308_v41 = vadd.f32 %v307_v39, %v306_v37  ;;  %v321_v42 = vrot.slane %v320_v40, 1 }
  0xc3   :  { %309 = vst [vmem:[%s588_s4] sm:$0x1] %v308_v41  ;;  %v322_v43 = vadd.f32 %v321_v42, %v320_v40 }
  0xc5   :  { %323 = vst [vmem:[%s589_s5] sm:$0x1] %v322_v43 }
  0xc6   :  { %336 = vsyncpa [#allocation3], 1 }

// kernel: segmentation_head.4
= control target key start
LH: loop header
LB: loop body
LE: loop exit
PB: predicated region body
PF: predicated region fallthrough
CT: control target
= control target key end

     0   :  { %vm1701_vm0 = vcmask 523264   ;;  %vm2451_vm1 = vcmask 1040384   ;;  %vm2453_vm2 = vcmask 1042434   ;;  %vm2455_vm3 = vcmask 1041408   ;;  %s5946_s1 = inlined_call_operand.vmem [shape: bf16[1088,512], index: 1, kind: input, shape index: {}]   ;;  %s5947_s0 = inlined_call_operand.vmem [shape: f32[32,1088], index: 0, kind: input, shape index: {}]   ;;  %s5948_s2 = inlined_call_operand.vmem [shape: bf16[32,512], index: 2, kind: output, shape index: {0}]   ;;  %s5949_s3 = inlined_call_operand.vmem [shape: f32[1,1,512], index: 3, kind: output, shape index: {1}]   ;;  %s5950_s4 = inlined_call_operand.vmem [shape: f32[1,1,512], index: 4, kind: output, shape index: {2}]  }
   0x1   :  { %v2653_v0 = vld [vmem:[%s5946_s1 + $0xe0] sm:$0xf]  ;;  %v3665_v1 = vld [vmem:[%s5946_s1 + $0xec] sm:$0xf0] }
   0x2   :  { %v2781_v2 = vld [vmem:[%s5946_s1 + $0x1e0] sm:$0xf]  ;;  %v2654_v3 = vor.u32 %v3665_v1, %v2653_v0  ;;  %v3697_v4 = vld [vmem:[%s5946_s1 + $0x1ec] sm:$0xf0] }
   0x3   :  { %v2909_v5 = vld [vmem:[%s5946_s1 + $0x2e0] sm:$0xf]  ;;  %v3729_v6 = vld [vmem:[%s5946_s1 + $0x2ec] sm:$0xf0]  ;;  %v2782_v7 = vor.u32 %v3697_v4, %v2781_v2 }
   0x4   :  { %v2910_v8 = vor.u32 %v3729_v6, %v2909_v5  ;;  %v3037_v9 = vld [vmem:[%s5946_s1 + $0x3e0] sm:$0xf]  ;;  %v3761_v10 = vld [vmem:[%s5946_s1 + $0x3ec] sm:$0xf0]  ;;  %1708 = vmatpush.bf16.msra.mxu0 %v2654_v3 }
   0x5   :  { %v2637_v11 = vld [vmem:[%s5946_s1 + $0xc0] sm:$0xf]  ;;  %v3038_v12 = vor.u32 %v3761_v10, %v3037_v9  ;;  %v3661_v13 = vld [vmem:[%s5946_s1 + $0xcc] sm:$0xf0]  ;;  %1727 = vmatpush.bf16.msra.mxu1 %v2782_v7 }
   0x6   :  { %v2765_v14 = vld [vmem:[%s5946_s1 + $0x1c0] sm:$0xf]  ;;  %v3693_v15 = vld [vmem:[%s5946_s1 + $0x1cc] sm:$0xf0]  ;;  %1746 = vmatpush.bf16.msra.mxu2 %v2910_v8  ;;  %v2638_v16 = vor.u32 %v3661_v13, %v2637_v11 }
   0x7   :  { %v2766_v17 = vor.u32 %v3693_v15, %v2765_v14  ;;  %v2893_v18 = vld [vmem:[%s5946_s1 + $0x2c0] sm:$0xf]  ;;  %v3725_v19 = vld [vmem:[%s5946_s1 + $0x2cc] sm:$0xf0]  ;;  %1765 = vmatpush.bf16.msra.mxu3 %v3038_v12 }
   0x8   :  { %v3021_v20 = vld [vmem:[%s5946_s1 + $0x3c0] sm:$0xf]  ;;  %v2894_v21 = vor.u32 %v3725_v19, %v2893_v18  ;;  %v3757_v22 = vld [vmem:[%s5946_s1 + $0x3cc] sm:$0xf0]  ;;  %1709 = vmatpush.bf16.msra.mxu0 %v2638_v16 }
   0x9   :  { %v2621_v23 = vld [vmem:[%s5946_s1 + $0xa0] sm:$0xf]  ;;  %v3657_v24 = vld [vmem:[%s5946_s1 + $0xac] sm:$0xf0]  ;;  %v3022_v25 = vor.u32 %v3757_v22, %v3021_v20  ;;  %1728 = vmatpush.bf16.msra.mxu1 %v2766_v17 }
   0xa   :  { %v2749_v26 = vld [vmem:[%s5946_s1 + $0x1a0] sm:$0xf]  ;;  %v3689_v27 = vld [vmem:[%s5946_s1 + $0x1ac] sm:$0xf0]  ;;  %v2622_v29 = vor.u32 %v3657_v24, %v2621_v23  ;;  %1747 = vmatpush.bf16.msra.mxu2 %v2894_v21 }
   0xb   :  { %v2877_v28 = vld [vmem:[%s5946_s1 + $0x2a0] sm:$0xf]  ;;  %v3721_v30 = vld [vmem:[%s5946_s1 + $0x2ac] sm:$0xf0]  ;;  %v2750_v33 = vor.u32 %v3689_v27, %v2749_v26  ;;  %1766 = vmatpush.bf16.msra.mxu3 %v3022_v25 }
   0xc   :  { %v3005_v31 = vld [vmem:[%s5946_s1 + $0x3a0] sm:$0xf]  ;;  %v3753_v32 = vld [vmem:[%s5946_s1 + $0x3ac] sm:$0xf0]  ;;  %v2878_v34 = vor.u32 %v3721_v30, %v2877_v28  ;;  %1710 = vmatpush.bf16.msra.mxu0 %v2622_v29  ;;  %v24_v29 = vld [vmem:[%s5947_s0 + $0x48] sm:$0xff] }
   0xd   :  { %v2605_v35 = vld [vmem:[%s5946_s1 + $0x80] sm:$0xf]  ;;  %v3653_v36 = vld [vmem:[%s5946_s1 + $0x8c] sm:$0xf0]  ;;  %v3006_v38 = vor.u32 %v3753_v32, %v3005_v31  ;;  %1729 = vmatpush.bf16.msra.mxu1 %v2750_v33  ;;  %v16_v30 = vld [vmem:[%s5947_s0 + $0x8] sm:$0xff] }
   0xe   :  { %v2733_v37 = vld [vmem:[%s5946_s1 + $0x180] sm:$0xf]  ;;  %v3685_v39 = vld [vmem:[%s5946_s1 + $0x18c] sm:$0xf0]  ;;  %v2606_v44 = vor.u32 %v3653_v36, %v2605_v35  ;;  %1748 = vmatpush.bf16.msra.mxu2 %v2878_v34 }
   0xf   :  { %v2861_v40 = vld [vmem:[%s5946_s1 + $0x280] sm:$0xf]  ;;  %v3717_v41 = vld [vmem:[%s5946_s1 + $0x28c] sm:$0xf0]  ;;  %v2734_v45 = vor.u32 %v3685_v39, %v2733_v37  ;;  %1767 = vmatpush.bf16.msra.mxu3 %v3006_v38 }
  0x10   :  { %v2989_v42 = vld [vmem:[%s5946_s1 + $0x380] sm:$0xf]  ;;  %v3749_v43 = vld [vmem:[%s5946_s1 + $0x38c] sm:$0xf0]  ;;  %v2862_v46 = vor.u32 %v3717_v41, %v2861_v40  ;;  %1711 = vmatpush.bf16.msra.mxu0 %v2606_v44  ;;  %v26_v40 = vld [vmem:[%s5947_s0 + $0x58] sm:$0xff] }
  0x11   :  { %v2589_v47 = vld [vmem:[%s5946_s1 + $0x60] sm:$0xf]  ;;  %v3649_v48 = vld [vmem:[%s5946_s1 + $0x6c] sm:$0xf0]  ;;  %v2990_v50 = vor.u32 %v3749_v43, %v2989_v42  ;;  %1730 = vmatpush.bf16.msra.mxu1 %v2734_v45  ;;  %v18_v41 = vld [vmem:[%s5947_s0 + $0x18] sm:$0xff] }
  0x12   :  { %v2717_v49 = vld [vmem:[%s5946_s1 + $0x160] sm:$0xf]  ;;  %v3681_v51 = vld [vmem:[%s5946_s1 + $0x16c] sm:$0xf0]  ;;  %v2590_v56 = vor.u32 %v3649_v48, %v2589_v47  ;;  %1749 = vmatpush.bf16.msra.mxu2 %v2862_v46 }
  0x13   :  { %v2845_v52 = vld [vmem:[%s5946_s1 + $0x260] sm:$0xf]  ;;  %v3713_v53 = vld [vmem:[%s5946_s1 + $0x26c] sm:$0xf0]  ;;  %v2718_v57 = vor.u32 %v3681_v51, %v2717_v49  ;;  %1768 = vmatpush.bf16.msra.mxu3 %v2990_v50 }
  0x14   :  { %v2973_v54 = vld [vmem:[%s5946_s1 + $0x360] sm:$0xf]  ;;  %v3745_v55 = vld [vmem:[%s5946_s1 + $0x36c] sm:$0xf0]  ;;  %v2846_v58 = vor.u32 %v3713_v53, %v2845_v52  ;;  %1712 = vmatpush.bf16.msra.mxu0 %v2590_v56 }
  0x15   :  { %v2573_v59 = vld [vmem:[%s5946_s1 + $0x40] sm:$0xf]  ;;  %v3645_v60 = vld [vmem:[%s5946_s1 + $0x4c] sm:$0xf0]  ;;  %v2974_v62 = vor.u32 %v3745_v55, %v2973_v54  ;;  %1731 = vmatpush.bf16.msra.mxu1 %v2718_v57 }
  0x16   :  { %v2701_v61 = vld [vmem:[%s5946_s1 + $0x140] sm:$0xf]  ;;  %v3677_v63 = vld [vmem:[%s5946_s1 + $0x14c] sm:$0xf0]  ;;  %v2574_v4 = vor.u32 %v3645_v60, %v2573_v59  ;;  %1750 = vmatpush.bf16.msra.mxu2 %v2846_v58 }
  0x17   :  { %v2829_v0 = vld [vmem:[%s5946_s1 + $0x240] sm:$0xf]  ;;  %v3709_v1 = vld [vmem:[%s5946_s1 + $0x24c] sm:$0xf0]  ;;  %v2702_v5 = vor.u32 %v3677_v63, %v2701_v61  ;;  %1769 = vmatpush.bf16.msra.mxu3 %v2974_v62 }
  0x18   :  { %v2957_v2 = vld [vmem:[%s5946_s1 + $0x340] sm:$0xf]  ;;  %v3741_v3 = vld [vmem:[%s5946_s1 + $0x34c] sm:$0xf0]  ;;  %v2830_v6 = vor.u32 %v3709_v1, %v2829_v0  ;;  %1713 = vmatpush.bf16.msra.mxu0 %v2574_v4 }
  0x19   :  { %v2557_v7 = vld [vmem:[%s5946_s1 + $0x20] sm:$0xf]  ;;  %v3641_v8 = vld [vmem:[%s5946_s1 + $0x2c] sm:$0xf0]  ;;  %v2958_v10 = vor.u32 %v3741_v3, %v2957_v2  ;;  %1732 = vmatpush.bf16.msra.mxu1 %v2702_v5 }
  0x1a   :  { %v2685_v9 = vld [vmem:[%s5946_s1 + $0x120] sm:$0xf]  ;;  %v3673_v11 = vld [vmem:[%s5946_s1 + $0x12c] sm:$0xf0]  ;;  %v2558_v17 = vor.u32 %v3641_v8, %v2557_v7  ;;  %1751 = vmatpush.bf16.msra.mxu2 %v2830_v6 }
  0x1b   :  { %v2813_v12 = vld [vmem:[%s5946_s1 + $0x220] sm:$0xf]  ;;  %v3705_v13 = vld [vmem:[%s5946_s1 + $0x22c] sm:$0xf0]  ;;  %v2686_v21 = vor.u32 %v3673_v11, %v2685_v9  ;;  %1770 = vmatpush.bf16.msra.mxu3 %v2958_v10 }
  0x1c   :  { %v2941_v14 = vld [vmem:[%s5946_s1 + $0x320] sm:$0xf]  ;;  %v3737_v15 = vld [vmem:[%s5946_s1 + $0x32c] sm:$0xf0]  ;;  %v2814_v22 = vor.u32 %v3705_v13, %v2813_v12  ;;  %1714 = vmatpush.bf16.msra.mxu0 %v2558_v17 }
  0x1d   :  { %v2541_v16 = vld [vmem:[%s5946_s1] sm:$0xf]  ;;  %v3637_v18 = vld [vmem:[%s5946_s1 + $0xc] sm:$0xf0]  ;;  %v2942_v26 = vor.u32 %v3737_v15, %v2941_v14  ;;  %1733 = vmatpush.bf16.msra.mxu1 %v2686_v21 }
  0x1e   :  { %v2669_v19 = vld [vmem:[%s5946_s1 + $0x100] sm:$0xf]  ;;  %v3669_v20 = vld [vmem:[%s5946_s1 + $0x10c] sm:$0xf0]  ;;  %v2542_v34 = vor.u32 %v3637_v18, %v2541_v16  ;;  %1752 = vmatpush.bf16.msra.mxu2 %v2814_v22 }
  0x1f   :  { %v2797_v23 = vld [vmem:[%s5946_s1 + $0x200] sm:$0xf]  ;;  %v3701_v24 = vld [vmem:[%s5946_s1 + $0x20c] sm:$0xf0]  ;;  %v2670_v38 = vor.u32 %v3669_v20, %v2669_v19  ;;  %1771 = vmatpush.bf16.msra.mxu3 %v2942_v26  ;;  %v42_v26 = vld [vmem:[%s5947_s0 + $0xd8] sm:$0xff] }
  0x20   :  { %v2925_v25 = vld [vmem:[%s5946_s1 + $0x300] sm:$0xf]  ;;  %v3733_v27 = vld [vmem:[%s5946_s1 + $0x30c] sm:$0xf0]  ;;  %v2798_v39 = vor.u32 %v3701_v24, %v2797_v23  ;;  %1715 = vmatpush.bf16.msra.mxu0 %v2542_v34 }
  0x21   :  { %v15_v28 = vld [vmem:[%s5947_s0] sm:$0xff]  ;;  %v25_v31 = vld [vmem:[%s5947_s0 + $0x50] sm:$0xff]  ;;  %v2926_v43 = vor.u32 %v3733_v27, %v2925_v25  ;;  %1734 = vmatpush.bf16.msra.mxu1 %v2670_v38 }
  0x22   :  { %v3421_v32 = vld [vmem:[%s5946_s1 + $0x6e0] sm:$0xf]  ;;  %v3857_v33 = vld [vmem:[%s5946_s1 + $0x6ec] sm:$0xf0]  ;;  %v4169_v48 = vpack.c.bf16 %v24_v29, %v15_v28  ;;  %v4180_v53 = vpack.c.bf16 %v25_v31, %v16_v30  ;;  %1753 = vmatpush.bf16.msra.mxu2 %v2798_v39  ;;  %v34_v28 = vld [vmem:[%s5947_s0 + $0x98] sm:$0xff] }
  0x23   :  { %v17_v35 = vld [vmem:[%s5947_s0 + $0x10] sm:$0xff]  ;;  %v3293_v36 = vld [vmem:[%s5946_s1 + $0x5e0] sm:$0xf]  ;;  %v3422_v44 = vor.u32 %v3857_v33, %v3421_v32  ;;  %1772 = vmatpush.bf16.msra.mxu3 %v2926_v43 }
  0x24   :  { %v3825_v37 = vld [vmem:[%s5946_s1 + $0x5ec] sm:$0xf0]  ;;  %v27_v42 = vld [vmem:[%s5947_s0 + $0x60] sm:$0xff]  ;;  %v4182_v54 = vpack.c.bf16 %v26_v40, %v17_v35  ;;  %1716 = vmatmul.bf16.vlgmr.msra.gmra.mxu0 %v4169_v48  ;;  %1735 = vmatmul.bf16.vlgmr.msra.gmra.mxu1 %v4180_v53 }
  0x25   :  { %v3165_v45 = vld [vmem:[%s5946_s1 + $0x4e0] sm:$0xf]  ;;  %v3793_v46 = vld [vmem:[%s5946_s1 + $0x4ec] sm:$0xf0]  ;;  %v3294_v49 = vor.u32 %v3825_v37, %v3293_v36  ;;  %v4190_v57 = vpack.c.bf16 %v27_v42, %v18_v41  ;;  %v44_v36 = vld [vmem:[%s5947_s0 + $0xe8] sm:$0xff] }
  0x26   :  { %v3549_v47 = vld [vmem:[%s5946_s1 + $0x7e0] sm:$0xf]  ;;  %v3889_v50 = vld [vmem:[%s5946_s1 + $0x7ec] sm:$0xf0]  ;;  %v3166_v58 = vor.u32 %v3793_v46, %v3165_v45  ;;  %1822 = vmatpush.bf16.msrb.mxu2 %v3422_v44  ;;  %v36_v37 = vld [vmem:[%s5947_s0 + $0xa8] sm:$0xff] }
  0x27   :  { %v3405_v51 = vld [vmem:[%s5946_s1 + $0x6c0] sm:$0xf]  ;;  %v3853_v52 = vld [vmem:[%s5946_s1 + $0x6cc] sm:$0xf0]  ;;  %v3550_v59 = vor.u32 %v3889_v50, %v3549_v47  ;;  %1803 = vmatpush.bf16.msrb.mxu1 %v3294_v49  ;;  %1754 = vmatmul.bf16.vlgmr.msra.gmra.mxu2 %v4182_v54 }
  0x28   :  { %v3277_v55 = vld [vmem:[%s5946_s1 + $0x5c0] sm:$0xf]  ;;  %v3821_v56 = vld [vmem:[%s5946_s1 + $0x5cc] sm:$0xf0]  ;;  %v3406_v60 = vor.u32 %v3853_v52, %v3405_v51  ;;  %1773 = vmatmul.bf16.vlgmr.msra.gmra.mxu3 %v4190_v57  ;;  %1784 = vmatpush.bf16.msrb.mxu0 %v3166_v58 }
  0x29   :  { %v3149_v61 = vld [vmem:[%s5946_s1 + $0x4c0] sm:$0xf]  ;;  %v3789_v62 = vld [vmem:[%s5946_s1 + $0x4cc] sm:$0xf0]  ;;  %v3278_v0 = vor.u32 %v3821_v56, %v3277_v55  ;;  %1841 = vmatpush.bf16.msrb.mxu3 %v3550_v59 }
  0x2a   :  { %v3533_v63 = vld [vmem:[%s5946_s1 + $0x7c0] sm:$0xf]  ;;  %v3885_v1 = vld [vmem:[%s5946_s1 + $0x7cc] sm:$0xf0]  ;;  %v3150_v6 = vor.u32 %v3789_v62, %v3149_v61  ;;  %1823 = vmatpush.bf16.msrb.mxu2 %v3406_v60 }
  0x2b   :  { %v3389_v2 = vld [vmem:[%s5946_s1 + $0x6a0] sm:$0xf]  ;;  %v3849_v3 = vld [vmem:[%s5946_s1 + $0x6ac] sm:$0xf0]  ;;  %v3534_v7 = vor.u32 %v3885_v1, %v3533_v63  ;;  %1804 = vmatpush.bf16.msrb.mxu1 %v3278_v0 }
  0x2c   :  { %v3261_v4 = vld [vmem:[%s5946_s1 + $0x5a0] sm:$0xf]  ;;  %v3817_v5 = vld [vmem:[%s5946_s1 + $0x5ac] sm:$0xf0]  ;;  %v3390_v8 = vor.u32 %v3849_v3, %v3389_v2  ;;  %1785 = vmatpush.bf16.msrb.mxu0 %v3150_v6 }
  0x2d   :  { %v3133_v9 = vld [vmem:[%s5946_s1 + $0x4a0] sm:$0xf]  ;;  %v3785_v10 = vld [vmem:[%s5946_s1 + $0x4ac] sm:$0xf0]  ;;  %v3262_v12 = vor.u32 %v3817_v5, %v3261_v4  ;;  %1842 = vmatpush.bf16.msrb.mxu3 %v3534_v7 }
  0x2e   :  { %v3517_v11 = vld [vmem:[%s5946_s1 + $0x7a0] sm:$0xf]  ;;  %v3881_v13 = vld [vmem:[%s5946_s1 + $0x7ac] sm:$0xf0]  ;;  %v3134_v18 = vor.u32 %v3785_v10, %v3133_v9  ;;  %1824 = vmatpush.bf16.msrb.mxu2 %v3390_v8 }
  0x2f   :  { %v3373_v14 = vld [vmem:[%s5946_s1 + $0x680] sm:$0xf]  ;;  %v3845_v15 = vld [vmem:[%s5946_s1 + $0x68c] sm:$0xf0]  ;;  %v3518_v22 = vor.u32 %v3881_v13, %v3517_v11  ;;  %1805 = vmatpush.bf16.msrb.mxu1 %v3262_v12 }
  0x30   :  { %v3245_v16 = vld [vmem:[%s5946_s1 + $0x580] sm:$0xf]  ;;  %v3813_v17 = vld [vmem:[%s5946_s1 + $0x58c] sm:$0xf0]  ;;  %v3374_v23 = vor.u32 %v3845_v15, %v3373_v14  ;;  %1786 = vmatpush.bf16.msrb.mxu0 %v3134_v18  ;;  %v3695_v18 = vld [vmem:[%s5946_s1 + $0x1e4] sm:$0xf] }
  0x31   :  { %v3117_v19 = vld [vmem:[%s5946_s1 + $0x480] sm:$0xf]  ;;  %v3781_v20 = vld [vmem:[%s5946_s1 + $0x48c] sm:$0xf0]  ;;  %v3246_v27 = vor.u32 %v3813_v17, %v3245_v16  ;;  %1843 = vmatpush.bf16.msrb.mxu3 %v3518_v22  ;;  %v3663_v22 = vld [vmem:[%s5946_s1 + $0xe4] sm:$0xf] }
  0x32   :  { %v3501_v21 = vld [vmem:[%s5946_s1 + $0x780] sm:$0xf]  ;;  %v3877_v24 = vld [vmem:[%s5946_s1 + $0x78c] sm:$0xf0]  ;;  %v3118_v35 = vor.u32 %v3781_v20, %v3117_v19  ;;  %1825 = vmatpush.bf16.msrb.mxu2 %v3374_v23  ;;  %v2783_v19 = vld [vmem:[%s5946_s1 + $0x1f0] sm:$0xf0] }
  0x33   :  { %v33_v25 = vld [vmem:[%s5947_s0 + $0x90] sm:$0xff]  ;;  %v43_v29 = vld [vmem:[%s5947_s0 + $0xe0] sm:$0xff]  ;;  %v3502_v39 = vor.u32 %v3877_v24, %v3501_v21  ;;  %1806 = vmatpush.bf16.msrb.mxu1 %v3246_v27 }
  0x34   :  { %v3357_v30 = vld [vmem:[%s5946_s1 + $0x660] sm:$0xf]  ;;  %v3841_v31 = vld [vmem:[%s5946_s1 + $0x66c] sm:$0xf0]  ;;  %v4301_v44 = vpack.c.bf16 %v42_v26, %v33_v25  ;;  %v4312_v50 = vpack.c.bf16 %v43_v29, %v34_v28  ;;  %1787 = vmatpush.bf16.msrb.mxu0 %v3118_v35  ;;  %v2655_v23 = vld [vmem:[%s5946_s1 + $0xf0] sm:$0xf0] }
  0x35   :  { %v35_v32 = vld [vmem:[%s5947_s0 + $0xa0] sm:$0xff]  ;;  %v3809_v34 = vld [vmem:[%s5946_s1 + $0x56c] sm:$0xf0]  ;;  %v3358_v40 = vor.u32 %v3841_v31, %v3357_v30  ;;  %1844 = vmatpush.bf16.msrb.mxu3 %v3502_v39  ;;  %v28_v31 = vld [vmem:[%s5947_s0 + $0x68] sm:$0xff] }
  0x36   :  { %v3229_v33 = vld [vmem:[%s5946_s1 + $0x560] sm:$0xf]  ;;  %v45_v38 = vld [vmem:[%s5947_s0 + $0xf0] sm:$0xff]  ;;  %v4314_v51 = vpack.c.bf16 %v44_v36, %v35_v32  ;;  %1721 = vmatmul.bf16.gmra.mxu0 %v4301_v44  ;;  %1740 = vmatmul.bf16.gmra.mxu1 %v4312_v50  ;;  %v20_v32 = vld [vmem:[%s5947_s0 + $0x28] sm:$0xff] }
  0x37   :  { %v3101_v41 = vld [vmem:[%s5946_s1 + $0x460] sm:$0xf]  ;;  %v3777_v42 = vld [vmem:[%s5946_s1 + $0x46c] sm:$0xf0]  ;;  %v3230_v45 = vor.u32 %v3809_v34, %v3229_v33  ;;  %v4322_v56 = vpack.c.bf16 %v45_v38, %v36_v37  ;;  %1826 = vmatpush.bf16.msrb.mxu2 %v3358_v40  ;;  %v2786_v34 = vor.u32 %v3695_v18, %v2783_v19  ;;  %v3727_v35 = vld [vmem:[%s5946_s1 + $0x2e4] sm:$0xf]  ;;  %v2658_v38 = vor.u32 %v3663_v22, %v2655_v23 }
  0x38   :  { %v3485_v43 = vld [vmem:[%s5946_s1 + $0x760] sm:$0xf]  ;;  %v3873_v46 = vld [vmem:[%s5946_s1 + $0x76c] sm:$0xf0]  ;;  %v3102_v58 = vor.u32 %v3777_v42, %v3101_v41  ;;  %1759 = vmatmul.bf16.gmra.mxu2 %v4314_v51  ;;  %v2911_v39 = vld [vmem:[%s5946_s1 + $0x2f0] sm:$0xf0] }
  0x39   :  { %v3341_v47 = vld [vmem:[%s5946_s1 + $0x640] sm:$0xf]  ;;  %v3837_v49 = vld [vmem:[%s5946_s1 + $0x64c] sm:$0xf0]  ;;  %v3486_v59 = vor.u32 %v3873_v46, %v3485_v43  ;;  %1807 = vmatpush.bf16.msrb.mxu1 %v3230_v45  ;;  %1778 = vmatmul.bf16.gmra.mxu3 %v4322_v56  ;;  %v3691_v40 = vld [vmem:[%s5946_s1 + $0x1c4] sm:$0xf] }
  0x3a   :  { %v3213_v52 = vld [vmem:[%s5946_s1 + $0x540] sm:$0xf]  ;;  %v3805_v55 = vld [vmem:[%s5946_s1 + $0x54c] sm:$0xf0]  ;;  %v3342_v60 = vor.u32 %v3837_v49, %v3341_v47  ;;  %1788 = vmatpush.bf16.msrb.mxu0 %v3102_v58  ;;  %v2767_v41 = vld [vmem:[%s5946_s1 + $0x1d0] sm:$0xf0] }
  0x3b   :  { %v3085_v61 = vld [vmem:[%s5946_s1 + $0x440] sm:$0xf]  ;;  %v3773_v62 = vld [vmem:[%s5946_s1 + $0x44c] sm:$0xf0]  ;;  %v3214_v0 = vor.u32 %v3805_v55, %v3213_v52  ;;  %1845 = vmatpush.bf16.msrb.mxu3 %v3486_v59  ;;  %v30_v45 = vld [vmem:[%s5947_s0 + $0x78] sm:$0xff]  ;;  %v2914_v59 = vor.u32 %v3727_v35, %v2911_v39 }
  0x3c   :  { %v3469_v63 = vld [vmem:[%s5946_s1 + $0x740] sm:$0xf]  ;;  %v3869_v1 = vld [vmem:[%s5946_s1 + $0x74c] sm:$0xf0]  ;;  %v3086_v6 = vor.u32 %v3773_v62, %v3085_v61  ;;  %1827 = vmatpush.bf16.msrb.mxu2 %v3342_v60  ;;  %v22_v46 = vld [vmem:[%s5947_s0 + $0x38] sm:$0xff]  ;;  %v2770_v60 = vor.u32 %v3691_v40, %v2767_v41 }
  0x3d   :  { %v3325_v2 = vld [vmem:[%s5946_s1 + $0x620] sm:$0xf]  ;;  %v3833_v3 = vld [vmem:[%s5946_s1 + $0x62c] sm:$0xf0]  ;;  %v3470_v8 = vor.u32 %v3869_v1, %v3469_v63  ;;  %1808 = vmatpush.bf16.msrb.mxu1 %v3214_v0  ;;  %v3659_v55 = vld [vmem:[%s5946_s1 + $0xc4] sm:$0xf] }
  0x3e   :  { %v3197_v4 = vld [vmem:[%s5946_s1 + $0x520] sm:$0xf]  ;;  %v3801_v5 = vld [vmem:[%s5946_s1 + $0x52c] sm:$0xf0]  ;;  %v3326_v9 = vor.u32 %v3833_v3, %v3325_v2  ;;  %1789 = vmatpush.bf16.msrb.mxu0 %v3086_v6  ;;  %v2639_v58 = vld [vmem:[%s5946_s1 + $0xd0] sm:$0xf0] }
  0x3f   :  { %v3069_v7 = vld [vmem:[%s5946_s1 + $0x420] sm:$0xf]  ;;  %v3769_v10 = vld [vmem:[%s5946_s1 + $0x42c] sm:$0xf0]  ;;  %v3198_v13 = vor.u32 %v3801_v5, %v3197_v4  ;;  %1846 = vmatpush.bf16.msrb.mxu3 %v3470_v8  ;;  %v3723_v61 = vld [vmem:[%s5946_s1 + $0x2c4] sm:$0xf] }
  0x40   :  { %v3453_v11 = vld [vmem:[%s5946_s1 + $0x720] sm:$0xf]  ;;  %v3865_v12 = vld [vmem:[%s5946_s1 + $0x72c] sm:$0xf0]  ;;  %v3070_v20 = vor.u32 %v3769_v10, %v3069_v7  ;;  %1828 = vmatpush.bf16.msrb.mxu2 %v3326_v9  ;;  %v2895_v2 = vld [vmem:[%s5946_s1 + $0x2d0] sm:$0xf0]  ;;  %v2642_v7 = vor.u32 %v3659_v55, %v2639_v58 }
  0x41   :  { %v3309_v14 = vld [vmem:[%s5946_s1 + $0x600] sm:$0xf]  ;;  %v3829_v15 = vld [vmem:[%s5946_s1 + $0x60c] sm:$0xf0]  ;;  %v3454_v24 = vor.u32 %v3865_v12, %v3453_v11  ;;  %1809 = vmatpush.bf16.msrb.mxu1 %v3198_v13  ;;  %v3687_v3 = vld [vmem:[%s5946_s1 + $0x1a4] sm:$0xf]  ;;  %v2898_v11 = vor.u32 %v3723_v61, %v2895_v2 }
  0x42   :  { %v3181_v16 = vld [vmem:[%s5946_s1 + $0x500] sm:$0xf]  ;;  %v3797_v17 = vld [vmem:[%s5946_s1 + $0x50c] sm:$0xf0]  ;;  %v3310_v25 = vor.u32 %v3829_v15, %v3309_v14  ;;  %1790 = vmatpush.bf16.msrb.mxu0 %v3070_v20  ;;  %v2751_v4 = vld [vmem:[%s5946_s1 + $0x1b0] sm:$0xf0] }
  0x43   :  { %v3053_v21 = vld [vmem:[%s5946_s1 + $0x400] sm:$0xf]  ;;  %v3765_v26 = vld [vmem:[%s5946_s1 + $0x40c] sm:$0xf0]  ;;  %v3182_v29 = vor.u32 %v3797_v17, %v3181_v16  ;;  %1847 = vmatpush.bf16.msrb.mxu3 %v3454_v24  ;;  %v3655_v8 = vld [vmem:[%s5946_s1 + $0xa4] sm:$0xf]  ;;  %v2754_v12 = vor.u32 %v3687_v3, %v2751_v4 }
  0x44   :  { %v3437_v27 = vld [vmem:[%s5946_s1 + $0x700] sm:$0xf]  ;;  %v3861_v28 = vld [vmem:[%s5946_s1 + $0x70c] sm:$0xf0]  ;;  %v3054_v42 = vor.u32 %v3765_v26, %v3053_v21  ;;  %1829 = vmatpush.bf16.msrb.mxu2 %v3310_v25  ;;  %v2623_v9 = vld [vmem:[%s5946_s1 + $0xb0] sm:$0xf0] }
  0x45   :  { %v19_v30 = vld [vmem:[%s5947_s0 + $0x20] sm:$0xff]  ;;  %v29_v33 = vld [vmem:[%s5947_s0 + $0x70] sm:$0xff]  ;;  %v3438_v47 = vor.u32 %v3861_v28, %v3437_v27  ;;  %1810 = vmatpush.bf16.msrb.mxu1 %v3182_v29  ;;  %v2626_v19 = vor.u32 %v3655_v8, %v2623_v9  ;;  %v48_v55 = vld [vmem:[%s5947_s0 + $0x108] sm:$0xff] }
  0x46   :  { %v3613_v36 = vld [vmem:[%s5946_s1 + $0x860] sm:$0xf]  ;;  %v3905_v37 = vld [vmem:[%s5946_s1 + $0x86c] sm:$0xf0]  ;;  %v4457_v0 = vpack.c.bf16 %v28_v31, %v19_v30  ;;  %v4459_v1 = vpack.c.bf16 %v29_v33, %v20_v32  ;;  %1791 = vmatpush.bf16.msrb.mxu0 %v3054_v42  ;;  %v3719_v13 = vld [vmem:[%s5946_s1 + $0x2a4] sm:$0xf] }
  0x47   :  { %v21_v43 = vld [vmem:[%s5947_s0 + $0x30] sm:$0xff]  ;;  %v31_v49 = vld [vmem:[%s5947_s0 + $0x80] sm:$0xff]  ;;  %v3614_v52 = vor.u32 %v3905_v37, %v3613_v36  ;;  %1848 = vmatpush.bf16.msrb.mxu3 %v3438_v47  ;;  %v46_v37 = vld [vmem:[%s5947_s0 + $0xf8] sm:$0xff] }
  0x48   :  { %1898 = vmatpush.bf16.msra.mxu2 %v2786_v34  ;;  %v3597_v62 = vld [vmem:[%s5946_s1 + $0x840] sm:$0xf]  ;;  %v3901_v63 = vld [vmem:[%s5946_s1 + $0x84c] sm:$0xf0]  ;;  %v4470_v5 = vpack.c.bf16 %v30_v45, %v21_v43  ;;  %v4472_v6 = vpack.c.bf16 %v31_v49, %v22_v46  ;;  %1811 = vmatmul.bf16.vlgmr.msrb.gmra.mxu1 %v4459_v1  ;;  %v2879_v16 = vld [vmem:[%s5946_s1 + $0x2b0] sm:$0xf0] }
  0x49   :  { %1879 = vmatpush.bf16.msra.mxu1 %v2658_v38  ;;  %v3598_v10 = vor.u32 %v3901_v63, %v3597_v62  ;;  %v3581_v14 = vld [vmem:[%s5946_s1 + $0x820] sm:$0xf]  ;;  %v3897_v15 = vld [vmem:[%s5946_s1 + $0x82c] sm:$0xf0]  ;;  %1792 = vmatmul.bf16.vlgmr.msrb.gmra.mxu0 %v4457_v0  ;;  %v3683_v17 = vld [vmem:[%s5946_s1 + $0x184] sm:$0xf]  ;;  %v2882_v23 = vor.u32 %v3719_v13, %v2879_v16 }
  0x4a   :  { %1864 = vmatpush.bf16.msra.mxu0 %v3614_v52  ;;  %v2735_v18 = vld [vmem:[%s5946_s1 + $0x190] sm:$0xf0]  ;;  %1830 = vmatmul.bf16.vlgmr.msrb.gmra.mxu2 %v4470_v5  ;;  %v3651_v20 = vld [vmem:[%s5946_s1 + $0x84] sm:$0xf]  ;;  %v3582_v22 = vor.u32 %v3897_v15, %v3581_v14  ;;  %v3565_v26 = vld [vmem:[%s5946_s1 + $0x800] sm:$0xf] }
  0x4b   :  { %1917 = vmatpush.bf16.msra.mxu3 %v2914_v59  ;;  %v2607_v21 = vld [vmem:[%s5946_s1 + $0x90] sm:$0xf0]  ;;  %v2738_v24 = vor.u32 %v3683_v17, %v2735_v18  ;;  %v3715_v25 = vld [vmem:[%s5946_s1 + $0x284] sm:$0xf]  ;;  %v3893_v27 = vld [vmem:[%s5946_s1 + $0x80c] sm:$0xf0] }
  0x4c   :  { %1899 = vmatpush.bf16.msra.mxu2 %v2770_v60  ;;  %1849 = vmatmul.bf16.vlgmr.msrb.gmra.mxu3 %v4472_v6  ;;  %v2863_v28 = vld [vmem:[%s5946_s1 + $0x290] sm:$0xf0]  ;;  %v3679_v29 = vld [vmem:[%s5946_s1 + $0x164] sm:$0xf]  ;;  %v2610_v31 = vor.u32 %v3651_v20, %v2607_v21  ;;  %v3566_v32 = vor.u32 %v3893_v27, %v3565_v26  ;;  %v38_v38 = vld [vmem:[%s5947_s0 + $0xb8] sm:$0xff] }
  0x4d   :  { %1880 = vmatpush.bf16.msra.mxu1 %v2642_v7  ;;  %v2719_v30 = vld [vmem:[%s5946_s1 + $0x170] sm:$0xf0]  ;;  %v3759_v33 = vld [vmem:[%s5946_s1 + $0x3e4] sm:$0xf]  ;;  %v2866_v35 = vor.u32 %v3715_v25, %v2863_v28  ;;  %v40_v58 = vld [vmem:[%s5947_s0 + $0xc8] sm:$0xff] }
  0x4e   :  { %1865 = vmatpush.bf16.msra.mxu0 %v3598_v10  ;;  %v3039_v34 = vld [vmem:[%s5946_s1 + $0x3f0] sm:$0xf0]  ;;  %v47_v39 = vld [vmem:[%s5947_s0 + $0x100] sm:$0xff]  ;;  %v2722_v40 = vor.u32 %v3679_v29, %v2719_v30 }
  0x4f   :  { %1918 = vmatpush.bf16.msra.mxu3 %v2898_v11  ;;  %v37_v36 = vld [vmem:[%s5947_s0 + $0xb0] sm:$0xff]  ;;  %v3647_v41 = vld [vmem:[%s5946_s1 + $0x64] sm:$0xf]  ;;  %v3042_v49 = vor.u32 %v3759_v33, %v3039_v34  ;;  %v4591_v9 = vpack.c.bf16 %v47_v39, %v38_v38 }
  0x50   :  { %1900 = vmatpush.bf16.msra.mxu2 %v2754_v12  ;;  %v2591_v42 = vld [vmem:[%s5946_s1 + $0x70] sm:$0xf0]  ;;  %v3711_v43 = vld [vmem:[%s5946_s1 + $0x264] sm:$0xf]  ;;  %v4589_v8 = vpack.c.bf16 %v46_v37, %v37_v36 }
  0x51   :  { %1881 = vmatpush.bf16.msra.mxu1 %v2626_v19  ;;  %v2847_v45 = vld [vmem:[%s5946_s1 + $0x270] sm:$0xf0]  ;;  %v3675_v46 = vld [vmem:[%s5946_s1 + $0x144] sm:$0xf]  ;;  %v2594_v60 = vor.u32 %v3647_v41, %v2591_v42 }
  0x52   :  { %1866 = vmatpush.bf16.msra.mxu0 %v3582_v22  ;;  %v2703_v47 = vld [vmem:[%s5946_s1 + $0x150] sm:$0xf0]  ;;  %v39_v52 = vld [vmem:[%s5947_s0 + $0xc0] sm:$0xff]  ;;  %v2850_v63 = vor.u32 %v3711_v43, %v2847_v45 }
  0x53   :  { %1919 = vmatpush.bf16.msra.mxu3 %v2882_v23  ;;  %v49_v59 = vld [vmem:[%s5947_s0 + $0x110] sm:$0xff]  ;;  %v3643_v61 = vld [vmem:[%s5946_s1 + $0x44] sm:$0xf]  ;;  %v2706_v2 = vor.u32 %v3675_v46, %v2703_v47  ;;  %v4602_v13 = vpack.c.bf16 %v48_v55, %v39_v52 }
  0x54   :  { %1901 = vmatpush.bf16.msra.mxu2 %v2738_v24  ;;  %v2575_v62 = vld [vmem:[%s5946_s1 + $0x50] sm:$0xf0]  ;;  %v3707_v3 = vld [vmem:[%s5946_s1 + $0x244] sm:$0xf]  ;;  %v4604_v14 = vpack.c.bf16 %v49_v59, %v40_v58 }
  0x55   :  { %1882 = vmatpush.bf16.msra.mxu1 %v2610_v31  ;;  %v3755_v4 = vld [vmem:[%s5946_s1 + $0x3c4] sm:$0xf]  ;;  %v3023_v7 = vld [vmem:[%s5946_s1 + $0x3d0] sm:$0xf0]  ;;  %v2578_v15 = vor.u32 %v3643_v61, %v2575_v62 }
  0x56   :  { %1867 = vmatpush.bf16.msra.mxu0 %v3566_v32  ;;  %v2831_v10 = vld [vmem:[%s5946_s1 + $0x250] sm:$0xf0]  ;;  %v3671_v11 = vld [vmem:[%s5946_s1 + $0x124] sm:$0xf]  ;;  %v3026_v18 = vor.u32 %v3755_v4, %v3023_v7 }
  0x57   :  { %1920 = vmatpush.bf16.msra.mxu3 %v2866_v35  ;;  %v2687_v12 = vld [vmem:[%s5946_s1 + $0x130] sm:$0xf0]  ;;  %v3639_v16 = vld [vmem:[%s5946_s1 + $0x24] sm:$0xf]  ;;  %v2834_v19 = vor.u32 %v3707_v3, %v2831_v10  ;;  %v32_v3 = vld [vmem:[%s5947_s0 + $0x88] sm:$0xff] }
  0x58   :  { %1902 = vmatpush.bf16.msra.mxu2 %v2722_v40  ;;  %v2559_v17 = vld [vmem:[%s5946_s1 + $0x30] sm:$0xf0]  ;;  %v2690_v20 = vor.u32 %v3671_v11, %v2687_v12  ;;  %v3703_v21 = vld [vmem:[%s5946_s1 + $0x224] sm:$0xf]  ;;  %1816 = vmatmul.bf16.gmra.mxu1 %v4591_v9 }
  0x59   :  { %1883 = vmatpush.bf16.msra.mxu1 %v2594_v60  ;;  %v3751_v22 = vld [vmem:[%s5946_s1 + $0x3a4] sm:$0xf]  ;;  %v3007_v23 = vld [vmem:[%s5946_s1 + $0x3b0] sm:$0xf0]  ;;  %1797 = vmatmul.bf16.gmra.mxu0 %v4589_v8  ;;  %v2562_v29 = vor.u32 %v3639_v16, %v2559_v17 }
  0x5a   :  { %1936 = vmatpush.bf16.msrb.mxu0 %v3042_v49  ;;  %v2815_v24 = vld [vmem:[%s5946_s1 + $0x230] sm:$0xf0]  ;;  %v3667_v25 = vld [vmem:[%s5946_s1 + $0x104] sm:$0xf]  ;;  %1835 = vmatmul.bf16.gmra.mxu2 %v4602_v13  ;;  %v3010_v33 = vor.u32 %v3751_v22, %v3007_v23 }
  0x5b   :  { %1921 = vmatpush.bf16.msra.mxu3 %v2850_v63  ;;  %v2671_v26 = vld [vmem:[%s5946_s1 + $0x110] sm:$0xf0]  ;;  %v3823_v27 = vld [vmem:[%s5946_s1 + $0x5e4] sm:$0xf]  ;;  %v2818_v34 = vor.u32 %v3703_v21, %v2815_v24 }
  0x5c   :  { %1903 = vmatpush.bf16.msra.mxu2 %v2706_v2  ;;  %1854 = vmatmul.bf16.gmra.mxu3 %v4604_v14  ;;  %v3295_v28 = vld [vmem:[%s5946_s1 + $0x5f0] sm:$0xf0]  ;;  %v3635_v30 = vld [vmem:[%s5946_s1 + $0x4] sm:$0xf]  ;;  %v2674_v35 = vor.u32 %v3667_v25, %v2671_v26 }
  0x5d   :  { %1884 = vmatpush.bf16.msra.mxu1 %v2578_v15  ;;  %v2543_v31 = vld [vmem:[%s5946_s1 + $0x10] sm:$0xf0]  ;;  %v3699_v32 = vld [vmem:[%s5946_s1 + $0x204] sm:$0xf]  ;;  %v3298_v39 = vor.u32 %v3823_v27, %v3295_v28 }
  0x5e   :  { %1937 = vmatpush.bf16.msrb.mxu0 %v3026_v18  ;;  %v2799_v36 = vld [vmem:[%s5946_s1 + $0x210] sm:$0xf0]  ;;  %v3747_v37 = vld [vmem:[%s5946_s1 + $0x384] sm:$0xf]  ;;  %v2546_v47 = vor.u32 %v3635_v30, %v2543_v31 }
  0x5f   :  { %1922 = vmatpush.bf16.msra.mxu3 %v2834_v19  ;;  %v2991_v38 = vld [vmem:[%s5946_s1 + $0x390] sm:$0xf0]  ;;  %v3791_v40 = vld [vmem:[%s5946_s1 + $0x4e4] sm:$0xf]  ;;  %v2802_v52 = vor.u32 %v3699_v32, %v2799_v36 }
  0x60   :  { %1904 = vmatpush.bf16.msra.mxu2 %v2690_v20  ;;  %v3167_v41 = vld [vmem:[%s5946_s1 + $0x4f0] sm:$0xf0]  ;;  %v3855_v42 = vld [vmem:[%s5946_s1 + $0x6e4] sm:$0xf]  ;;  %v2994_v49 = vor.u32 %v3747_v37, %v2991_v38 }
  0x61   :  { %v3423_v43 = vld [vmem:[%s5946_s1 + $0x6f0] sm:$0xf0]  ;;  %v3819_v45 = vld [vmem:[%s5946_s1 + $0x5c4] sm:$0xf]  ;;  %1885 = vmatpush.bf16.msra.mxu1 %v2562_v29  ;;  %v3170_v55 = vor.u32 %v3791_v40, %v3167_v41 }
  0x62   :  { %v3279_v46 = vld [vmem:[%s5946_s1 + $0x5d0] sm:$0xf0]  ;;  %1938 = vmatpush.bf16.msrb.mxu0 %v3010_v33  ;;  %v3743_v58 = vld [vmem:[%s5946_s1 + $0x364] sm:$0xf]  ;;  %v3426_v60 = vor.u32 %v3855_v42, %v3423_v43 }
  0x63   :  { %1923 = vmatpush.bf16.msra.mxu3 %v2818_v34  ;;  %v2975_v59 = vld [vmem:[%s5946_s1 + $0x370] sm:$0xf0]  ;;  %v3282_v61 = vor.u32 %v3819_v45, %v3279_v46  ;;  %v3787_v62 = vld [vmem:[%s5946_s1 + $0x4c4] sm:$0xf] }
  0x64   :  { %1905 = vmatpush.bf16.msra.mxu2 %v2674_v35  ;;  %v3151_v63 = vld [vmem:[%s5946_s1 + $0x4d0] sm:$0xf0]  ;;  %v23_v2 = vld [vmem:[%s5947_s0 + $0x40] sm:$0xff]  ;;  %v2978_v10 = vor.u32 %v3743_v58, %v2975_v59 }
  0x65   :  { %1886 = vmatpush.bf16.msra.mxu1 %v2546_v47  ;;  %v3851_v4 = vld [vmem:[%s5946_s1 + $0x6c4] sm:$0xf]  ;;  %v3407_v7 = vld [vmem:[%s5946_s1 + $0x6d0] sm:$0xf0]  ;;  %v3154_v11 = vor.u32 %v3787_v62, %v3151_v63  ;;  %v4709_v17 = vpack.c.bf16 %v32_v3, %v23_v2 }
  0x66   :  { %1939 = vmatpush.bf16.msrb.mxu0 %v2994_v49  ;;  %v3815_v12 = vld [vmem:[%s5946_s1 + $0x5a4] sm:$0xf]  ;;  %v3263_v15 = vld [vmem:[%s5946_s1 + $0x5b0] sm:$0xf0]  ;;  %v3410_v21 = vor.u32 %v3851_v4, %v3407_v7  ;;  %v50_v7 = vld [vmem:[%s5947_s0 + $0x118] sm:$0xff] }
  0x67   :  { %1924 = vmatpush.bf16.msra.mxu3 %v2802_v52  ;;  %v3783_v16 = vld [vmem:[%s5946_s1 + $0x4a4] sm:$0xf]  ;;  %v3135_v18 = vld [vmem:[%s5946_s1 + $0x4b0] sm:$0xf0]  ;;  %v3266_v22 = vor.u32 %v3815_v12, %v3263_v15 }
  0x68   :  { %1974 = vmatpush.bf16.msrb.mxu2 %v3298_v39  ;;  %v3739_v19 = vld [vmem:[%s5946_s1 + $0x344] sm:$0xf]  ;;  %v2959_v20 = vld [vmem:[%s5946_s1 + $0x350] sm:$0xf0]  ;;  %v3138_v25 = vor.u32 %v3783_v16, %v3135_v18  ;;  %1887 = vmatmul.bf16.vlgmr.msra.gmra.mxu1 %v4169_v48 }
  0x69   :  { %1955 = vmatpush.bf16.msrb.mxu1 %v3170_v55  ;;  %v3847_v23 = vld [vmem:[%s5946_s1 + $0x6a4] sm:$0xf]  ;;  %v3391_v24 = vld [vmem:[%s5946_s1 + $0x6b0] sm:$0xf0]  ;;  %v2962_v29 = vor.u32 %v3739_v19, %v2959_v20  ;;  %3627 = vmatmul.msk.bf16.vlgmr.msra.gmra.mxu0 %vm1701_vm0, %v4709_v17 }
  0x6a   :  { %1940 = vmatpush.bf16.msrb.mxu0 %v2978_v10  ;;  %v3811_v26 = vld [vmem:[%s5946_s1 + $0x584] sm:$0xf]  ;;  %v3247_v27 = vld [vmem:[%s5946_s1 + $0x590] sm:$0xf0]  ;;  %1906 = vmatmul.bf16.vlgmr.msra.gmra.mxu2 %v4180_v53  ;;  %v3394_v33 = vor.u32 %v3847_v23, %v3391_v24 }
  0x6b   :  { %1993 = vmatpush.bf16.msrb.mxu3 %v3426_v60  ;;  %v3779_v28 = vld [vmem:[%s5946_s1 + $0x484] sm:$0xf]  ;;  %v3119_v30 = vld [vmem:[%s5946_s1 + $0x490] sm:$0xf0]  ;;  %v3250_v34 = vor.u32 %v3811_v26, %v3247_v27 }
  0x6c   :  { %1975 = vmatpush.bf16.msrb.mxu2 %v3282_v61  ;;  %v3735_v31 = vld [vmem:[%s5946_s1 + $0x324] sm:$0xf]  ;;  %v2943_v32 = vld [vmem:[%s5946_s1 + $0x330] sm:$0xf0]  ;;  %1925 = vmatmul.bf16.vlgmr.msra.gmra.mxu3 %v4182_v54  ;;  %v3122_v37 = vor.u32 %v3779_v28, %v3119_v30 }
  0x6d   :  { %1956 = vmatpush.bf16.msrb.mxu1 %v3154_v11  ;;  %v3843_v35 = vld [vmem:[%s5946_s1 + $0x684] sm:$0xf]  ;;  %v3375_v36 = vld [vmem:[%s5946_s1 + $0x690] sm:$0xf0]  ;;  %v2946_v41 = vor.u32 %v3735_v31, %v2943_v32 }
  0x6e   :  { %v3807_v38 = vld [vmem:[%s5946_s1 + $0x564] sm:$0xf]  ;;  %v3231_v39 = vld [vmem:[%s5946_s1 + $0x570] sm:$0xf0]  ;;  %1941 = vmatpush.bf16.msrb.mxu0 %v2962_v29  ;;  %v3378_v49 = vor.u32 %v3843_v35, %v3375_v36  ;;  %v2661_v35 = vld [vmem:[%s5946_s1 + $0xe8] sm:$0xf] }
  0x6f   :  { %1994 = vmatpush.bf16.msrb.mxu3 %v3410_v21  ;;  %v3775_v40 = vld [vmem:[%s5946_s1 + $0x464] sm:$0xf]  ;;  %v3103_v42 = vld [vmem:[%s5946_s1 + $0x470] sm:$0xf0]  ;;  %v3234_v52 = vor.u32 %v3807_v38, %v3231_v39  ;;  %v3666_v36 = vld [vmem:[%s5946_s1 + $0xf4] sm:$0xf0] }
  0x70   :  { %1976 = vmatpush.bf16.msrb.mxu2 %v3266_v22  ;;  %v3731_v43 = vld [vmem:[%s5946_s1 + $0x304] sm:$0xf]  ;;  %v2927_v45 = vld [vmem:[%s5946_s1 + $0x310] sm:$0xf0]  ;;  %v3106_v58 = vor.u32 %v3775_v40, %v3103_v42 }
  0x71   :  { %1957 = vmatpush.bf16.msrb.mxu1 %v3138_v25  ;;  %v3887_v46 = vld [vmem:[%s5946_s1 + $0x7e4] sm:$0xf]  ;;  %v3551_v47 = vld [vmem:[%s5946_s1 + $0x7f0] sm:$0xf0]  ;;  %v2930_v62 = vor.u32 %v3731_v43, %v2927_v45 }
  0x72   :  { %v3839_v55 = vld [vmem:[%s5946_s1 + $0x664] sm:$0xf]  ;;  %v3359_v59 = vld [vmem:[%s5946_s1 + $0x670] sm:$0xf0]  ;;  %1942 = vmatpush.bf16.msrb.mxu0 %v2946_v41  ;;  %v3554_v3 = vor.u32 %v3887_v46, %v3551_v47  ;;  %v2662_v47 = vor.u32 %v3666_v36, %v2661_v35 }
  0x73   :  { %1995 = vmatpush.bf16.msrb.mxu3 %v3394_v33  ;;  %v3803_v60 = vld [vmem:[%s5946_s1 + $0x544] sm:$0xf]  ;;  %v3215_v61 = vld [vmem:[%s5946_s1 + $0x550] sm:$0xf0]  ;;  %v3362_v10 = vor.u32 %v3839_v55, %v3359_v59  ;;  %v3662_v59 = vld [vmem:[%s5946_s1 + $0xd4] sm:$0xf0] }
  0x74   :  { %1977 = vmatpush.bf16.msrb.mxu2 %v3250_v34  ;;  %v3771_v63 = vld [vmem:[%s5946_s1 + $0x444] sm:$0xf]  ;;  %v3087_v2 = vld [vmem:[%s5946_s1 + $0x450] sm:$0xf0]  ;;  %v3218_v11 = vor.u32 %v3803_v60, %v3215_v61 }
  0x75   :  { %1958 = vmatpush.bf16.msrb.mxu1 %v3122_v37  ;;  %v41_v4 = vld [vmem:[%s5947_s0 + $0xd0] sm:$0xff]  ;;  %v3835_v12 = vld [vmem:[%s5946_s1 + $0x644] sm:$0xf]  ;;  %v3090_v16 = vor.u32 %v3771_v63, %v3087_v2 }
  0x76   :  { %v3343_v15 = vld [vmem:[%s5946_s1 + $0x650] sm:$0xf0]  ;;  %v3799_v18 = vld [vmem:[%s5946_s1 + $0x524] sm:$0xf]  ;;  %1943 = vmatpush.bf16.msrb.mxu0 %v2930_v62  ;;  %v4818_v21 = vpack.c.bf16 %v50_v7, %v41_v4 }
  0x77   :  { %1996 = vmatpush.bf16.msrb.mxu3 %v3378_v49  ;;  %v3199_v19 = vld [vmem:[%s5946_s1 + $0x530] sm:$0xf0]  ;;  %v3767_v20 = vld [vmem:[%s5946_s1 + $0x424] sm:$0xf]  ;;  %v3346_v25 = vor.u32 %v3835_v12, %v3343_v15  ;;  %v2789_v49 = vld [vmem:[%s5946_s1 + $0x1e8] sm:$0xf] }
  0x78   :  { %1978 = vmatpush.bf16.msrb.mxu2 %v3234_v52  ;;  %v3071_v22 = vld [vmem:[%s5946_s1 + $0x430] sm:$0xf0]  ;;  %v3883_v23 = vld [vmem:[%s5946_s1 + $0x7c4] sm:$0xf]  ;;  %v3202_v26 = vor.u32 %v3799_v18, %v3199_v19  ;;  %1892 = vmatmul.bf16.gmra.mxu1 %v4301_v44  ;;  %v3698_v52 = vld [vmem:[%s5946_s1 + $0x1f4] sm:$0xf0] }
  0x79   :  { %1959 = vmatpush.bf16.msrb.mxu1 %v3106_v58  ;;  %v3535_v24 = vld [vmem:[%s5946_s1 + $0x7d0] sm:$0xf0]  ;;  %v3831_v27 = vld [vmem:[%s5946_s1 + $0x624] sm:$0xf]  ;;  %v3074_v30 = vor.u32 %v3767_v20, %v3071_v22  ;;  %3628 = vmatmul.msk.bf16.gmra.mxu0 %vm1701_vm0, %v4818_v21  ;;  %v2645_v58 = vld [vmem:[%s5946_s1 + $0xc8] sm:$0xf]  ;;  %v2790_v4 = vor.u32 %v3698_v52, %v2789_v49 }
  0x7a   :  { %2012 = vmatpush.bf16.msra.mxu0 %v3554_v3  ;;  %v3327_v28 = vld [vmem:[%s5946_s1 + $0x630] sm:$0xf0]  ;;  %v3795_v29 = vld [vmem:[%s5946_s1 + $0x504] sm:$0xf]  ;;  %v3538_v34 = vor.u32 %v3883_v23, %v3535_v24  ;;  %1911 = vmatmul.bf16.gmra.mxu2 %v4312_v50  ;;  %v2646_v7 = vor.u32 %v3662_v59, %v2645_v58  ;;  %v2629_v12 = vld [vmem:[%s5946_s1 + $0xa8] sm:$0xf] }
  0x7b   :  { %1997 = vmatpush.bf16.msrb.mxu3 %v3362_v10  ;;  %v3183_v31 = vld [vmem:[%s5946_s1 + $0x510] sm:$0xf0]  ;;  %v3763_v32 = vld [vmem:[%s5946_s1 + $0x404] sm:$0xf]  ;;  %v3330_v41 = vor.u32 %v3831_v27, %v3327_v28  ;;  %v2773_v10 = vld [vmem:[%s5946_s1 + $0x1c8] sm:$0xf] }
  0x7c   :  { %1979 = vmatpush.bf16.msrb.mxu2 %v3218_v11  ;;  %v3055_v33 = vld [vmem:[%s5946_s1 + $0x410] sm:$0xf0]  ;;  %v3903_v37 = vld [vmem:[%s5946_s1 + $0x864] sm:$0xf]  ;;  %1930 = vmatmul.bf16.gmra.mxu3 %v4314_v51  ;;  %v3186_v42 = vor.u32 %v3795_v29, %v3183_v31  ;;  %v3694_v11 = vld [vmem:[%s5946_s1 + $0x1d4] sm:$0xf0] }
  0x7d   :  { %1960 = vmatpush.bf16.msrb.mxu1 %v3090_v16  ;;  %v3615_v38 = vld [vmem:[%s5946_s1 + $0x870] sm:$0xf0]  ;;  %v3879_v39 = vld [vmem:[%s5946_s1 + $0x7a4] sm:$0xf]  ;;  %v3058_v45 = vor.u32 %v3763_v32, %v3055_v33  ;;  %v3658_v15 = vld [vmem:[%s5946_s1 + $0xb4] sm:$0xf0]  ;;  %v2774_v22 = vor.u32 %v3694_v11, %v2773_v10 }
  0x7e   :  { %v3519_v40 = vld [vmem:[%s5946_s1 + $0x7b0] sm:$0xf0]  ;;  %v3827_v43 = vld [vmem:[%s5946_s1 + $0x604] sm:$0xf]  ;;  %2013 = vmatpush.bf16.msra.mxu0 %v3538_v34  ;;  %v3618_v55 = vor.u32 %v3903_v37, %v3615_v38  ;;  %v2757_v19 = vld [vmem:[%s5946_s1 + $0x1a8] sm:$0xf]  ;;  %v2630_v23 = vor.u32 %v3658_v15, %v2629_v12 }
  0x7f   :  { %1998 = vmatpush.bf16.msrb.mxu3 %v3346_v25  ;;  %v3311_v46 = vld [vmem:[%s5946_s1 + $0x610] sm:$0xf0]  ;;  %v3522_v60 = vor.u32 %v3879_v39, %v3519_v40  ;;  %v3899_v61 = vld [vmem:[%s5946_s1 + $0x844] sm:$0xf]  ;;  %v3690_v27 = vld [vmem:[%s5946_s1 + $0x1b4] sm:$0xf0] }
  0x80   :  { %1980 = vmatpush.bf16.msrb.mxu2 %v3202_v26  ;;  %v3599_v62 = vld [vmem:[%s5946_s1 + $0x850] sm:$0xf0]  ;;  %v3875_v63 = vld [vmem:[%s5946_s1 + $0x784] sm:$0xf]  ;;  %v3314_v3 = vor.u32 %v3827_v43, %v3311_v46  ;;  %v2613_v28 = vld [vmem:[%s5946_s1 + $0x88] sm:$0xf]  ;;  %v2758_v34 = vor.u32 %v3690_v27, %v2757_v19 }
  0x81   :  { %1961 = vmatpush.bf16.msrb.mxu1 %v3074_v30  ;;  %v3503_v2 = vld [vmem:[%s5946_s1 + $0x790] sm:$0xf0]  ;;  %v3602_v16 = vor.u32 %v3899_v61, %v3599_v62  ;;  %v3871_v20 = vld [vmem:[%s5946_s1 + $0x764] sm:$0xf]  ;;  %v3654_v29 = vld [vmem:[%s5946_s1 + $0x94] sm:$0xf0] }
  0x82   :  { %2014 = vmatpush.bf16.msra.mxu0 %v3522_v60  ;;  %v3506_v18 = vor.u32 %v3875_v63, %v3503_v2  ;;  %v3487_v24 = vld [vmem:[%s5946_s1 + $0x770] sm:$0xf0]  ;;  %v3895_v25 = vld [vmem:[%s5946_s1 + $0x824] sm:$0xf]  ;;  %v2741_v30 = vld [vmem:[%s5946_s1 + $0x188] sm:$0xf]  ;;  %v2614_v35 = vor.u32 %v3654_v29, %v2613_v28 }
  0x83   :  { %1999 = vmatpush.bf16.msrb.mxu3 %v3330_v41  ;;  %v3583_v26 = vld [vmem:[%s5946_s1 + $0x830] sm:$0xf0]  ;;  %v3490_v31 = vor.u32 %v3871_v20, %v3487_v24  ;;  %v3867_v33 = vld [vmem:[%s5946_s1 + $0x744] sm:$0xf]  ;;  %v3686_v39 = vld [vmem:[%s5946_s1 + $0x194] sm:$0xf0] }
  0x84   :  { %1981 = vmatpush.bf16.msrb.mxu2 %v3186_v42  ;;  %v3586_v32 = vor.u32 %v3895_v25, %v3583_v26  ;;  %v3471_v36 = vld [vmem:[%s5946_s1 + $0x750] sm:$0xf0]  ;;  %v3891_v37 = vld [vmem:[%s5946_s1 + $0x804] sm:$0xf]  ;;  %v2597_v40 = vld [vmem:[%s5946_s1 + $0x68] sm:$0xf] }
  0x85   :  { %1962 = vmatpush.bf16.msrb.mxu1 %v3058_v45  ;;  %v3567_v38 = vld [vmem:[%s5946_s1 + $0x810] sm:$0xf0]  ;;  %v3650_v41 = vld [vmem:[%s5946_s1 + $0x74] sm:$0xf0]  ;;  %v3045_v42 = vld [vmem:[%s5946_s1 + $0x3e8] sm:$0xf]  ;;  %v3474_v45 = vor.u32 %v3867_v33, %v3471_v36 }
  0x86   :  { %2015 = vmatpush.bf16.msra.mxu0 %v3506_v18  ;;  %v3762_v43 = vld [vmem:[%s5946_s1 + $0x3f4] sm:$0xf0]  ;;  %v3570_v46 = vor.u32 %v3891_v37, %v3567_v38  ;;  %v2598_v49 = vor.u32 %v3650_v41, %v2597_v40  ;;  %v2725_v52 = vld [vmem:[%s5946_s1 + $0x168] sm:$0xf]  ;;  %v3455_v58 = vld [vmem:[%s5946_s1 + $0x730] sm:$0xf0] }
  0x87   :  { %2000 = vmatpush.bf16.msrb.mxu3 %v3314_v3  ;;  %v3682_v59 = vld [vmem:[%s5946_s1 + $0x174] sm:$0xf0]  ;;  %v2581_v60 = vld [vmem:[%s5946_s1 + $0x48] sm:$0xf]  ;;  %v3046_v62 = vor.u32 %v3762_v43, %v3045_v42  ;;  %v3859_v11 = vld [vmem:[%s5946_s1 + $0x704] sm:$0xf] }
  0x88   :  { %2050 = vmatpush.bf16.msra.mxu2 %v2662_v47  ;;  %1963 = vmatmul.bf16.vlgmr.msrb.gmra.mxu1 %v4457_v0  ;;  %v2742_v47 = vor.u32 %v3686_v39, %v2741_v30  ;;  %v3646_v61 = vld [vmem:[%s5946_s1 + $0x54] sm:$0xf0]  ;;  %v3029_v63 = vld [vmem:[%s5946_s1 + $0x3c8] sm:$0xf]  ;;  %v3439_v12 = vld [vmem:[%s5946_s1 + $0x710] sm:$0xf0] }
  0x89   :  { %2035 = vmatpush.bf16.msra.mxu1 %v3618_v55  ;;  %1944 = vmatmul.bf16.vlgmr.msrb.gmra.mxu0 %v4190_v57  ;;  %v3863_v55 = vld [vmem:[%s5946_s1 + $0x724] sm:$0xf]  ;;  %v3758_v2 = vld [vmem:[%s5946_s1 + $0x3d4] sm:$0xf0]  ;;  %v2709_v10 = vld [vmem:[%s5946_s1 + $0x148] sm:$0xf] }
  0x8a   :  { %1982 = vmatmul.bf16.vlgmr.msrb.gmra.mxu2 %v4459_v1  ;;  %2016 = vmatpush.bf16.msra.mxu0 %v3490_v31  ;;  %v3458_v3 = vor.u32 %v3863_v55, %v3455_v58  ;;  %v3678_v15 = vld [vmem:[%s5946_s1 + $0x154] sm:$0xf0]  ;;  %v3030_v19 = vor.u32 %v3758_v2, %v3029_v63  ;;  %v2693_v20 = vld [vmem:[%s5946_s1 + $0x128] sm:$0xf] }
  0x8b   :  { %2069 = vmatpush.bf16.msra.mxu3 %v2790_v4  ;;  %v2726_v4 = vor.u32 %v3682_v59, %v2725_v52  ;;  %v3642_v18 = vld [vmem:[%s5946_s1 + $0x34] sm:$0xf0]  ;;  %v2710_v24 = vor.u32 %v3678_v15, %v2709_v10  ;;  %v3013_v27 = vld [vmem:[%s5946_s1 + $0x3a8] sm:$0xf] }
  0x8c   :  { %2051 = vmatpush.bf16.msra.mxu2 %v2646_v7  ;;  %2001 = vmatmul.bf16.vlgmr.msrb.gmra.mxu3 %v4470_v5  ;;  %v2582_v7 = vor.u32 %v3646_v61, %v2581_v60  ;;  %v3730_v26 = vld [vmem:[%s5946_s1 + $0x2f4] sm:$0xf0]  ;;  %v2549_v30 = vld [vmem:[%s5946_s1 + $0x8] sm:$0xf] }
  0x8d   :  { %2036 = vmatpush.bf16.msra.mxu1 %v3602_v16  ;;  %v2565_v16 = vld [vmem:[%s5946_s1 + $0x28] sm:$0xf]  ;;  %v3754_v28 = vld [vmem:[%s5946_s1 + $0x3b4] sm:$0xf0] }
  0x8e   :  { %2017 = vmatpush.bf16.msra.mxu0 %v3474_v45  ;;  %v2566_v25 = vor.u32 %v3642_v18, %v2565_v16  ;;  %v3674_v29 = vld [vmem:[%s5946_s1 + $0x134] sm:$0xf0]  ;;  %v3014_v36 = vor.u32 %v3754_v28, %v3013_v27  ;;  %v2997_v40 = vld [vmem:[%s5946_s1 + $0x388] sm:$0xf] }
  0x8f   :  { %2070 = vmatpush.bf16.msra.mxu3 %v2774_v22  ;;  %v3442_v22 = vor.u32 %v3859_v11, %v3439_v12  ;;  %v3638_v31 = vld [vmem:[%s5946_s1 + $0x14] sm:$0xf0]  ;;  %v2694_v37 = vor.u32 %v3674_v29, %v2693_v20  ;;  %v2677_v42 = vld [vmem:[%s5946_s1 + $0x108] sm:$0xf] }
  0x90   :  { %2052 = vmatpush.bf16.msra.mxu2 %v2630_v23  ;;  %v2917_v23 = vld [vmem:[%s5946_s1 + $0x2e8] sm:$0xf]  ;;  %v3794_v33 = vld [vmem:[%s5946_s1 + $0x4f4] sm:$0xf0]  ;;  %v2550_v38 = vor.u32 %v3638_v31, %v2549_v30 }
  0x91   :  { %2037 = vmatpush.bf16.msra.mxu1 %v3586_v32  ;;  %v3173_v32 = vld [vmem:[%s5946_s1 + $0x4e8] sm:$0xf]  ;;  %v3726_v39 = vld [vmem:[%s5946_s1 + $0x2d4] sm:$0xf0] }
  0x92   :  { %2018 = vmatpush.bf16.msra.mxu0 %v3458_v3  ;;  %v3750_v41 = vld [vmem:[%s5946_s1 + $0x394] sm:$0xf0]  ;;  %v3174_v45 = vor.u32 %v3794_v33, %v3173_v32  ;;  %v2885_v58 = vld [vmem:[%s5946_s1 + $0x2a8] sm:$0xf] }
  0x93   :  { %2071 = vmatpush.bf16.msra.mxu3 %v2758_v34  ;;  %v2918_v34 = vor.u32 %v3730_v26, %v2917_v23  ;;  %v3670_v43 = vld [vmem:[%s5946_s1 + $0x114] sm:$0xf0]  ;;  %v2998_v59 = vor.u32 %v3750_v41, %v2997_v40  ;;  %v3141_v10 = vld [vmem:[%s5946_s1 + $0x4a8] sm:$0xf] }
  0x94   :  { %2053 = vmatpush.bf16.msra.mxu2 %v2614_v35  ;;  %v2901_v35 = vld [vmem:[%s5946_s1 + $0x2c8] sm:$0xf]  ;;  %v3790_v52 = vld [vmem:[%s5946_s1 + $0x4d4] sm:$0xf0]  ;;  %v2678_v60 = vor.u32 %v3670_v43, %v2677_v42 }
  0x95   :  { %2038 = vmatpush.bf16.msra.mxu1 %v3570_v46  ;;  %v3301_v46 = vld [vmem:[%s5946_s1 + $0x5e8] sm:$0xf]  ;;  %v2902_v55 = vor.u32 %v3726_v39, %v2901_v35  ;;  %v3722_v61 = vld [vmem:[%s5946_s1 + $0x2b4] sm:$0xf0] }
  0x96   :  { %2019 = vmatpush.bf16.msra.mxu0 %v3442_v22  ;;  %v3746_v63 = vld [vmem:[%s5946_s1 + $0x374] sm:$0xf0]  ;;  %v2886_v12 = vor.u32 %v3722_v61, %v2885_v58  ;;  %v2869_v15 = vld [vmem:[%s5946_s1 + $0x288] sm:$0xf] }
  0x97   :  { %2072 = vmatpush.bf16.msra.mxu3 %v2742_v47  ;;  %v3826_v47 = vld [vmem:[%s5946_s1 + $0x5f4] sm:$0xf0]  ;;  %v3125_v28 = vld [vmem:[%s5946_s1 + $0x488] sm:$0xf] }
  0x98   :  { %2054 = vmatpush.bf16.msra.mxu2 %v2598_v49  ;;  %1968 = vmatmul.bf16.gmra.mxu1 %v4589_v8  ;;  %v3157_v49 = vld [vmem:[%s5946_s1 + $0x4c8] sm:$0xf]  ;;  %v3302_v2 = vor.u32 %v3826_v47, %v3301_v46  ;;  %v3786_v11 = vld [vmem:[%s5946_s1 + $0x4b4] sm:$0xf0] }
  0x99   :  { %2107 = vmatpush.bf16.msrb.mxu1 %v3046_v62  ;;  %1949 = vmatmul.bf16.gmra.mxu0 %v4322_v56  ;;  %v2981_v62 = vld [vmem:[%s5946_s1 + $0x368] sm:$0xf]  ;;  %v3158_v3 = vor.u32 %v3790_v52, %v3157_v49  ;;  %v3718_v18 = vld [vmem:[%s5946_s1 + $0x294] sm:$0xf0]  ;;  %v3142_v23 = vor.u32 %v3786_v11, %v3141_v10 }
  0x9a   :  { %1987 = vmatmul.bf16.gmra.mxu2 %v4591_v9  ;;  %2088 = vmatpush.bf16.msrb.mxu0 %v2918_v34  ;;  %v2982_v16 = vor.u32 %v3746_v63, %v2981_v62  ;;  %v3742_v20 = vld [vmem:[%s5946_s1 + $0x354] sm:$0xf0]  ;;  %v2870_v26 = vor.u32 %v3718_v18, %v2869_v15  ;;  %v2853_v30 = vld [vmem:[%s5946_s1 + $0x268] sm:$0xf] }
  0x9b   :  { %2073 = vmatpush.bf16.msra.mxu3 %v2726_v4  ;;  %v3285_v4 = vld [vmem:[%s5946_s1 + $0x5c8] sm:$0xf]  ;;  %v3782_v29 = vld [vmem:[%s5946_s1 + $0x494] sm:$0xf0] }
  0x9c   :  { %2055 = vmatpush.bf16.msra.mxu2 %v2582_v7  ;;  %2006 = vmatmul.bf16.gmra.mxu3 %v4602_v13  ;;  %v3822_v7 = vld [vmem:[%s5946_s1 + $0x5d4] sm:$0xf0]  ;;  %v2949_v33 = vld [vmem:[%s5946_s1 + $0x328] sm:$0xf] }
  0x9d   :  { %2108 = vmatpush.bf16.msrb.mxu1 %v3030_v19  ;;  %v2965_v19 = vld [vmem:[%s5946_s1 + $0x348] sm:$0xf]  ;;  %v3286_v22 = vor.u32 %v3822_v7, %v3285_v4  ;;  %v3714_v32 = vld [vmem:[%s5946_s1 + $0x274] sm:$0xf0] }
  0x9e   :  { %2089 = vmatpush.bf16.msrb.mxu0 %v2902_v55  ;;  %v2966_v27 = vor.u32 %v3742_v20, %v2965_v19  ;;  %v3738_v34 = vld [vmem:[%s5946_s1 + $0x334] sm:$0xf0]  ;;  %v3253_v39 = vld [vmem:[%s5946_s1 + $0x588] sm:$0xf]  ;;  %v2854_v43 = vor.u32 %v3714_v32, %v2853_v30 }
  0x9f   :  { %2074 = vmatpush.bf16.msra.mxu3 %v2710_v24  ;;  %v3269_v24 = vld [vmem:[%s5946_s1 + $0x5a8] sm:$0xf]  ;;  %v3814_v40 = vld [vmem:[%s5946_s1 + $0x594] sm:$0xf0]  ;;  %v2950_v46 = vor.u32 %v3738_v34, %v2949_v33 }
  0xa0   :  { %2056 = vmatpush.bf16.msra.mxu2 %v2566_v25  ;;  %v3818_v25 = vld [vmem:[%s5946_s1 + $0x5b4] sm:$0xf0]  ;;  %v3109_v41 = vld [vmem:[%s5946_s1 + $0x468] sm:$0xf] }
  0xa1   :  { %2109 = vmatpush.bf16.msrb.mxu1 %v3014_v36  ;;  %v1717_v31 = vpop.f32.mrf.mxu0  ;;  %v1736_v35 = vpop.f32.mrf.mxu1  ;;  %v3778_v42 = vld [vmem:[%s5946_s1 + $0x474] sm:$0xf0]  ;;  %v2933_v49 = vld [vmem:[%s5946_s1 + $0x308] sm:$0xf] }
  0xa2   :  { %2090 = vmatpush.bf16.msrb.mxu0 %v2886_v12  ;;  %v1737_v36 = vadd.f32 %v1736_v35, %v1717_v31  ;;  %v3710_v47 = vld [vmem:[%s5946_s1 + $0x254] sm:$0xf0]  ;;  %v3557_v55 = vld [vmem:[%s5946_s1 + $0x7e8] sm:$0xf] }
  0xa3   :  { %2075 = vmatpush.bf16.msra.mxu3 %v2694_v37  ;;  %v3270_v37 = vor.u32 %v3818_v25, %v3269_v24  ;;  %v3734_v52 = vld [vmem:[%s5946_s1 + $0x314] sm:$0xf0]  ;;  %v3237_v61 = vld [vmem:[%s5946_s1 + $0x568] sm:$0xf] }
  0xa4   :  { %2057 = vmatpush.bf16.msra.mxu2 %v2550_v38  ;;  %v3126_v38 = vor.u32 %v3782_v29, %v3125_v28  ;;  %v3890_v58 = vld [vmem:[%s5946_s1 + $0x7f4] sm:$0xf0]  ;;  %v2934_v7 = vor.u32 %v3734_v52, %v2933_v49  ;;  %v2821_v15 = vld [vmem:[%s5946_s1 + $0x228] sm:$0xf] }
  0xa5   :  { %2110 = vmatpush.bf16.msrb.mxu1 %v2998_v59  ;;  %v3254_v59 = vor.u32 %v3814_v40, %v3253_v39  ;;  %v3810_v62 = vld [vmem:[%s5946_s1 + $0x574] sm:$0xf0]  ;;  %v3558_v18 = vor.u32 %v3890_v58, %v3557_v55  ;;  %v3077_v29 = vld [vmem:[%s5946_s1 + $0x428] sm:$0xf] }
  0xa6   :  { %2091 = vmatpush.bf16.msrb.mxu0 %v2870_v26  ;;  %v3238_v20 = vor.u32 %v3810_v62, %v3237_v61  ;;  %v3806_v28 = vld [vmem:[%s5946_s1 + $0x554] sm:$0xf0]  ;;  %v2805_v32 = vld [vmem:[%s5946_s1 + $0x208] sm:$0xf] }
  0xa7   :  { %2076 = vmatpush.bf16.msra.mxu3 %v2678_v60  ;;  %v3110_v60 = vor.u32 %v3778_v42, %v3109_v41  ;;  %v3770_v30 = vld [vmem:[%s5946_s1 + $0x434] sm:$0xf0]  ;;  %v3061_v40 = vld [vmem:[%s5946_s1 + $0x408] sm:$0xf] }
  0xa8   :  { %2126 = vmatpush.bf16.msrb.mxu2 %v3174_v45  ;;  %v2837_v45 = vld [vmem:[%s5946_s1 + $0x248] sm:$0xf]  ;;  %3629 = vmatmul.msk.bf16.vlgmr.msra.gmra.mxu1 %vm1701_vm0, %v4709_v17  ;;  %v3702_v33 = vld [vmem:[%s5946_s1 + $0x214] sm:$0xf0] }
  0xa9   :  { %2111 = vmatpush.bf16.msrb.mxu1 %v2982_v16  ;;  %2020 = vmatmul.bf16.vlgmr.msra.gmra.mxu0 %v4472_v6  ;;  %v2838_v4 = vor.u32 %v3710_v47, %v2837_v45  ;;  %v1719_v12 = vpop.f32.mrf.mxu0  ;;  %v3706_v16 = vld [vmem:[%s5946_s1 + $0x234] sm:$0xf0]  ;;  %v1738_v19 = vpop.f32.mrf.mxu1  ;;  %v2806_v42 = vor.u32 %v3702_v33, %v2805_v32  ;;  %v3621_v49 = vld [vmem:[%s5946_s1 + $0x868] sm:$0xf] }
  0xaa   :  { %2058 = vmatmul.bf16.vlgmr.msra.gmra.mxu2 %v4169_v48  ;;  %v1755_v63 = vpop.f32.mrf.mxu2  ;;  %2092 = vmatpush.bf16.msrb.mxu0 %v2854_v43  ;;  %v1739_v25 = vadd.f32 %v1738_v19, %v1719_v12  ;;  %v2822_v31 = vor.u32 %v3706_v16, %v2821_v15  ;;  %v3766_v41 = vld [vmem:[%s5946_s1 + $0x414] sm:$0xf0]  ;;  %v3429_v43 = vld [vmem:[%s5946_s1 + $0x6e8] sm:$0xf]  ;;  %v2663_v12 = vld [vmem:[%s5946_s1 + $0xf8] sm:$0xf0] }
  0xab   :  { %2145 = vmatpush.bf16.msrb.mxu3 %v3302_v2  ;;  %v3093_v2 = vld [vmem:[%s5946_s1 + $0x448] sm:$0xf]  ;;  %v1756_v10 = vadd.f32 %v1755_v63, %v1737_v36  ;;  %v1774_v11 = vpop.f32.mrf.mxu3  ;;  %v3078_v36 = vor.u32 %v3770_v30, %v3077_v29  ;;  %v3906_v52 = vld [vmem:[%s5946_s1 + $0x874] sm:$0xf0]  ;;  %v3660_v29 = vld [vmem:[%s5946_s1 + $0xcc] sm:$0xf] }
  0xac   :  { %2127 = vmatpush.bf16.msrb.mxu2 %v3158_v3  ;;  %2077 = vmatmul.bf16.vlgmr.msra.gmra.mxu3 %v4180_v53  ;;  %v3774_v3 = vld [vmem:[%s5946_s1 + $0x454] sm:$0xf0]  ;;  %v3413_v15 = vld [vmem:[%s5946_s1 + $0x6c8] sm:$0xf]  ;;  %v2647_v30 = vld [vmem:[%s5946_s1 + $0xd8] sm:$0xf0] }
  0xad   :  { %2112 = vmatpush.bf16.msrb.mxu1 %v2966_v27  ;;  %v5195_v24 = vadd.f32 %v1774_v11, %v1756_v10  ;;  %v3094_v26 = vor.u32 %v3774_v3, %v3093_v2  ;;  %v3221_v27 = vld [vmem:[%s5946_s1 + $0x548] sm:$0xf]  ;;  %v3858_v55 = vld [vmem:[%s5946_s1 + $0x6f4] sm:$0xf0]  ;;  %v3062_v2 = vor.u32 %v3766_v41, %v3061_v40  ;;  %v3664_v11 = vld [vmem:[%s5946_s1 + $0xec] sm:$0xf] }
  0xae   :  { %2093 = vmatpush.bf16.msrb.mxu0 %v2838_v4  ;;  %v3222_v35 = vor.u32 %v3806_v28, %v3221_v27  ;;  %v3882_v61 = vld [vmem:[%s5946_s1 + $0x7b4] sm:$0xf0]  ;;  %v3189_v3 = vld [vmem:[%s5946_s1 + $0x508] sm:$0xf]  ;;  %v3430_v10 = vor.u32 %v3858_v55, %v3429_v43  ;;  %v2666_v27 = vor.u32 %v3664_v11, %v2663_v12 }
  0xaf   :  { %2146 = vmatpush.bf16.msrb.mxu3 %v3286_v22  ;;  %v3541_v22 = vld [vmem:[%s5946_s1 + $0x7c8] sm:$0xf]  ;;  %v3798_v4 = vld [vmem:[%s5946_s1 + $0x514] sm:$0xf0] }
  0xb0   :  { %2128 = vmatpush.bf16.msrb.mxu2 %v3142_v23  ;;  %v3886_v23 = vld [vmem:[%s5946_s1 + $0x7d4] sm:$0xf0]  ;;  %v3589_v40 = vld [vmem:[%s5946_s1 + $0x828] sm:$0xf] }
  0xb1   :  { %2113 = vmatpush.bf16.msrb.mxu1 %v2950_v46  ;;  %v3542_v34 = vor.u32 %v3886_v23, %v3541_v22  ;;  %v3854_v16 = vld [vmem:[%s5946_s1 + $0x6d4] sm:$0xf0]  ;;  %v3509_v22 = vld [vmem:[%s5946_s1 + $0x788] sm:$0xf] }
  0xb2   :  { %v1757_v39 = vpop.f32.mrf.mxu2  ;;  %2094 = vmatpush.bf16.msrb.mxu0 %v2822_v31  ;;  %v3878_v23 = vld [vmem:[%s5946_s1 + $0x794] sm:$0xf0]  ;;  %v3414_v28 = vor.u32 %v3854_v16, %v3413_v15  ;;  %v3381_v55 = vld [vmem:[%s5946_s1 + $0x688] sm:$0xf]  ;;  %v2615_v16 = vld [vmem:[%s5946_s1 + $0x98] sm:$0xf0] }
  0xb3   :  { %2147 = vmatpush.bf16.msrb.mxu3 %v3270_v37  ;;  %v3205_v37 = vld [vmem:[%s5946_s1 + $0x528] sm:$0xf]  ;;  %v1758_v45 = vadd.f32 %v1757_v39, %v1739_v25  ;;  %v1776_v46 = vpop.f32.mrf.mxu3  ;;  %v1722_v47 = vpop.f32.mrf.mxu0  ;;  %v3190_v25 = vor.u32 %v3798_v4, %v3189_v3  ;;  %v3898_v41 = vld [vmem:[%s5946_s1 + $0x834] sm:$0xf0] }
  0xb4   :  { %2129 = vmatpush.bf16.msrb.mxu2 %v3126_v38  ;;  %v3802_v38 = vld [vmem:[%s5946_s1 + $0x534] sm:$0xf0]  ;;  %v1741_v58 = vpop.f32.mrf.mxu1 }
  0xb5   :  { %2114 = vmatpush.bf16.msrb.mxu1 %v2934_v7  ;;  %v5245_v62 = vadd.f32 %v1776_v46, %v1758_v45  ;;  %v1742_v63 = vadd.f32 %v1741_v58, %v1722_v47  ;;  %v3622_v7 = vor.u32 %v3906_v52, %v3621_v49  ;;  %v2650_v46 = vor.u32 %v3660_v29, %v2647_v30  ;;  %v3656_v49 = vld [vmem:[%s5946_s1 + $0xac] sm:$0xf]  ;;  %v2631_v52 = vld [vmem:[%s5946_s1 + $0xb8] sm:$0xf0]  ;;  %v3846_v58 = vld [vmem:[%s5946_s1 + $0x694] sm:$0xf0] }
  0xb6   :  { %2095 = vmatpush.bf16.msrb.mxu0 %v2806_v42  ;;  %v3874_v42 = vld [vmem:[%s5946_s1 + $0x774] sm:$0xf0]  ;;  %v2634_v3 = vor.u32 %v3656_v49, %v2631_v52  ;;  %v3382_v4 = vor.u32 %v3846_v58, %v3381_v55  ;;  %v3461_v29 = vld [vmem:[%s5946_s1 + $0x728] sm:$0xf]  ;;  %v3031_v49 = vld [vmem:[%s5946_s1 + $0x3d8] sm:$0xf0] }
  0xb7   :  { %2148 = vmatpush.bf16.msrb.mxu3 %v3254_v59  ;;  %v3206_v59 = vor.u32 %v3802_v38, %v3205_v37  ;;  %v3510_v37 = vor.u32 %v3878_v23, %v3509_v22  ;;  %v3493_v38 = vld [vmem:[%s5946_s1 + $0x768] sm:$0xf]  ;;  %v3894_v11 = vld [vmem:[%s5946_s1 + $0x814] sm:$0xf0]  ;;  %v2583_v58 = vld [vmem:[%s5946_s1 + $0x58] sm:$0xf0] }
  0xb8   :  { %2130 = vmatpush.bf16.msrb.mxu2 %v3110_v60  ;;  %v3525_v60 = vld [vmem:[%s5946_s1 + $0x7a8] sm:$0xf]  ;;  %3630 = vmatmul.msk.bf16.gmra.mxu1 %vm1701_vm0, %v4818_v21 }
  0xb9   :  { %2183 = vmatpush.bf16.msra.mxu1 %v3558_v18  ;;  %2025 = vmatmul.bf16.gmra.mxu0 %v4604_v14  ;;  %v3605_v18 = vld [vmem:[%s5946_s1 + $0x848] sm:$0xf]  ;;  %v3526_v19 = vor.u32 %v3882_v61, %v3525_v60  ;;  %v3494_v60 = vor.u32 %v3874_v42, %v3493_v38  ;;  %v3652_v61 = vld [vmem:[%s5946_s1 + $0x8c] sm:$0xf] }
  0xba   :  { %2063 = vmatmul.bf16.gmra.mxu2 %v4301_v44  ;;  %2164 = vmatpush.bf16.msra.mxu0 %v3430_v10  ;;  %v3573_v10 = vld [vmem:[%s5946_s1 + $0x808] sm:$0xf]  ;;  %v2618_v30 = vor.u32 %v3652_v61, %v2615_v16 }
  0xbb   :  { %2149 = vmatpush.bf16.msrb.mxu3 %v3238_v20  ;;  %v3902_v20 = vld [vmem:[%s5946_s1 + $0x854] sm:$0xf0]  ;;  %v1724_v33 = vpop.f32.mrf.mxu0 }
  0xbc   :  { %2131 = vmatpush.bf16.msrb.mxu2 %v3094_v26  ;;  %2082 = vmatmul.bf16.gmra.mxu3 %v4312_v50  ;;  %v1760_v26 = vpop.f32.mrf.mxu2  ;;  %v1779_v32 = vpop.f32.mrf.mxu3 }
  0xbd   :  { %2184 = vmatpush.bf16.msra.mxu1 %v3542_v34  ;;  %v1761_v31 = vadd.f32 %v1760_v26, %v1742_v63  ;;  %v3606_v34 = vor.u32 %v3902_v20, %v3605_v18  ;;  %v1743_v39 = vpop.f32.mrf.mxu1  ;;  %v3477_v63 = vld [vmem:[%s5946_s1 + $0x748] sm:$0xf]  ;;  %v3648_v26 = vld [vmem:[%s5946_s1 + $0x6c] sm:$0xf] }
  0xbe   :  { %v1744_v45 = vadd.f32 %v1743_v39, %v1724_v33  ;;  %2165 = vmatpush.bf16.msra.mxu0 %v3414_v28  ;;  %v3365_v18 = vld [vmem:[%s5946_s1 + $0x668] sm:$0xf]  ;;  %v3574_v28 = vor.u32 %v3894_v11, %v3573_v10  ;;  %v3047_v33 = vld [vmem:[%s5946_s1 + $0x3f8] sm:$0xf0]  ;;  %v3644_v39 = vld [vmem:[%s5946_s1 + $0x4c] sm:$0xf] }
  0xbf   :  { %2150 = vmatpush.bf16.msrb.mxu3 %v3222_v35  ;;  %v3397_v35 = vld [vmem:[%s5946_s1 + $0x6a8] sm:$0xf]  ;;  %v5306_v43 = vadd.f32 %v1779_v32, %v1761_v31  ;;  %v3866_v32 = vld [vmem:[%s5946_s1 + $0x734] sm:$0xf0] }
  0xc0   :  { %2132 = vmatpush.bf16.msrb.mxu2 %v3078_v36  ;;  %v3850_v36 = vld [vmem:[%s5946_s1 + $0x6b4] sm:$0xf0] }
  0xc1   :  { %2185 = vmatpush.bf16.msra.mxu1 %v3526_v19  ;;  %v3398_v47 = vor.u32 %v3850_v36, %v3397_v35  ;;  %v3842_v19 = vld [vmem:[%s5946_s1 + $0x674] sm:$0xf0]  ;;  %v2599_v35 = vld [vmem:[%s5946_s1 + $0x78] sm:$0xf0]  ;;  %v3349_v36 = vld [vmem:[%s5946_s1 + $0x648] sm:$0xf] }
  0xc2   :  { %v3366_v31 = vor.u32 %v3842_v19, %v3365_v18  ;;  %v2602_v42 = vor.u32 %v3648_v26, %v2599_v35  ;;  %v3640_v18 = vld [vmem:[%s5946_s1 + $0x2c] sm:$0xf]  ;;  %v3830_v26 = vld [vmem:[%s5946_s1 + $0x614] sm:$0xf0] }
  0xc3   :  { %2151 = vmatpush.bf16.msrb.mxu3 %v3206_v59  ;;  %v3590_v59 = vor.u32 %v3898_v41, %v3589_v40  ;;  %2166 = vmatpush.bf16.msra.mxu0 %v3398_v47  ;;  %v3462_v40 = vor.u32 %v3866_v32, %v3461_v29  ;;  %v3445_v41 = vld [vmem:[%s5946_s1 + $0x708] sm:$0xf]  ;;  %v3756_v47 = vld [vmem:[%s5946_s1 + $0x3cc] sm:$0xf] }
  0xc4   :  { %2133 = vmatpush.bf16.msrb.mxu2 %v3062_v2  ;;  %v1762_v2 = vpop.f32.mrf.mxu2  ;;  %v1781_v15 = vpop.f32.mrf.mxu3  ;;  %v3034_v61 = vor.u32 %v3756_v47, %v3031_v49  ;;  %v3752_v19 = vld [vmem:[%s5946_s1 + $0x3ac] sm:$0xf] }
  0xc5   :  { %2186 = vmatpush.bf16.msra.mxu1 %v3510_v37  ;;  %v1763_v12 = vadd.f32 %v1762_v2, %v1744_v45  ;;  %v1812_v22 = vpop.f32.mrf.mxu1  ;;  %v3838_v37 = vld [vmem:[%s5946_s1 + $0x654] sm:$0xf0]  ;;  %v3636_v29 = vld [vmem:[%s5946_s1 + $0xc] sm:$0xf] }
  0xc6   :  { %v1793_v20 = vpop.f32.mrf.mxu0  ;;  %v3350_v45 = vor.u32 %v3838_v37, %v3349_v36  ;;  %v2551_v37 = vld [vmem:[%s5946_s1 + $0x18] sm:$0xf0] }
  0xc7   :  { %2152 = vmatpush.bf16.msrb.mxu3 %v3190_v25  ;;  %v5344_v23 = vadd.f32 %v1781_v15, %v1763_v12  ;;  %v1794_v25 = vadd.f32 %v1793_v20, %v5195_v24  ;;  %2167 = vmatpush.bf16.msra.mxu0 %v3382_v4  ;;  %v3760_v24 = vld [vmem:[%s5946_s1 + $0x3ec] sm:$0xf]  ;;  %v2586_v15 = vor.u32 %v3644_v39, %v2583_v58  ;;  %v2999_v39 = vld [vmem:[%s5946_s1 + $0x398] sm:$0xf0] }
  0xc8   :  { %2206 = vmatpush.bf16.msra.mxu2 %v3622_v7  ;;  %v3870_v7 = vld [vmem:[%s5946_s1 + $0x754] sm:$0xf0]  ;;  %2115 = vmatmul.bf16.vlgmr.msrb.gmra.mxu1 %v4190_v57  ;;  %v3050_v38 = vor.u32 %v3760_v24, %v3047_v33  ;;  %v3728_v4 = vld [vmem:[%s5946_s1 + $0x2ec] sm:$0xf]  ;;  %v2791_v24 = vld [vmem:[%s5946_s1 + $0x1f8] sm:$0xf0] }
  0xc9   :  { %2187 = vmatpush.bf16.msra.mxu1 %v3494_v60  ;;  %2096 = vmatmul.bf16.vlgmr.msrb.gmra.mxu0 %v4182_v54  ;;  %v3834_v60 = vld [vmem:[%s5946_s1 + $0x634] sm:$0xf0]  ;;  %v3724_v33 = vld [vmem:[%s5946_s1 + $0x2cc] sm:$0xf] }
  0xca   :  { %2134 = vmatmul.bf16.vlgmr.msrb.gmra.mxu2 %v4457_v0 }
  0xcb   :  { %2221 = vmatpush.bf16.msra.mxu3 %v2666_v27  ;;  %v3478_v27 = vor.u32 %v3870_v7, %v3477_v63  ;;  %2168 = vmatpush.bf16.msra.mxu0 %v3366_v31  ;;  %v2919_v7 = vld [vmem:[%s5946_s1 + $0x2f8] sm:$0xf0] }
  0xcc   :  { %2207 = vmatpush.bf16.msra.mxu2 %v3606_v34  ;;  %v1813_v34 = vadd.f32 %v1812_v22, %v1794_v25  ;;  %2153 = vmatmul.bf16.vlgmr.msrb.gmra.mxu3 %v4459_v1  ;;  %v2567_v22 = vld [vmem:[%s5946_s1 + $0x38] sm:$0xf0]  ;;  %v3317_v25 = vld [vmem:[%s5946_s1 + $0x608] sm:$0xf] }
  0xcd   :  { %2188 = vmatpush.bf16.msra.mxu1 %v3478_v27  ;;  %v1831_v52 = vpop.f32.mrf.mxu2  ;;  %v2922_v27 = vor.u32 %v3728_v4, %v2919_v7  ;;  %v2570_v31 = vor.u32 %v3640_v18, %v2567_v22  ;;  %v3318_v32 = vor.u32 %v3830_v26, %v3317_v25  ;;  %v3744_v4 = vld [vmem:[%s5946_s1 + $0x36c] sm:$0xf]  ;;  %v2983_v7 = vld [vmem:[%s5946_s1 + $0x378] sm:$0xf0] }
  0xce   :  { %v1832_v63 = vadd.f32 %v1831_v52, %v1813_v34  ;;  %v1795_v2 = vpop.f32.mrf.mxu0  ;;  %v2903_v34 = vld [vmem:[%s5946_s1 + $0x2d8] sm:$0xf0]  ;;  %v3692_v52 = vld [vmem:[%s5946_s1 + $0x1cc] sm:$0xf]  ;;  %v2986_v22 = vor.u32 %v3744_v4, %v2983_v7 }
  0xcf   :  { %2222 = vmatpush.bf16.msra.mxu3 %v2650_v46  ;;  %v3862_v46 = vld [vmem:[%s5946_s1 + $0x714] sm:$0xf0]  ;;  %v1850_v55 = vpop.f32.mrf.mxu3  ;;  %v1796_v10 = vadd.f32 %v1795_v2, %v5245_v62  ;;  %2169 = vmatpush.bf16.msra.mxu0 %v3350_v45  ;;  %v3015_v62 = vld [vmem:[%s5946_s1 + $0x3b8] sm:$0xf0]  ;;  %v3792_v45 = vld [vmem:[%s5946_s1 + $0x4ec] sm:$0xf] }
  0xd0   :  { %2208 = vmatpush.bf16.msra.mxu2 %v3590_v59  ;;  %v3333_v59 = vld [vmem:[%s5946_s1 + $0x628] sm:$0xf]  ;;  %v3446_v11 = vor.u32 %v3862_v46, %v3445_v41  ;;  %v5406_v12 = vadd.f32 %v1850_v55, %v1832_v63  ;;  %v3175_v46 = vld [vmem:[%s5946_s1 + $0x4f8] sm:$0xf0]  ;;  %v2906_v55 = vor.u32 %v3724_v33, %v2903_v34  ;;  %v3732_v7 = vld [vmem:[%s5946_s1 + $0x30c] sm:$0xf] }
  0xd1   :  { %2189 = vmatpush.bf16.msra.mxu1 %v3462_v40  ;;  %v3334_v16 = vor.u32 %v3834_v60, %v3333_v59  ;;  %v2554_v59 = vor.u32 %v3636_v29, %v2551_v37  ;;  %v2775_v60 = vld [vmem:[%s5946_s1 + $0x1d8] sm:$0xf0] }
  0xd2   :  { %v2967_v29 = vld [vmem:[%s5946_s1 + $0x358] sm:$0xf0] }
  0xd3   :  { %2223 = vmatpush.bf16.msra.mxu3 %v2634_v3  ;;  %v1814_v3 = vpop.f32.mrf.mxu1  ;;  %2170 = vmatpush.bf16.msra.mxu0 %v3334_v16  ;;  %v3688_v16 = vld [vmem:[%s5946_s1 + $0x1ac] sm:$0xf]  ;;  %v3143_v33 = vld [vmem:[%s5946_s1 + $0x4b8] sm:$0xf0] }
  0xd4   :  { %2209 = vmatpush.bf16.msra.mxu2 %v3574_v28  ;;  %v1815_v20 = vadd.f32 %v1814_v3, %v1796_v10  ;;  %v3018_v28 = vor.u32 %v3752_v19, %v3015_v62  ;;  %v3178_v3 = vor.u32 %v3792_v45, %v3175_v46  ;;  %v3788_v10 = vld [vmem:[%s5946_s1 + $0x4cc] sm:$0xf]  ;;  %v2759_v19 = vld [vmem:[%s5946_s1 + $0x1b8] sm:$0xf0] }
  0xd5   :  { %2190 = vmatpush.bf16.msra.mxu1 %v3446_v11  ;;  %v1833_v35 = vpop.f32.mrf.mxu2  ;;  %v3159_v11 = vld [vmem:[%s5946_s1 + $0x4d8] sm:$0xf0]  ;;  %v3716_v62 = vld [vmem:[%s5946_s1 + $0x28c] sm:$0xf] }
  0xd6   :  { %v1834_v40 = vadd.f32 %v1833_v35, %v1815_v20  ;;  %v1798_v41 = vpop.f32.mrf.mxu0  ;;  %v2871_v20 = vld [vmem:[%s5946_s1 + $0x298] sm:$0xf0]  ;;  %v2762_v35 = vor.u32 %v3688_v16, %v2759_v19  ;;  %v3736_v46 = vld [vmem:[%s5946_s1 + $0x32c] sm:$0xf] }
  0xd7   :  { %2224 = vmatpush.bf16.msra.mxu3 %v2618_v30  ;;  %v3696_v30 = vld [vmem:[%s5946_s1 + $0x1ec] sm:$0xf]  ;;  %v1852_v36 = vpop.f32.mrf.mxu3  ;;  %v1799_v47 = vadd.f32 %v1798_v41, %v5306_v43  ;;  %2171 = vmatpush.bf16.msra.mxu0 %v3318_v32  ;;  %v2887_v43 = vld [vmem:[%s5946_s1 + $0x2b8] sm:$0xf0]  ;;  %v2874_v37 = vor.u32 %v3716_v62, %v2871_v20 }
  0xd8   :  { %2278 = vmatpush.bf16.msrb.mxu2 %v3050_v38  ;;  %v3748_v38 = vld [vmem:[%s5946_s1 + $0x38c] sm:$0xf]  ;;  %v2794_v49 = vor.u32 %v3696_v30, %v2791_v24  ;;  %v5460_v58 = vadd.f32 %v1852_v36, %v1834_v40  ;;  %2120 = vmatmul.bf16.gmra.mxu1 %v4322_v56  ;;  %v2839_v4 = vld [vmem:[%s5946_s1 + $0x258] sm:$0xf0] }
  0xd9   :  { %2259 = vmatpush.bf16.msrb.mxu1 %v2922_v27  ;;  %v3002_v63 = vor.u32 %v3748_v38, %v2999_v39  ;;  %2101 = vmatmul.bf16.gmra.mxu0 %v4314_v51  ;;  %v3162_v27 = vor.u32 %v3788_v10, %v3159_v11  ;;  %v3784_v24 = vld [vmem:[%s5946_s1 + $0x4ac] sm:$0xf]  ;;  %v2743_v39 = vld [vmem:[%s5946_s1 + $0x198] sm:$0xf0] }
  0xda   :  { %2139 = vmatmul.bf16.gmra.mxu2 %v4589_v8  ;;  %v3684_v36 = vld [vmem:[%s5946_s1 + $0x18c] sm:$0xf]  ;;  %v3146_v45 = vor.u32 %v3784_v24, %v3143_v33  ;;  %v2935_v10 = vld [vmem:[%s5946_s1 + $0x318] sm:$0xf0] }
  0xdb   :  { %2225 = vmatpush.bf16.msra.mxu3 %v2602_v42  ;;  %v1817_v42 = vpop.f32.mrf.mxu1  ;;  %2240 = vmatpush.bf16.msrb.mxu0 %v2794_v49  ;;  %v3712_v40 = vld [vmem:[%s5946_s1 + $0x26c] sm:$0xf]  ;;  %v2746_v49 = vor.u32 %v3684_v36, %v2743_v39  ;;  %v3095_v36 = vld [vmem:[%s5946_s1 + $0x458] sm:$0xf0] }
  0xdc   :  { %2279 = vmatpush.bf16.msrb.mxu2 %v3034_v61  ;;  %v3720_v61 = vld [vmem:[%s5946_s1 + $0x2ac] sm:$0xf]  ;;  %v1818_v2 = vadd.f32 %v1817_v42, %v1799_v47  ;;  %2158 = vmatmul.bf16.gmra.mxu3 %v4591_v9  ;;  %v2951_v47 = vld [vmem:[%s5946_s1 + $0x338] sm:$0xf0] }
  0xdd   :  { %2260 = vmatpush.bf16.msrb.mxu1 %v2906_v55  ;;  %v2890_v18 = vor.u32 %v3720_v61, %v2887_v43  ;;  %v1836_v25 = vpop.f32.mrf.mxu2  ;;  %v3127_v55 = vld [vmem:[%s5946_s1 + $0x498] sm:$0xf0]  ;;  %v3708_v43 = vld [vmem:[%s5946_s1 + $0x24c] sm:$0xf] }
  0xde   :  { %v1837_v30 = vadd.f32 %v1836_v25, %v1818_v2  ;;  %v2727_v61 = vld [vmem:[%s5946_s1 + $0x178] sm:$0xf0]  ;;  %v3776_v20 = vld [vmem:[%s5946_s1 + $0x46c] sm:$0xf] }
  0xdf   :  { %2226 = vmatpush.bf16.msra.mxu3 %v2586_v15  ;;  %v2778_v15 = vor.u32 %v3692_v52, %v2775_v60  ;;  %v1855_v26 = vpop.f32.mrf.mxu3  ;;  %v3780_v52 = vld [vmem:[%s5946_s1 + $0x48c] sm:$0xf] }
  0xe0   :  { %2280 = vmatpush.bf16.msrb.mxu2 %v3018_v28  ;;  %v3740_v28 = vld [vmem:[%s5946_s1 + $0x34c] sm:$0xf]  ;;  %v5515_v38 = vadd.f32 %v1855_v26, %v1837_v30  ;;  %v3130_v19 = vor.u32 %v3780_v52, %v3127_v55  ;;  %v3559_v30 = vld [vmem:[%s5946_s1 + $0x7f8] sm:$0xf0] }
  0xe1   :  { %2241 = vmatpush.bf16.msrb.mxu0 %v2778_v15  ;;  %2261 = vmatpush.bf16.msrb.mxu1 %v2890_v18  ;;  %v2970_v41 = vor.u32 %v3740_v28, %v2967_v29  ;;  %v3680_v60 = vld [vmem:[%s5946_s1 + $0x16c] sm:$0xf]  ;;  %v2938_v28 = vor.u32 %v3732_v7, %v2935_v10  ;;  %v3527_v10 = vld [vmem:[%s5946_s1 + $0x7b8] sm:$0xf0] }
  0xe2   :  { %v2730_v62 = vor.u32 %v3680_v60, %v2727_v61  ;;  %v3676_v25 = vld [vmem:[%s5946_s1 + $0x14c] sm:$0xf] }
  0xe3   :  { %2227 = vmatpush.bf16.msra.mxu3 %v2570_v31  ;;  %v1800_v31 = vpop.f32.mrf.mxu0  ;;  %v1819_v32 = vpop.f32.mrf.mxu1  ;;  %v3888_v29 = vld [vmem:[%s5946_s1 + $0x7ec] sm:$0xf] }
  0xe4   :  { %2281 = vmatpush.bf16.msrb.mxu2 %v3002_v63  ;;  %v1801_v34 = vadd.f32 %v1800_v31, %v5344_v23  ;;  %v2855_v23 = vld [vmem:[%s5946_s1 + $0x278] sm:$0xf0]  ;;  %v2954_v63 = vor.u32 %v3736_v46, %v2951_v47  ;;  %v3704_v31 = vld [vmem:[%s5946_s1 + $0x22c] sm:$0xf]  ;;  %v3562_v24 = vor.u32 %v3888_v29, %v3559_v30 }
  0xe5   :  { %2242 = vmatpush.bf16.msrb.mxu0 %v2762_v35  ;;  %2262 = vmatpush.bf16.msrb.mxu1 %v2874_v37  ;;  %v1838_v2 = vpop.f32.mrf.mxu2  ;;  %v3772_v35 = vld [vmem:[%s5946_s1 + $0x44c] sm:$0xf]  ;;  %v2807_v46 = vld [vmem:[%s5946_s1 + $0x218] sm:$0xf0] }
  0xe6   :  { %v1820_v42 = vadd.f32 %v1819_v32, %v1801_v34  ;;  %v2823_v32 = vld [vmem:[%s5946_s1 + $0x238] sm:$0xf0]  ;;  %v3672_v37 = vld [vmem:[%s5946_s1 + $0x12c] sm:$0xf]  ;;  %v3098_v61 = vor.u32 %v3772_v35, %v3095_v36 }
  0xe7   :  { %2228 = vmatpush.bf16.msra.mxu3 %v2554_v59  ;;  %v2858_v59 = vor.u32 %v3712_v40, %v2855_v23  ;;  %v2826_v39 = vor.u32 %v3704_v31, %v2823_v32  ;;  %v3884_v40 = vld [vmem:[%s5946_s1 + $0x7cc] sm:$0xf]  ;;  %v3543_v23 = vld [vmem:[%s5946_s1 + $0x7d8] sm:$0xf0] }
  0xe8   :  { %2282 = vmatpush.bf16.msrb.mxu2 %v2986_v22  ;;  %v1839_v11 = vadd.f32 %v1838_v2, %v1820_v42  ;;  %v3111_v22 = vld [vmem:[%s5946_s1 + $0x478] sm:$0xf0]  ;;  %2191 = vmatmul.bf16.vlgmr.msra.gmra.mxu1 %v4472_v6  ;;  %v3546_v47 = vor.u32 %v3884_v40, %v3543_v23  ;;  %v3856_v55 = vld [vmem:[%s5946_s1 + $0x6ec] sm:$0xf] }
  0xe9   :  { %2243 = vmatpush.bf16.msrb.mxu0 %v2746_v49  ;;  %2263 = vmatpush.bf16.msrb.mxu1 %v2858_v59  ;;  %v3114_v33 = vor.u32 %v3776_v20, %v3111_v22  ;;  %v3431_v59 = vld [vmem:[%s5946_s1 + $0x6f8] sm:$0xf0]  ;;  %v3880_v7 = vld [vmem:[%s5946_s1 + $0x7ac] sm:$0xf] }
  0xea   :  { %2172 = vmatmul.bf16.vlgmr.msra.gmra.mxu0 %v4470_v5  ;;  %3631 = vmatmul.msk.bf16.vlgmr.msra.gmra.mxu2 %vm1701_vm0, %v4709_v17  ;;  %v3079_v2 = vld [vmem:[%s5946_s1 + $0x438] sm:$0xf0]  ;;  %v3852_v29 = vld [vmem:[%s5946_s1 + $0x6cc] sm:$0xf] }
  0xeb   :  { %2297 = vmatpush.bf16.msrb.mxu3 %v3178_v3  ;;  %v1857_v3 = vpop.f32.mrf.mxu3  ;;  %v1869_v15 = vpop.f32.mrf.mxu0  ;;  %v3415_v30 = vld [vmem:[%s5946_s1 + $0x6d8] sm:$0xf0] }
  0xec   :  { %2283 = vmatpush.bf16.msrb.mxu2 %v2970_v41  ;;  %v5556_v16 = vpop.f32.mrf.mxu1  ;;  %v5559_v18 = vadd.f32 %v1869_v15, %v5406_v12  ;;  %v5570_v26 = vadd.f32 %v1857_v3, %v1839_v11  ;;  %v2711_v12 = vld [vmem:[%s5946_s1 + $0x158] sm:$0xf0]  ;;  %2229 = vmatmul.bf16.vlgmr.msra.gmra.mxu3 %v4169_v48  ;;  %v3668_v3 = vld [vmem:[%s5946_s1 + $0x10c] sm:$0xf]  ;;  %v3418_v23 = vor.u32 %v3852_v29, %v3415_v30 }
  0xed   :  { %2244 = vmatpush.bf16.msrb.mxu0 %v2730_v62  ;;  %v2714_v34 = vor.u32 %v3676_v25, %v2711_v12  ;;  %v2695_v48 = vld [vmem:[%s5946_s1 + $0x138] sm:$0xf0]  ;;  %v5610_v41 = vpop.f32.mrf.mxu2  ;;  %v3824_v11 = vld [vmem:[%s5946_s1 + $0x5ec] sm:$0xf]  ;;  %v3530_v62 = vor.u32 %v3880_v7, %v3527_v10 }
  0xee   :  { %v3303_v15 = vld [vmem:[%s5946_s1 + $0x5f8] sm:$0xf0]  ;;  %v3764_v25 = vld [vmem:[%s5946_s1 + $0x40c] sm:$0xf] }
  0xef   :  { %2298 = vmatpush.bf16.msrb.mxu3 %v3162_v27  ;;  %v2842_v27 = vor.u32 %v3708_v43, %v2839_v4  ;;  %v2698_v43 = vor.u32 %v3672_v37, %v2695_v48  ;;  %v3063_v12 = vld [vmem:[%s5946_s1 + $0x418] sm:$0xf0]  ;;  %v3876_v37 = vld [vmem:[%s5946_s1 + $0x78c] sm:$0xf] }
  0xf0   :  { %2284 = vmatpush.bf16.msrb.mxu2 %v2954_v63  ;;  %v3768_v63 = vld [vmem:[%s5946_s1 + $0x42c] sm:$0xf]  ;;  %v3511_v48 = vld [vmem:[%s5946_s1 + $0x798] sm:$0xf0]  ;;  %v3066_v40 = vor.u32 %v3764_v25, %v3063_v12 }
  0xf1   :  { %2264 = vmatpush.bf16.msrb.mxu1 %v2842_v27  ;;  %2245 = vmatpush.bf16.msrb.mxu0 %v2714_v34  ;;  %v3082_v20 = vor.u32 %v3768_v63, %v3079_v2  ;;  %v3306_v27 = vor.u32 %v3824_v11, %v3303_v15  ;;  %v3287_v34 = vld [vmem:[%s5946_s1 + $0x5d8] sm:$0xf0]  ;;  %v3872_v63 = vld [vmem:[%s5946_s1 + $0x76c] sm:$0xf] }
  0xf2   :  { %v3495_v2 = vld [vmem:[%s5946_s1 + $0x778] sm:$0xf0]  ;;  %v3812_v7 = vld [vmem:[%s5946_s1 + $0x58c] sm:$0xf] }
  0xf3   :  { %2299 = vmatpush.bf16.msrb.mxu3 %v3146_v45  ;;  %v5612_v42 = vpop.f32.mrf.mxu3  ;;  %v3700_v45 = vld [vmem:[%s5946_s1 + $0x20c] sm:$0xf]  ;;  %v1871_v49 = vpop.f32.mrf.mxu0  ;;  %v3383_v10 = vld [vmem:[%s5946_s1 + $0x698] sm:$0xf0] }
  0xf4   :  { %2285 = vmatpush.bf16.msrb.mxu2 %v2938_v28  ;;  %v5620_v52 = vpop.f32.mrf.mxu1  ;;  %v5629_v60 = vadd.f32 %v1871_v49, %v5460_v58  ;;  %v2679_v58 = vld [vmem:[%s5946_s1 + $0x118] sm:$0xf0]  ;;  %v2810_v4 = vor.u32 %v3700_v45, %v2807_v46  ;;  %v3820_v28 = vld [vmem:[%s5946_s1 + $0x5cc] sm:$0xf] }
  0xf5   :  { %2265 = vmatpush.bf16.msrb.mxu1 %v2826_v39  ;;  %2246 = vmatpush.bf16.msrb.mxu0 %v2698_v43  ;;  %v2682_v22 = vor.u32 %v3668_v3, %v2679_v58  ;;  %v5670_v31 = vpop.f32.mrf.mxu2  ;;  %v3290_v46 = vor.u32 %v3820_v28, %v3287_v34  ;;  %v3848_v49 = vld [vmem:[%s5946_s1 + $0x6ac] sm:$0xf]  ;;  %v3514_v43 = vor.u32 %v3876_v37, %v3511_v48  ;;  %v3479_v28 = vld [vmem:[%s5946_s1 + $0x758] sm:$0xf0] }
  0xf6   :  { %v3367_v34 = vld [vmem:[%s5946_s1 + $0x678] sm:$0xf0] }
  0xf7   :  { %2300 = vmatpush.bf16.msrb.mxu3 %v3130_v19  ;;  %v3434_v19 = vor.u32 %v3856_v55, %v3431_v59  ;;  %v3271_v55 = vld [vmem:[%s5946_s1 + $0x5b8] sm:$0xf0]  ;;  %v3900_v59 = vld [vmem:[%s5946_s1 + $0x84c] sm:$0xf] }
  0xf8   :  { %2354 = vmatpush.bf16.msra.mxu2 %v3562_v24  ;;  %v3904_v24 = vld [vmem:[%s5946_s1 + $0x86c] sm:$0xf]  ;;  %2196 = vmatmul.bf16.gmra.mxu1 %v4604_v14  ;;  %v3239_v37 = vld [vmem:[%s5946_s1 + $0x578] sm:$0xf0] }
  0xf9   :  { %2266 = vmatpush.bf16.msrb.mxu1 %v2810_v4  ;;  %2247 = vmatpush.bf16.msrb.mxu0 %v2682_v22  ;;  %v3591_v22 = vld [vmem:[%s5946_s1 + $0x838] sm:$0xf0] }
  0xfa   :  { %2177 = vmatmul.bf16.gmra.mxu0 %v4602_v13  ;;  %3632 = vmatmul.msk.bf16.gmra.mxu2 %vm1701_vm0, %v4818_v21 }
  0xfb   :  { %2301 = vmatpush.bf16.msrb.mxu3 %v3114_v33  ;;  %v5672_v32 = vpop.f32.mrf.mxu3  ;;  %v3623_v33 = vld [vmem:[%s5946_s1 + $0x878] sm:$0xf0]  ;;  %v1874_v35 = vpop.f32.mrf.mxu0 }
  0xfc   :  { %2355 = vmatpush.bf16.msra.mxu2 %v3546_v47  ;;  %v5683_v36 = vpop.f32.mrf.mxu1  ;;  %v5692_v39 = vadd.f32 %v1874_v35, %v5515_v38  ;;  %v3626_v45 = vor.u32 %v3904_v24, %v3623_v33  ;;  %v3816_v47 = vld [vmem:[%s5946_s1 + $0x5ac] sm:$0xf]  ;;  %v3399_v38 = vld [vmem:[%s5946_s1 + $0x6b8] sm:$0xf0]  ;;  %2234 = vmatmul.bf16.gmra.mxu3 %v4301_v44 }
  0xfd   :  { %2335 = vmatpush.bf16.msra.mxu1 %v3434_v19  ;;  %2316 = vmatpush.bf16.msra.mxu0 %v3306_v27  ;;  %v3402_v3 = vor.u32 %v3848_v49, %v3399_v38  ;;  %v3274_v58 = vor.u32 %v3816_v47, %v3271_v55  ;;  %v3844_v44 = vld [vmem:[%s5946_s1 + $0x68c] sm:$0xf]  ;;  %v5732_v11 = vpop.f32.mrf.mxu2  ;;  %v3255_v19 = vld [vmem:[%s5946_s1 + $0x598] sm:$0xf0] }
  0xfe   :  { %v3868_v27 = vld [vmem:[%s5946_s1 + $0x74c] sm:$0xf]  ;;  %v3386_v30 = vor.u32 %v3844_v44, %v3383_v10  ;;  %v3258_v24 = vor.u32 %v3812_v7, %v3255_v19  ;;  %v3351_v49 = vld [vmem:[%s5946_s1 + $0x658] sm:$0xf0] }
  0xff   :  { %2302 = vmatpush.bf16.msrb.mxu3 %v3098_v61  ;;  %v3607_v61 = vld [vmem:[%s5946_s1 + $0x858] sm:$0xf0]  ;;  %v3840_v33 = vld [vmem:[%s5946_s1 + $0x66c] sm:$0xf]  ;;  %v3482_v48 = vor.u32 %v3868_v27, %v3479_v28 }
 0x100   :  { %2356 = vmatpush.bf16.msra.mxu2 %v3530_v62  ;;  %v3610_v4 = vor.u32 %v3900_v59, %v3607_v61  ;;  %v3498_v62 = vor.u32 %v3872_v63, %v3495_v2  ;;  %v3864_v38 = vld [vmem:[%s5946_s1 + $0x72c] sm:$0xf]  ;;  %v3463_v55 = vld [vmem:[%s5946_s1 + $0x738] sm:$0xf0] }
 0x101   :  { %2336 = vmatpush.bf16.msra.mxu1 %v3418_v23  ;;  %2317 = vmatpush.bf16.msra.mxu0 %v3290_v46  ;;  %v3575_v23 = vld [vmem:[%s5946_s1 + $0x818] sm:$0xf0]  ;;  %v3836_v46 = vld [vmem:[%s5946_s1 + $0x64c] sm:$0xf]  ;;  %v3466_v7 = vor.u32 %v3864_v38, %v3463_v55  ;;  %v1910_v38 = vadd.f32 %v5670_v31, %v5620_v52 }
 0x102   :  { %v3804_v63 = vld [vmem:[%s5946_s1 + $0x54c] sm:$0xf]  ;;  %v3223_v2 = vld [vmem:[%s5946_s1 + $0x558] sm:$0xf0] }
 0x103   :  { %2303 = vmatpush.bf16.msrb.mxu3 %v3082_v20  ;;  %v5734_v15 = vpop.f32.mrf.mxu3  ;;  %v3896_v20 = vld [vmem:[%s5946_s1 + $0x82c] sm:$0xf]  ;;  %v1876_v25 = vpop.f32.mrf.mxu0  ;;  %v3226_v10 = vor.u32 %v3804_v63, %v3223_v2  ;;  %v3335_v19 = vld [vmem:[%s5946_s1 + $0x638] sm:$0xf0]  ;;  %v1929_v2 = vadd.f32 %v5672_v32, %v1910_v38 }
 0x104   :  { %2357 = vmatpush.bf16.msra.mxu2 %v3514_v43  ;;  %v5745_v12 = vpop.f32.mrf.mxu1  ;;  %v5754_v29 = vadd.f32 %v1876_v25, %v5570_v26  ;;  %v3594_v35 = vor.u32 %v3896_v20, %v3591_v22  ;;  %v3808_v26 = vld [vmem:[%s5946_s1 + $0x56c] sm:$0xf]  ;;  %v3447_v20 = vld [vmem:[%s5946_s1 + $0x718] sm:$0xf0] }
 0x105   :  { %2337 = vmatpush.bf16.msra.mxu1 %v3402_v3  ;;  %2318 = vmatpush.bf16.msra.mxu0 %v3274_v58  ;;  %v3242_v47 = vor.u32 %v3808_v26, %v3239_v37  ;;  %v5786_v61 = vpop.f32.mrf.mxu2  ;;  %v3832_v44 = vld [vmem:[%s5946_s1 + $0x62c] sm:$0xf]  ;;  %v3207_v25 = vld [vmem:[%s5946_s1 + $0x538] sm:$0xf0] }
 0x106   :  { %v3800_v22 = vld [vmem:[%s5946_s1 + $0x52c] sm:$0xf]  ;;  %v3338_v27 = vor.u32 %v3832_v44, %v3335_v19 }
 0x107   :  { %2304 = vmatpush.bf16.msrb.mxu3 %v3066_v40  ;;  %v3892_v40 = vld [vmem:[%s5946_s1 + $0x80c] sm:$0xf] }
 0x108   :  { %2358 = vmatpush.bf16.msra.mxu2 %v3498_v62  ;;  %v3578_v59 = vor.u32 %v3892_v40, %v3575_v23  ;;  %v3860_v62 = vld [vmem:[%s5946_s1 + $0x70c] sm:$0xf]  ;;  %2267 = vmatmul.bf16.vlgmr.msrb.gmra.mxu1 %v4182_v54 }
 0x109   :  { %2338 = vmatpush.bf16.msra.mxu1 %v3386_v30  ;;  %2319 = vmatpush.bf16.msra.mxu0 %v3258_v24  ;;  %v3450_v28 = vor.u32 %v3860_v62, %v3447_v20  ;;  %v3828_v54 = vld [vmem:[%s5946_s1 + $0x60c] sm:$0xf]  ;;  %v3319_v30 = vld [vmem:[%s5946_s1 + $0x618] sm:$0xf0] }
 0x10a   :  { %2248 = vmatmul.bf16.vlgmr.msrb.gmra.mxu0 %v4180_v53  ;;  %2286 = vmatmul.bf16.vlgmr.msrb.gmra.mxu2 %v4190_v57  ;;  %v3210_v53 = vor.u32 %v3800_v22, %v3207_v25  ;;  %v3796_v57 = vld [vmem:[%s5946_s1 + $0x50c] sm:$0xf]  ;;  %v3322_v26 = vor.u32 %v3828_v54, %v3319_v30 }
 0x10b   :  { %2377 = vmatpush.bf16.msra.mxu3 %v3626_v45  ;;  %v3370_v45 = vor.u32 %v3840_v33, %v3367_v34  ;;  %v5788_v43 = vpop.f32.mrf.mxu3  ;;  %v1945_v3 = vpop.f32.mrf.mxu0 }
 0x10c   :  { %2359 = vmatpush.bf16.msra.mxu2 %v3482_v48  ;;  %v1964_v58 = vpop.f32.mrf.mxu1  ;;  %2305 = vmatmul.bf16.vlgmr.msrb.gmra.mxu3 %v4457_v0  ;;  %v3191_v0 = vld [vmem:[%s5946_s1 + $0x518] sm:$0xf0]  ;;  %v1908_v48 = vadd.f32 %v5610_v41, %v5556_v16 }
 0x10d   :  { %2339 = vmatpush.bf16.msra.mxu1 %v3370_v45  ;;  %2320 = vmatpush.bf16.msra.mxu0 %v3242_v47  ;;  %v1983_v24 = vpop.f32.mrf.mxu2  ;;  %v3194_v37 = vor.u32 %v3796_v57, %v3191_v0 }
 0x10e   :  { %v1927_v47 = vadd.f32 %v5612_v42, %v1908_v48 }
 0x10f   :  { %2378 = vmatpush.bf16.msra.mxu3 %v3610_v4  ;;  %v3354_v4 = vor.u32 %v3836_v46, %v3351_v49 }
 0x110   :  { %2360 = vmatpush.bf16.msra.mxu2 %v3466_v7  ;;  %v1946_v49 = vadd.f32 %v1945_v3, %v1927_v47 }
 0x111   :  { %2340 = vmatpush.bf16.msra.mxu1 %v3354_v4  ;;  %2321 = vmatpush.bf16.msra.mxu0 %v3226_v10 }
 0x112   :  { %v1965_v63 = vadd.f32 %v1964_v58, %v1946_v49 }
 0x113   :  { %2379 = vmatpush.bf16.msra.mxu3 %v3594_v35  ;;  %v2002_v33 = vpop.f32.mrf.mxu3  ;;  %v1947_v34 = vpop.f32.mrf.mxu0 }
 0x114   :  { %v1966_v35 = vpop.f32.mrf.mxu1  ;;  %2361 = vmatpush.bf16.msra.mxu2 %v3450_v28  ;;  %v1984_v42 = vadd.f32 %v1983_v24, %v1965_v63  ;;  %v1948_v4 = vadd.f32 %v1947_v34, %v1929_v2 }
 0x115   :  { %2341 = vmatpush.bf16.msra.mxu1 %v3338_v27  ;;  %2322 = vmatpush.bf16.msra.mxu0 %v3210_v53  ;;  %v1985_v40 = vpop.f32.mrf.mxu2 }
 0x116   :  { %v1967_v44 = vadd.f32 %v1966_v35, %v1948_v4 }
 0x117   :  { %2380 = vmatpush.bf16.msra.mxu3 %v3578_v59 }
 0x118   :  { %2272 = vmatmul.bf16.gmra.mxu1 %v4314_v51  ;;  %v2003_v51 = vadd.f32 %v2002_v33, %v1984_v42  ;;  %v1986_v31 = vadd.f32 %v1985_v40, %v1967_v44 }
 0x119   :  { %2342 = vmatpush.bf16.msra.mxu1 %v3322_v26  ;;  %2323 = vmatpush.bf16.msra.mxu0 %v3194_v37 }
 0x11a   :  { %2253 = vmatmul.bf16.gmra.mxu0 %v4312_v50  ;;  %2291 = vmatmul.bf16.gmra.mxu2 %v4322_v56  ;;  %v1913_v50 = vadd.f32 %v5732_v11, %v5683_v36  ;;  %v1915_v11 = vadd.f32 %v5786_v61, %v5745_v12 }
 0x11b   :  { %v2004_v23 = vpop.f32.mrf.mxu3  ;;  %v1950_v45 = vpop.f32.mrf.mxu0 }
 0x11c   :  { %v1969_v46 = vpop.f32.mrf.mxu1  ;;  %2310 = vmatmul.bf16.gmra.mxu3 %v4589_v8  ;;  %v1932_v52 = vadd.f32 %v5734_v15, %v1913_v50  ;;  %v2005_v58 = vadd.f32 %v2004_v23, %v1986_v31 }
 0x11d   :  { %v1988_v55 = vpop.f32.mrf.mxu2 }
 0x11e   :  { %v1951_v32 = vadd.f32 %v1950_v45, %v1932_v52 }
 0x123   :  { %v2007_v16 = vpop.f32.mrf.mxu3  ;;  %v1952_v41 = vpop.f32.mrf.mxu0 }
 0x124   :  { %v1971_v59 = vpop.f32.mrf.mxu1 }
 0x125   :  { %v1990_v56 = vpop.f32.mrf.mxu2 }
 0x128   :  { %2343 = vmatmul.bf16.vlgmr.msra.gmra.mxu1 %v4470_v5 }
 0x12a   :  { %2324 = vmatmul.bf16.vlgmr.msra.gmra.mxu0 %v4459_v1  ;;  %2362 = vmatmul.bf16.vlgmr.msra.gmra.mxu2 %v4472_v6  ;;  %v1970_v6 = vadd.f32 %v1969_v46, %v1951_v32 }
 0x12b   :  { %v2009_v7 = vpop.f32.mrf.mxu3  ;;  %v2021_v8 = vpop.f32.mrf.mxu0 }
 0x12c   :  { %v2040_v3 = vpop.f32.mrf.mxu1  ;;  %v2022_v10 = vadd.f32 %v2021_v8, %v2003_v51  ;;  %3633 = vmatmul.msk.bf16.vlgmr.msra.gmra.mxu3 %vm1701_vm0, %v4709_v17  ;;  %v1934_v17 = vadd.f32 %v5788_v43, %v1915_v11  ;;  %v1989_v25 = vadd.f32 %v1988_v55, %v1970_v6 }
 0x12d   :  { %v2059_v15 = vpop.f32.mrf.mxu2 }
 0x12e   :  { %v2041_v19 = vadd.f32 %v2040_v3, %v2022_v10  ;;  %v1953_v28 = vadd.f32 %v1952_v41, %v1934_v17  ;;  %v2008_v30 = vadd.f32 %v2007_v16, %v1989_v25 }
 0x130   :  { %v2392_v36 = vpack.c.bf16 %v2041_v19, %v5559_v18  ;;  %v2464_v53 = vmul.f32 %v2041_v19, %v2041_v19  ;;  %v1972_v43 = vadd.f32 %v1971_v59, %v1953_v28 }
 0x132   :  { %2400 = vst [vmem:[%s5948_s2] sm:$0xff] %v2392_v36  ;;  %v1991_v37 = vadd.f32 %v1990_v56, %v1972_v43 }
 0x133   :  { %v2078_v1 = vpop.f32.mrf.mxu3  ;;  %v2023_v5 = vpop.f32.mrf.mxu0 }
 0x134   :  { %v2079_v62 = vadd.f32 %v2078_v1, %v2059_v15  ;;  %v2042_v20 = vpop.f32.mrf.mxu1  ;;  %v2024_v22 = vadd.f32 %v2023_v5, %v2005_v58  ;;  %v2010_v46 = vadd.f32 %v2009_v7, %v1991_v37 }
 0x135   :  { %v2061_v33 = vpop.f32.mrf.mxu2 }
 0x136   :  { %v2043_v27 = vadd.f32 %v2042_v20, %v2024_v22 }
 0x138   :  { %v2394_v12 = vpack.c.bf16 %v2043_v27, %v5629_v60  ;;  %v2417_v61 = vadd.f32 %v2043_v27, %v2041_v19  ;;  %v2468_v54 = vmul.f32 %v2043_v27, %v2043_v27  ;;  %2348 = vmatmul.bf16.gmra.mxu1 %v4602_v13 }
 0x13a   :  { %2402 = vst [vmem:[%s5948_s2 + $0x10] sm:$0xff] %v2394_v12  ;;  %v2488_v24 = vadd.f32 %v2468_v54, %v2464_v53  ;;  %2329 = vmatmul.bf16.gmra.mxu0 %v4591_v9  ;;  %2367 = vmatmul.bf16.gmra.mxu2 %v4604_v14 }
 0x13b   :  { %v2080_v57 = vpop.f32.mrf.mxu3  ;;  %v2026_v34 = vpop.f32.mrf.mxu0 }
 0x13c   :  { %v2081_v0 = vadd.f32 %v2080_v57, %v2061_v33  ;;  %v2045_v35 = vpop.f32.mrf.mxu1  ;;  %v2027_v26 = vadd.f32 %v2026_v34, %v2008_v30  ;;  %3634 = vmatmul.msk.bf16.gmra.mxu3 %vm1701_vm0, %v4818_v21 }
 0x13d   :  { %v2064_v49 = vpop.f32.mrf.mxu2 }
 0x13e   :  { %v2046_v48 = vadd.f32 %v2045_v35, %v2027_v26 }
 0x140   :  { %v2396_v40 = vpack.c.bf16 %v2046_v48, %v5692_v39  ;;  %v2418_v23 = vadd.f32 %v2417_v61, %v2046_v48  ;;  %v2472_v45 = vmul.f32 %v2046_v48, %v2046_v48 }
 0x142   :  { %2404 = vst [vmem:[%s5948_s2 + $0x20] sm:$0xff] %v2396_v40  ;;  %v2489_v47 = vadd.f32 %v2488_v24, %v2472_v45 }
 0x143   :  { %v2083_v38 = vpop.f32.mrf.mxu3  ;;  %v2028_v55 = vpop.f32.mrf.mxu0 }
 0x144   :  { %v2084_v9 = vadd.f32 %v2083_v38, %v2064_v49  ;;  %v2047_v13 = vpop.f32.mrf.mxu1  ;;  %v2029_v16 = vadd.f32 %v2028_v55, %v2010_v46 }
 0x145   :  { %v2066_v2 = vpop.f32.mrf.mxu2 }
 0x146   :  { %v2048_v14 = vadd.f32 %v2047_v13, %v2029_v16 }
 0x148   :  { %v2398_v41 = vpack.c.bf16 %v2048_v14, %v5754_v29  ;;  %v5869_v21 = vadd.f32 %v2418_v23, %v2048_v14  ;;  %v2476_v59 = vmul.f32 %v2048_v14, %v2048_v14 }
 0x14a   :  { %2406 = vst [vmem:[%s5948_s2 + $0x30] sm:$0xff] %v2398_v41  ;;  %v5874_v63 = vadd.f32 %v2489_v47, %v2476_v59 }
 0x14b   :  { %v2085_v42 = vpop.f32.mrf.mxu3  ;;  %v2097_v50 = vpop.f32.mrf.mxu0 }
 0x14c   :  { %v2086_v4 = vadd.f32 %v2085_v42, %v2066_v2  ;;  %v2116_v51 = vpop.f32.mrf.mxu1  ;;  %v2098_v56 = vadd.f32 %v2097_v50, %v2079_v62 }
 0x14d   :  { %v2135_v8 = vpop.f32.mrf.mxu2 }
 0x14e   :  { %v2117_v7 = vadd.f32 %v2116_v51, %v2098_v56 }
 0x150   :  { %v2136_v44 = vadd.f32 %v2135_v8, %v2117_v7 }
 0x153   :  { %v2154_v3 = vpop.f32.mrf.mxu3  ;;  %v2099_v10 = vpop.f32.mrf.mxu0 }
 0x154   :  { %v2118_v52 = vpop.f32.mrf.mxu1  ;;  %v2100_v31 = vadd.f32 %v2099_v10, %v2081_v0  ;;  %v2155_v19 = vadd.f32 %v2154_v3, %v2136_v44 }
 0x155   :  { %v2137_v36 = vpop.f32.mrf.mxu2 }
 0x156   :  { %v2119_v32 = vadd.f32 %v2118_v52, %v2100_v31 }
 0x158   :  { %v2138_v58 = vadd.f32 %v2137_v36, %v2119_v32 }
 0x15b   :  { %v2156_v11 = vpop.f32.mrf.mxu3  ;;  %v2102_v15 = vpop.f32.mrf.mxu0 }
 0x15c   :  { %v2121_v1 = vpop.f32.mrf.mxu1  ;;  %v2103_v5 = vadd.f32 %v2102_v15, %v2084_v9  ;;  %v2157_v20 = vadd.f32 %v2156_v11, %v2138_v58 }
 0x15d   :  { %v2140_v22 = vpop.f32.mrf.mxu2 }
 0x15e   :  { %v2122_v6 = vadd.f32 %v2121_v1, %v2103_v5 }
 0x160   :  { %v2141_v62 = vadd.f32 %v2140_v22, %v2122_v6 }
 0x163   :  { %v2159_v17 = vpop.f32.mrf.mxu3  ;;  %v2104_v25 = vpop.f32.mrf.mxu0 }
 0x164   :  { %v2123_v27 = vpop.f32.mrf.mxu1  ;;  %v2105_v28 = vadd.f32 %v2104_v25, %v2086_v4  ;;  %v2160_v53 = vadd.f32 %v2159_v17, %v2141_v62 }
 0x165   :  { %v2142_v61 = vpop.f32.mrf.mxu2 }
 0x166   :  { %v2124_v12 = vadd.f32 %v2123_v27, %v2105_v28 }
 0x168   :  { %v2143_v30 = vadd.f32 %v2142_v61, %v2124_v12 }
 0x16b   :  { %v2161_v54 = vpop.f32.mrf.mxu3  ;;  %v2173_v24 = vpop.f32.mrf.mxu0 }
 0x16c   :  { %v2192_v33 = vpop.f32.mrf.mxu1  ;;  %v2174_v57 = vadd.f32 %v2173_v24, %v2155_v19  ;;  %v2162_v0 = vadd.f32 %v2161_v54, %v2143_v30 }
 0x16d   :  { %v2211_v35 = vpop.f32.mrf.mxu2 }
 0x16e   :  { %v2193_v34 = vadd.f32 %v2192_v33, %v2174_v57 }
 0x170   :  { %v5876_v26 = vadd.f32 %v2211_v35, %v2193_v34 }
 0x172   :  { %v2465_v55 = vmul.f32 %v5876_v26, %v5876_v26 }
 0x173   :  { %v2230_v43 = vpop.f32.mrf.mxu3  ;;  %v2175_v37 = vpop.f32.mrf.mxu0 }
 0x174   :  { %v2194_v48 = vpop.f32.mrf.mxu1  ;;  %v2176_v40 = vadd.f32 %v2175_v37, %v2157_v20 }
 0x175   :  { %v2213_v45 = vpop.f32.mrf.mxu2 }
 0x176   :  { %v2195_v23 = vadd.f32 %v2194_v48, %v2176_v40 }
 0x178   :  { %v5878_v47 = vadd.f32 %v2213_v45, %v2195_v23 }
 0x17a   :  { %v2426_v13 = vadd.f32 %v5878_v47, %v5876_v26  ;;  %v2469_v16 = vmul.f32 %v5878_v47, %v5878_v47 }
 0x17b   :  { %v2232_v46 = vpop.f32.mrf.mxu3  ;;  %v2178_v49 = vpop.f32.mrf.mxu0 }
 0x17c   :  { %v2197_v38 = vpop.f32.mrf.mxu1  ;;  %v2179_v9 = vadd.f32 %v2178_v49, %v2160_v53  ;;  %v2497_v41 = vadd.f32 %v2469_v16, %v2465_v55 }
 0x17d   :  { %v2216_v59 = vpop.f32.mrf.mxu2 }
 0x17e   :  { %v2198_v14 = vadd.f32 %v2197_v38, %v2179_v9 }
 0x180   :  { %v5886_v42 = vadd.f32 %v2216_v59, %v2198_v14 }
 0x182   :  { %v2427_v56 = vadd.f32 %v2426_v13, %v5886_v42  ;;  %v2473_v7 = vmul.f32 %v5886_v42, %v5886_v42 }
 0x183   :  { %v2235_v2 = vpop.f32.mrf.mxu3  ;;  %v2180_v4 = vpop.f32.mrf.mxu0 }
 0x184   :  { %v2199_v50 = vpop.f32.mrf.mxu1  ;;  %v2181_v51 = vadd.f32 %v2180_v4, %v2162_v0  ;;  %v2498_v3 = vadd.f32 %v2497_v41, %v2473_v7 }
 0x185   :  { %v2218_v44 = vpop.f32.mrf.mxu2 }
 0x186   :  { %v2200_v8 = vadd.f32 %v2199_v50, %v2181_v51 }
 0x188   :  { %v5891_v52 = vadd.f32 %v2218_v44, %v2200_v8  ;;  %v2467_v44 = vmul.f32 %v5629_v60, %v5629_v60 }
 0x18a   :  { %v5894_v32 = vadd.f32 %v2427_v56, %v5891_v52  ;;  %v2477_v36 = vmul.f32 %v5891_v52, %v5891_v52 }
 0x18b   :  { %v2237_v10 = vpop.f32.mrf.mxu3  ;;  %v2249_v31 = vpop.f32.mrf.mxu0 }
 0x18c   :  { %v2268_v19 = vpop.f32.mrf.mxu1  ;;  %v5898_v11 = vadd.f32 %v2498_v3, %v2477_v36  ;;  %v2250_v62 = vadd.f32 %v2249_v31, %v2230_v43  ;;  %v2408_v36 = vadd.f32 %v5629_v60, %v5559_v18 }
 0x18d   :  { %v2287_v58 = vpop.f32.mrf.mxu2 }
 0x18e   :  { %v2269_v12 = vadd.f32 %v2268_v19, %v2250_v62 }
 0x190   :  { %v2288_v61 = vadd.f32 %v2287_v58, %v2269_v12  ;;  %v2471_v58 = vmul.f32 %v5692_v39, %v5692_v39 }
 0x193   :  { %v2306_v15 = vpop.f32.mrf.mxu3  ;;  %v2251_v1 = vpop.f32.mrf.mxu0 }
 0x194   :  { %v2270_v5 = vpop.f32.mrf.mxu1  ;;  %v2252_v54 = vadd.f32 %v2251_v1, %v2232_v46  ;;  %v2307_v33 = vadd.f32 %v2306_v15, %v2288_v61 }
 0x195   :  { %v2289_v20 = vpop.f32.mrf.mxu2 }
 0x196   :  { %v2271_v34 = vadd.f32 %v2270_v5, %v2252_v54  ;;  %v2409_v5 = vadd.f32 %v2408_v36, %v5692_v39  ;;  %v2500_v54 = vrot.slane %v5898_v11, 4 }
 0x198   :  { %v2290_v37 = vadd.f32 %v2289_v20, %v2271_v34  ;;  %v2420_v20 = vrot.slane %v5869_v21, 4 }
 0x19a   :  { %v2421_v61 = vadd.f32 %v2420_v20, %v5869_v21  ;;  %v2501_v21 = vadd.f32 %v2500_v54, %v5898_v11 }
 0x19b   :  { %v2308_v6 = vpop.f32.mrf.mxu3  ;;  %v2254_v22 = vpop.f32.mrf.mxu0 }
 0x19c   :  { %v2273_v17 = vpop.f32.mrf.mxu1  ;;  %v2255_v48 = vadd.f32 %v2254_v22, %v2235_v2  ;;  %v2309_v43 = vadd.f32 %v2308_v6, %v2290_v37  ;;  %v2422_v37 = vrot.slane %v2421_v61, 2 }
 0x19d   :  { %v2292_v25 = vpop.f32.mrf.mxu2 }
 0x19e   :  { %v2274_v55 = vadd.f32 %v2273_v17, %v2255_v48 }
 0x1a0   :  { %v2293_v46 = vadd.f32 %v2292_v25, %v2274_v55  ;;  %v2410_v25 = vadd.f32 %v2409_v5, %v5754_v29 }
 0x1a3   :  { %v2311_v27 = vpop.f32.mrf.mxu3  ;;  %v2256_v28 = vpop.f32.mrf.mxu0 }
 0x1a4   :  { %v2275_v53 = vpop.f32.mrf.mxu1  ;;  %v2257_v41 = vadd.f32 %v2256_v28, %v2237_v10  ;;  %v2312_v50 = vadd.f32 %v2311_v27, %v2293_v46  ;;  %v2463_v10 = vmul.f32 %v5559_v18, %v5559_v18  ;;  %v2491_v27 = vrot.slane %v5874_v63, 4 }
 0x1a5   :  { %v2294_v30 = vpop.f32.mrf.mxu2  ;;  %v2429_v28 = vrot.slane %v5894_v32, 4  ;;  %v2423_v46 = vadd.f32 %v2422_v37, %v2421_v61 }
 0x1a6   :  { %v2276_v7 = vadd.f32 %v2275_v53, %v2257_v41  ;;  %v2479_v1 = vadd.f32 %v2467_v44, %v2463_v10 }
 0x1a8   :  { %v2295_v19 = vadd.f32 %v2294_v30, %v2276_v7  ;;  %v2480_v62 = vadd.f32 %v2479_v1, %v2471_v58 }
 0x1ab   :  { %v2313_v24 = vpop.f32.mrf.mxu3  ;;  %v2325_v57 = vpop.f32.mrf.mxu0 }
 0x1ac   :  { %v2344_v0 = vpop.f32.mrf.mxu1  ;;  %v2326_v35 = vadd.f32 %v2325_v57, %v2307_v33  ;;  %v2314_v17 = vadd.f32 %v2313_v24, %v2295_v19  ;;  %v2411_v33 = vrot.slane %v2410_v25, 4  ;;  %v2492_v24 = vadd.f32 %v2491_v27, %v5874_v63 }
 0x1ad   :  { %v2363_v23 = vpop.f32.mrf.mxu2 }
 0x1ae   :  { %v2345_v40 = vadd.f32 %v2344_v0, %v2326_v35  ;;  %v2430_v0 = vadd.f32 %v2429_v28, %v5894_v32  ;;  %v2493_v63 = vrot.slane %v2492_v24, 2 }
 0x1b0   :  { %v2364_v49 = vadd.f32 %v2363_v23, %v2345_v40 }
 0x1b3   :  { %v2382_v45 = vpop.f32.mrf.mxu3  ;;  %v2327_v38 = vpop.f32.mrf.mxu0 }
 0x1b4   :  { %v2346_v9 = vpop.f32.mrf.mxu1  ;;  %v2383_v13 = vadd.f32 %v2382_v45, %v2364_v49  ;;  %v2328_v16 = vadd.f32 %v2327_v38, %v2309_v43  ;;  %v2412_v43 = vadd.f32 %v2411_v33, %v2410_v25  ;;  %v2431_v38 = vrot.slane %v2430_v0, 2 }
 0x1b5   :  { %v2365_v2 = vpop.f32.mrf.mxu2 }
 0x1b6   :  { %v2393_v14 = vpack.c.bf16 %v2383_v13, %v5876_v26  ;;  %v2347_v59 = vadd.f32 %v2346_v9, %v2328_v16  ;;  %v2466_v40 = vmul.f32 %v2383_v13, %v2383_v13 }
 0x1b8   :  { %2401 = vst [vmem:[%s5948_s2 + $0x8] sm:$0xff] %v2393_v14  ;;  %v2366_v51 = vadd.f32 %v2365_v2, %v2347_v59  ;;  %v2502_v14 = vrot.slane %v2501_v21, 2 }
 0x1bb   :  { %v2384_v4 = vpop.f32.mrf.mxu3  ;;  %v2330_v56 = vpop.f32.mrf.mxu0 }
 0x1bc   :  { %v2385_v8 = vadd.f32 %v2384_v4, %v2366_v51  ;;  %v2331_v3 = vadd.f32 %v2330_v56, %v2312_v50  ;;  %v2349_v31 = vpop.f32.mrf.mxu1  ;;  %v2413_v4 = vrot.slane %v2412_v43, 2  ;;  %v2494_v50 = vadd.f32 %v2493_v63, %v2492_v24 }
 0x1bd   :  { %v2368_v6 = vpop.f32.mrf.mxu2 }
 0x1be   :  { %v2395_v26 = vpack.c.bf16 %v2385_v8, %v5878_v47  ;;  %v2350_v15 = vadd.f32 %v2349_v31, %v2331_v3  ;;  %v2475_v47 = vmul.f32 %v5754_v29, %v5754_v29  ;;  %v2470_v29 = vmul.f32 %v2385_v8, %v2385_v8 }
 0x1bf   :  { %v2435_v23 = vadd.f32 %v2385_v8, %v2383_v13  ;;  %v2432_v13 = vadd.f32 %v2431_v38, %v2430_v0  ;;  %v2424_v8 = vrot.slane %v2423_v46, 1  ;;  %v2503_v3 = vadd.f32 %v2502_v14, %v2501_v21 }
 0x1c0   :  { %2403 = vst [vmem:[%s5948_s2 + $0x18] sm:$0xff] %v2395_v26  ;;  %v2369_v18 = vadd.f32 %v2368_v6, %v2350_v15  ;;  %v2481_v39 = vadd.f32 %v2480_v62, %v2475_v47  ;;  %v2506_v32 = vadd.f32 %v2470_v29, %v2466_v40  ;;  %v2414_v19 = vadd.f32 %v2413_v4, %v2412_v43 }
 0x1c1   :  { %v2495_v26 = vrot.slane %v2494_v50, 1  ;;  %v2433_v10 = vrot.slane %v2432_v13, 1  ;;  %v2425_v15 = vadd.f32 %v2424_v8, %v2423_v46  ;;  %v2504_v1 = vrot.slane %v2503_v3, 1 }
 0x1c2   :  { %v2482_v35 = vrot.slane %v2481_v39, 4  ;;  %v2415_v20 = vrot.slane %v2414_v19, 1  ;;  %v2458_v62 = vlaneseq }
 0x1c3   :  { %v2387_v22 = vpop.f32.mrf.mxu3  ;;  %v2332_v60 = vpop.f32.mrf.mxu0  ;;  %v2496_v6 = vadd.f32 %v2495_v26, %v2494_v50  ;;  %v2448_v25 = vrot.slane %v2425_v15, 7  ;;  %v2505_v27 = vadd.f32 %v2504_v1, %v2503_v3 }
 0x1c4   :  { %v2388_v53 = vadd.f32 %v2387_v22, %v2369_v18  ;;  %v2333_v12 = vadd.f32 %v2332_v60, %v2314_v17  ;;  %v2351_v57 = vpop.f32.mrf.mxu1  ;;  %v2483_v16 = vadd.f32 %v2482_v35, %v2481_v39  ;;  %v2434_v22 = vadd.f32 %v2433_v10, %v2432_v13 }
 0x1c5   :  { %v2370_v48 = vpop.f32.mrf.mxu2  ;;  %v2519_v39 = vrot.slane %v2496_v6, 7  ;;  %vm2460_vm4 = vcmp.lt.s32.totalorder %v2458_v62, 512 }
 0x1c6   :  { %v2397_v30 = vpack.c.bf16 %v2388_v53, %v5886_v42  ;;  %v2352_v34 = vadd.f32 %v2351_v57, %v2333_v12  ;;  %v2474_v42 = vmul.f32 %v2388_v53, %v2388_v53  ;;  %v2436_v9 = vadd.f32 %v2435_v23, %v2388_v53 }
 0x1c7   :  { %v2484_v7 = vrot.slane %v2483_v16, 2  ;;  %v2416_v12 = vadd.f32 %v2415_v20, %v2414_v19  ;;  %v2449_v61 = vrot.slane %v2434_v22, 6  ;;  %v2520_v57 = vrot.slane %v2505_v27, 6 }
 0x1c8   :  { %2405 = vst [vmem:[%s5948_s2 + $0x28] sm:$0xff] %v2397_v30  ;;  %v2371_v45 = vadd.f32 %v2370_v48, %v2352_v34  ;;  %v2507_v41 = vadd.f32 %v2506_v32, %v2474_v42 }
 0x1c9   :  { %v2485_v58 = vadd.f32 %v2484_v7, %v2483_v16  ;;  %v2452_v24 = vsel %vm2451_vm1, %v2416_v12, %v2448_v25 }
 0x1cb   :  { %v2389_v49 = vpop.f32.mrf.mxu3  ;;  %v2486_v60 = vrot.slane %v2485_v58, 1 }
 0x1cc   :  { %v2390_v55 = vadd.f32 %v2389_v49, %v2371_v45 }
 0x1cd   :  { %v2487_v33 = vadd.f32 %v2486_v60, %v2485_v58 }
 0x1ce   :  { %v2399_v59 = vpack.c.bf16 %v2390_v55, %v5891_v52  ;;  %v2437_v2 = vadd.f32 %v2436_v9, %v2390_v55  ;;  %v2478_v11 = vmul.f32 %v2390_v55, %v2390_v55 }
 0x1cf   :  { %v2522_v35 = vsel %vm2451_vm1, %v2487_v33, %v2519_v39 }
 0x1d0   :  { %2407 = vst [vmem:[%s5948_s2 + $0x38] sm:$0xff] %v2399_v59  ;;  %v2438_v51 = vrot.slane %v2437_v2, 4  ;;  %v2508_v56 = vadd.f32 %v2507_v41, %v2478_v11 }
 0x1d2   :  { %v2439_v44 = vadd.f32 %v2438_v51, %v2437_v2  ;;  %v2509_v31 = vrot.slane %v2508_v56, 4 }
 0x1d4   :  { %v2440_v52 = vrot.slane %v2439_v44, 2  ;;  %v2510_v36 = vadd.f32 %v2509_v31, %v2508_v56 }
 0x1d6   :  { %v2441_v5 = vadd.f32 %v2440_v52, %v2439_v44  ;;  %v2511_v47 = vrot.slane %v2510_v36, 2 }
 0x1d8   :  { %v2442_v17 = vrot.slane %v2441_v5, 1  ;;  %v2512_v18 = vadd.f32 %v2511_v47, %v2510_v36 }
 0x1da   :  { %v2443_v28 = vadd.f32 %v2442_v17, %v2441_v5  ;;  %v2513_v53 = vrot.slane %v2512_v18, 1 }
 0x1dc   :  { %v2450_v54 = vrot.slane %v2443_v28, 5  ;;  %v2514_v30 = vadd.f32 %v2513_v53, %v2512_v18 }
 0x1de   :  { %v2454_v0 = vsel %vm2453_vm2, %v2449_v61, %v2450_v54  ;;  %v2521_v29 = vrot.slane %v2514_v30, 5 }
 0x1df   :  { %v2456_v34 = vsel %vm2455_vm3, %v2452_v24, %v2454_v0 }
 0x1e0   :  { %2462 = vst.msk [vmem:[%s5949_s3] sm:$0xf] %vm2460_vm4, %v2456_v34  ;;  %v2523_v37 = vsel %vm2453_vm2, %v2520_v57, %v2521_v29 }
 0x1e1   :  { %v2524_v21 = vsel %vm2455_vm3, %v2522_v35, %v2523_v37 }
 0x1e2   :  { %2526 = vst.msk [vmem:[%s5950_s4] sm:$0xf] %vm2460_vm4, %v2524_v21 }

// kernel: segmentation_head.7
= control target key start
LH: loop header
LB: loop body
LE: loop exit
PB: predicated region body
PF: predicated region fallthrough
CT: control target
= control target key end

     0   :  { %8 = vsyncpa [#allocation3], 0  ;;  %s277_s15 = smov [#allocation2]   ;;  %s346_s0 = inlined_call_operand.vmem [shape: f32[2], index: 0, kind: input, shape index: {}]   ;;  %s347_s1 = inlined_call_operand.vmem [shape: bf16[32,128], index: 1, kind: input, shape index: {}]   ;;  %s348_s2 = inlined_call_operand.vmem [shape: bf16[128,128], index: 2, kind: input, shape index: {}]   ;;  %s349_s3 = inlined_call_operand.vmem [shape: bf16[32,128], index: 3, kind: output, shape index: {}]  }
   0x1   :  { %s14_s14 = sshll.u32 %s346_s0, 4  ;;  %s15_s14 = int_to_ptr.vmem [resolvable:$true] %s14_s14 }
   0x2   :  { %17 = dma.vmem_to_smem %s15_s14, 16, %s277_s15, [#allocation3]  }
   0x3   :  { %275 = dma.done.wait [#allocation3], 16  }
   0x4   :  { %276 = vsyncadd [#allocation3], 4294967280 }
   0x5   :  { %26 = sfence }
   0x6   :  { %v233_v0 = vld [vmem:[%s348_s2 + $0x38] sm:$0xff]  ;;  %s27_s18 = sld [smem:[#allocation2]]  ;;  %v232_v1 = vld [vmem:[%s348_s2 + $0x30] sm:$0xff]  ;;  %v231_v2 = vld [vmem:[%s348_s2 + $0x28] sm:$0xff] }
   0x7   :  { %s304_s19 = sld [smem:[#allocation2 + $0x1]]  ;;  %161 = vmatpush.bf16.msra.mxu0 %v233_v0  ;;  %254 = vmatpush.bf16.msra.mxu1 %v233_v0  ;;  %v230_v3 = vld [vmem:[%s348_s2 + $0x20] sm:$0xff]  ;;  %v252_v5 = vld [vmem:[%s347_s1 + $0x8] sm:$0xff]   ;;  %v229_v6 = vld [vmem:[%s348_s2 + $0x18] sm:$0xff] }
   0x8   :  { %v235_v4 = vld [vmem:[%s347_s1] sm:$0xff]   ;;  %v240_v9 = vunpack.c.l.bf16 %v252_v5  ;;  %v241_v11 = vunpack.c.h.bf16 %v252_v5  ;;  %v228_v12 = vld [vmem:[%s348_s2 + $0x10] sm:$0xff]  ;;  %v227_v19 = vld [vmem:[%s348_s2 + $0x8] sm:$0xff] }
   0x9   :  { %v236_v7 = vunpack.c.l.bf16 %v235_v4  ;;  %v237_v8 = vunpack.c.h.bf16 %v235_v4  ;;  %v226_v29 = vld [vmem:[%s348_s2] sm:$0xff] }
   0xb   :  { %162 = vmatpush.bf16.msra.mxu0 %v232_v1  ;;  %255 = vmatpush.bf16.msra.mxu1 %v232_v1 }
   0xc   :  { %p29_p0 = scmp.ne.f32.partialorder %s27_s18, %s27_s18  ;;  %s30_s23 = sshrl.u32 %s27_s18, 16 }
   0xd   :  { %s31_s24 = sand.u32 1, %s30_s23  ;;  %p40_p1 = scmp.ne.f32.partialorder %s304_s19, %s304_s19 }
   0xe   :  { %s32_s25 = sadd.s32 32767, %s31_s24  ;;  %s41_s26 = sshrl.u32 %s304_s19, 16 }
   0xf   :  { %s33_s27 = sadd.s32 %s32_s25, %s27_s18  ;;  %s42_s28 = sand.u32 1, %s41_s26  ;;  %163 = vmatpush.bf16.msra.mxu0 %v231_v2  ;;  %256 = vmatpush.bf16.msra.mxu1 %v231_v2 }
  0x10   :  { %s34_s4 = sand.u32 4294901760, %s33_s27  ;;  %s43_s5 = sadd.s32 32767, %s42_s28 }
  0x11   :  { %s351_s4 = smov (%p29_p0, %s34_s4), 2143289344  ;;  %s44_s6 = sadd.s32 %s304_s19, %s43_s5 }
  0x12   :  { %s37_s7 = sshrl.u32 %s351_s4, 16  ;;  %s45_s8 = sand.u32 4294901760, %s44_s6 }
  0x13   :  { %164 = vmatpush.bf16.msra.mxu0 %v230_v3  ;;  %257 = vmatpush.bf16.msra.mxu1 %v230_v3  ;;  %s353_s8 = smov (%p40_p1, %s45_s8), 2143289344  ;;  %s53_s15 = sshll.u32 %s37_s7, 16 }
  0x14   :  { %s48_s16 = sshrl.u32 %s353_s8, 16  ;;  %s54_s17 = sor.u32 %s53_s15, %s37_s7 }
  0x15   :  { %v55_v10 = vstv %s54_s17  ;;  %s70_s18 = sshll.u32 %s48_s16, 16 }
  0x16   :  { %v61_v13 = vunpack.c.l.bf16 %v55_v10  ;;  %s71_s21 = sor.u32 %s70_s18, %s48_s16 }
  0x17   :  { %165 = vmatpush.bf16.msra.mxu0 %v229_v6  ;;  %258 = vmatpush.bf16.msra.mxu1 %v229_v6  ;;  %v72_v14 = vstv %s71_s21 }
  0x18   :  { %v62_v15 = vsub.f32 %v236_v7, %v61_v13  ;;  %v63_v16 = vsub.f32 %v237_v8, %v61_v13  ;;  %v64_v17 = vsub.f32 %v240_v9, %v61_v13  ;;  %v65_v18 = vsub.f32 %v241_v11, %v61_v13 }
  0x19   :  { %v78_v22 = vunpack.c.l.bf16 %v72_v14 }
  0x1a   :  { %v66_v20 = vpack.c.bf16 %v62_v15, %v62_v15  ;;  %v67_v21 = vpack.c.bf16 %v63_v16, %v63_v16  ;;  %v68_v23 = vpack.c.bf16 %v64_v17, %v64_v17  ;;  %v69_v24 = vpack.c.bf16 %v65_v18, %v65_v18 }
  0x1b   :  { %166 = vmatpush.bf16.msra.mxu0 %v228_v12  ;;  %259 = vmatpush.bf16.msra.mxu1 %v228_v12 }
  0x1c   :  { %v74_v25 = vunpack.c.l.bf16 %v66_v20  ;;  %v75_v26 = vunpack.c.l.bf16 %v67_v21  ;;  %v76_v27 = vunpack.c.l.bf16 %v68_v23  ;;  %v77_v28 = vunpack.c.l.bf16 %v69_v24 }
  0x1e   :  { %v79_v30 = vmul.f32 %v78_v22, %v74_v25  ;;  %v80_v31 = vmul.f32 %v78_v22, %v75_v26  ;;  %v81_v32 = vmul.f32 %v78_v22, %v76_v27  ;;  %v82_v33 = vmul.f32 %v78_v22, %v77_v28 }
  0x1f   :  { %167 = vmatpush.bf16.msra.mxu0 %v227_v19  ;;  %260 = vmatpush.bf16.msra.mxu1 %v227_v19 }
  0x20   :  { %v91_v34 = vmax.f32 %v79_v30, 0.0  ;;  %v92_v35 = vmax.f32 %v80_v31, 0.0  ;;  %v93_v36 = vmax.f32 %v81_v32, 0.0  ;;  %v94_v37 = vmax.f32 %v82_v33, 0.0 }
  0x22   :  { %v95_v38 = vpack.c.bf16 %v92_v35, %v91_v34  ;;  %v96_v39 = vpack.c.bf16 %v94_v37, %v93_v36 }
  0x23   :  { %168 = vmatpush.bf16.msra.mxu0 %v226_v29  ;;  %261 = vmatpush.bf16.msra.mxu1 %v226_v29 }
  0x26   :  { %169 = vmatmul.bf16.vlgmr.msra.gmra.mxu0 %v95_v38  ;;  %174 = vmatmul.bf16.vlgmr.msra.gmra.mxu1 %v96_v39 }
  0xa3   :  { %v170_v40 = vpop.f32.mrf.mxu0  ;;  %v175_v41 = vpop.f32.mrf.mxu1 }
  0xab   :  { %v172_v42 = vpop.f32.mrf.mxu0  ;;  %v177_v43 = vpop.f32.mrf.mxu1 }
  0xac   :  { %v245_v44 = vpack.c.bf16 %v172_v42, %v170_v40  ;;  %v250_v45 = vpack.c.bf16 %v177_v43, %v175_v41 }
  0xae   :  { %246 = vst [vmem:[%s349_s3] sm:$0xff] %v245_v44  }
  0xaf   :  { %253 = vst [vmem:[%s349_s3 + $0x8] sm:$0xff] %v250_v45  }
  0xb0   :  { %192 = vsyncpa [#allocation3], 1 }

</bundles_post_ra>
